<compile_context>
chip_gen: v6e
topology: v6e:2x2x1
jax: 0.10.0
libtpu: 0.0.40
codegen_flags: <defaults>
</compile_context>

<pallas_src>
import functools

import jax
import jax.numpy as jnp
from jax import lax
from jax.experimental import pallas as pl
from jax.experimental.pallas import tpu as pltpu

_LANE = 128


def _lane_fold(v, c_tile):
    """Fold (n_tile, c_tile) down to (n_tile, 128) with lane-dense VPU adds."""
    part = v[:, 0:_LANE]
    for k in range(1, c_tile // _LANE):
        part = part + v[:, k * _LANE:(k + 1) * _LANE]
    return part


def _pass1_kernel(scal_ref, x_ref, invx_ref, w_ref, invw_ref,
                  dot_ref, rowsum_ref, acc_ref,
                  *, c_tile, c_valid_last, matmul_dtype):
    """Normalized matmul, store dot, accumulate per-row e_cos sum."""
    j = pl.program_id(1)
    nj = pl.num_programs(1)

    s = scal_ref[0]  # s (exponent scale; note exp(s*dot) == exp(s*cosa*10))

    # Row-normalize the x tile (inverse norms precomputed outside the kernel).
    xs = x_ref[...] * invx_ref[...]                        # (TN, F) f32

    if matmul_dtype is not None:
        lhs = xs.astype(matmul_dtype)
        rhs = w_ref[...].astype(matmul_dtype)
    else:
        lhs = xs
        rhs = w_ref[...]

    # MXU matmul with f32 accumulation; column-normalize AFTER the dot so the
    # O(F * C_TILE) rescale of w is never materialized per grid step.
    dot = jnp.dot(lhs, rhs, preferred_element_type=jnp.float32)
    dot = dot * invw_ref[...]                              # true cosine in [-1, 1]

    # Single stored (N, C) intermediate (e_cos / e_margin recomputed in pass 2).
    dot_ref[...] = dot.astype(dot_ref.dtype)

    e_cos = jnp.exp(s * dot)                               # == exp(s * cosa * 10)

    @pl.when(j == 0)
    def _():
        acc_ref[...] = jnp.zeros_like(acc_ref)

    if c_valid_last < c_tile:
        # Padding only exists in the last C tile: keep the hot loop mask-free.
        @pl.when(j != nj - 1)
        def _():
            acc_ref[...] += _lane_fold(e_cos, c_tile)

        @pl.when(j == nj - 1)
        def _():
            col = lax.broadcasted_iota(jnp.int32, e_cos.shape, 1)
            e_cos_m = jnp.where(col < c_valid_last, e_cos, 0.0)
            acc_ref[...] += _lane_fold(e_cos_m, c_tile)
    else:
        acc_ref[...] += _lane_fold(e_cos, c_tile)

    # Cross-lane reduce + lane-sparse writeback only once per row tile.
    @pl.when(j == nj - 1)
    def _():
        rowsum_ref[...] = jnp.sum(acc_ref[...], axis=1, keepdims=True)


def _finalize_kernel(scal_ref, dot_ref, rowsum_ref, out_ref):
    """Recompute e_cos / e_margin from the stored dot and normalize."""
    s = scal_ref[0]            # s
    s_cos_m = scal_ref[1]      # s * cos(m)
    s10_sin_m = scal_ref[2]    # 10 * s * sin(m)

    dot = dot_ref[...].astype(jnp.float32)
    cosa = dot * 0.1                                       # reference's "/ 10"
    e_cos = jnp.exp(s * dot)
    # cos(acos(cosa) + m) = cosa*cos(m) - sqrt(1 - cosa^2)*sin(m), with the
    # s*10 factor folded into the host-side scalars.
    arg_margin = s_cos_m * dot - s10_sin_m * jnp.sqrt(
        jnp.maximum(1.0 - cosa * cosa, 0.0))
    e_margin = jnp.exp(arg_margin)

    denom = rowsum_ref[...] - e_cos + e_margin
    out_ref[...] = (e_margin / denom).astype(out_ref.dtype)


def arc_softmax(x, w, s, m, *, n_tile=256, c_tile=1024,
                matmul_dtype=jnp.bfloat16, store_dtype=jnp.float32,
                c_tile_fin_cap=4096, vmem_limit_bytes=32 * 1024 * 1024):
    """Pallas ArcSoftmax forward.

    x: (N, F) float, w: (F, C) float, s/m: scalars.
    matmul_dtype: jnp.bfloat16 (default, fast MXU path on v5e/v6e/v7x) or None
    for f32 MXU inputs; accumulation is f32 either way.  store_dtype controls
    the single (N, C) intermediate (keep f32 for tight numerics at large s).
    """
    assert n_tile % 8 == 0 and c_tile % _LANE == 0
    x = jnp.asarray(x, jnp.float32)
    w = jnp.asarray(w, jnp.float32)
    n, f = x.shape
    f2, c = w.shape
    assert f == f2, "feature dims of x and w must match"

    n_pad = int(pl.cdiv(n, n_tile)) * n_tile
    c_pad = int(pl.cdiv(c, c_tile)) * c_tile
    if n_pad != n:
        x = jnp.pad(x, ((0, n_pad - n), (0, 0)))
    if c_pad != c:
        w = jnp.pad(w, ((0, 0), (0, c_pad - c)))

    # Hoisted normalization reciprocals: two tiny reductions done once, not
    # once per grid step inside the kernel.
    inv_x = 1.0 / jnp.maximum(
        jnp.sqrt(jnp.sum(x * x, axis=1, keepdims=True)), 1e-12)    # (n_pad, 1)
    inv_w = 1.0 / jnp.maximum(
        jnp.sqrt(jnp.sum(w * w, axis=0, keepdims=True)), 1e-12)    # (1, c_pad)

    # Host-folded scalar constants, delivered via scalar prefetch (SMEM).
    s_f = jnp.asarray(s, jnp.float32)
    m_f = jnp.asarray(m, jnp.float32)
    scalars = jnp.stack(
        [s_f, s_f * jnp.cos(m_f), 10.0 * s_f * jnp.sin(m_f)]).astype(jnp.float32)

    n_ctiles = c_pad // c_tile
    c_valid_last = c - (n_ctiles - 1) * c_tile             # static python int
    grid = (n_pad // n_tile, n_ctiles)

    kernel1 = functools.partial(
        _pass1_kernel, c_tile=c_tile, c_valid_last=c_valid_last,
        matmul_dtype=matmul_dtype)

    dot_store, rowsum = pl.pallas_call(
        kernel1,
        out_shape=(
            jax.ShapeDtypeStruct((n_pad, c_pad), store_dtype),   # normalized dot
            jax.ShapeDtypeStruct((n_pad, 1), jnp.float32),       # row-sum of e_cos
        ),
        grid_spec=pltpu.PrefetchScalarGridSpec(
            num_scalar_prefetch=1,
            grid=grid,
            in_specs=[
                pl.BlockSpec((n_tile, f), lambda i, j, scal: (i, 0)),    # x rows
                pl.BlockSpec((n_tile, 1), lambda i, j, scal: (i, 0)),    # 1/||x||
                pl.BlockSpec((f, c_tile), lambda i, j, scal: (0, j)),    # w cols
                pl.BlockSpec((1, c_tile), lambda i, j, scal: (0, j)),    # 1/||w_col||
            ],
            out_specs=[
                pl.BlockSpec((n_tile, c_tile), lambda i, j, scal: (i, j)),
                pl.BlockSpec((n_tile, 1), lambda i, j, scal: (i, 0)),    # resident
            ],
            scratch_shapes=[pltpu.VMEM((n_tile, _LANE), jnp.float32)],   # lane-dense acc
        ),
        compiler_params=pltpu.CompilerParams(
            dimension_semantics=("parallel", "arbitrary"),
            vmem_limit_bytes=vmem_limit_bytes,
        ),
    )(scalars, x, inv_x, w, inv_w)

    # Pass 2: mem-bound elementwise finalize with the largest lane-dense C
    # tile that divides c_pad, is a multiple of 128, and fits the VMEM budget.
    c_tile_fin = min(c_pad, int(c_tile_fin_cap))
    c_tile_fin = (c_tile_fin // _LANE) * _LANE
    while c_pad % c_tile_fin != 0:
        c_tile_fin -= _LANE
    store_bytes = jnp.dtype(store_dtype).itemsize
    # dot (in) + out, each double-buffered.
    while (c_tile_fin > _LANE and
           n_tile * c_tile_fin * (store_bytes + 4) * 2 > 0.75 * vmem_limit_bytes):
        c_tile_fin -= _LANE
        while c_pad % c_tile_fin != 0 and c_tile_fin > _LANE:
            c_tile_fin -= _LANE
    grid_fin = (n_pad // n_tile, c_pad // c_tile_fin)

    out = pl.pallas_call(
        _finalize_kernel,
        out_shape=jax.ShapeDtypeStruct((n_pad, c_pad), jnp.float32),
        grid_spec=pltpu.PrefetchScalarGridSpec(
            num_scalar_prefetch=1,
            grid=grid_fin,
            in_specs=[
                pl.BlockSpec((n_tile, c_tile_fin), lambda i, j, scal: (i, j)),
                pl.BlockSpec((n_tile, 1), lambda i, j, scal: (i, 0)),
            ],
            out_specs=pl.BlockSpec((n_tile, c_tile_fin), lambda i, j, scal: (i, j)),
        ),
        compiler_params=pltpu.CompilerParams(
            dimension_semantics=("parallel", "parallel"),
            vmem_limit_bytes=vmem_limit_bytes,
        ),
    )(scalars, dot_store, rowsum)

    return out[:n, :c]


def arc_softmax_ref(x, w, s, m):
    """Pure-JAX reference mirroring the PyTorch forward exactly."""
    x_norm = x / jnp.maximum(jnp.linalg.norm(x, axis=1, keepdims=True), 1e-12)
    w_norm = w / jnp.maximum(jnp.linalg.norm(w, axis=0, keepdims=True), 1e-12)
    cosa = jnp.matmul(x_norm, w_norm) / 10.0
    a = jnp.arccos(cosa)
    e_margin = jnp.exp(s * jnp.cos(a + m) * 10.0)
    e_cos = jnp.exp(s * cosa * 10.0)
    return e_margin / (jnp.sum(e_cos, axis=1, keepdims=True) - e_cos + e_margin)


if __name__ == "__main__":
    # Small deterministic example: batch=8, feature_num=32, cls_num=600.
    # (cls_num is deliberately not a multiple of the C tile to exercise the
    #  padded-class masking on the last C tile.)
    key = jax.random.PRNGKey(0)
    kx, kw = jax.random.split(key)
    N, FEAT, CLS = 8, 32, 600

    x = jax.random.normal(kx, (N, FEAT), dtype=jnp.float32)
    # nn.Parameter(torch.randn((feature_num, cls_num))) -> deterministic normal init
    w = jax.random.normal(kw, (FEAT, CLS), dtype=jnp.float32)

    s, m = 2.0, 0.5

    ref = arc_softmax_ref(x, w, s, m)

    # f32 MXU path (tight numerics).
    out_f32 = arc_softmax(x, w, s, m, matmul_dtype=None)
    jax.block_until_ready(out_f32)
    assert out_f32.shape == (N, CLS) and out_f32.dtype == jnp.float32
    assert jnp.allclose(out_f32, ref, atol=2e-3, rtol=2e-3), "f32 path mismatch"

    # Default bf16-input MXU path (fast path on v5e/v6e/v7x); f32 accumulation
    # and f32 stored dot / exponent math; looser tolerance for bf16 inputs.
    out_bf16 = arc_softmax(x, w, s, m)
    jax.block_until_ready(out_bf16)
    assert jnp.allclose(out_bf16, ref, atol=3e-2, rtol=3e-2), "bf16 path mismatch"

    print("KERNEL_OK")
</pallas_src>

<mosaic_0001>
module attributes {stable_mosaic.version = 11 : i64} {
  func.func @_pass1_kernel(%arg0: i32, %arg1: i32, %arg2: memref<3xf32, #tpu.memory_space<smem>>, %arg3: memref<256x32xf32, #tpu.memory_space<vmem>>, %arg4: memref<256x1xf32, #tpu.memory_space<vmem>>, %arg5: memref<32x1024xf32, #tpu.memory_space<vmem>>, %arg6: memref<1x1024xf32, #tpu.memory_space<vmem>>, %arg7: memref<256x1024xf32, #tpu.memory_space<vmem>>, %arg8: memref<256x1xf32, #tpu.memory_space<vmem>>, %arg9: memref<256x128xf32, #tpu.memory_space<vmem>>) attributes {dimension_semantics = [#tpu.dimension_semantics<parallel>, #tpu.dimension_semantics<arbitrary>], iteration_bounds = array<i64: 1, 1>, scalar_prefetch = 1 : i64, scratch_operands = 1 : i64, tpu.core_type = #tpu.core_type<tc>, window_params = [{transform_indices = @transform_0, window_bounds = array<i64: 256, 32>}, {transform_indices = @transform_1, window_bounds = array<i64: 256, 1>}, {transform_indices = @transform_2, window_bounds = array<i64: 32, 1024>}, {transform_indices = @transform_3, window_bounds = array<i64: 1, 1024>}, {transform_indices = @transform_4, window_bounds = array<i64: 256, 1024>}, {transform_indices = @transform_5, window_bounds = array<i64: 256, 1>}]} {
    %c0 = arith.constant 0 : index
    %0 = memref.load %arg2[%c0] : memref<3xf32, #tpu.memory_space<smem>>
    %c0_0 = arith.constant 0 : index
    %c0_1 = arith.constant 0 : index
    %1 = vector.load %arg3[%c0_0, %c0_1] : memref<256x32xf32, #tpu.memory_space<vmem>>, vector<256x32xf32>
    %c0_2 = arith.constant 0 : index
    %c0_3 = arith.constant 0 : index
    %2 = vector.load %arg4[%c0_2, %c0_3] : memref<256x1xf32, #tpu.memory_space<vmem>>, vector<256x1xf32>
    %3 = vector.broadcast %2 : vector<256x1xf32> to vector<256x32xf32>
    %4 = arith.mulf %1, %3 : vector<256x32xf32>
    %c0_4 = arith.constant 0 : index
    %c0_5 = arith.constant 0 : index
    %5 = vector.load %arg5[%c0_4, %c0_5] : memref<32x1024xf32, #tpu.memory_space<vmem>>, vector<32x1024xf32>
    %cst = arith.constant dense<0.000000e+00> : vector<256x1024xf32>
    %6 = tpu.matmul %4, %5, %cst {dimension_numbers = #tpu.dot_dimension_numbers<[1], [0], [0], [1], [0, 0, 1, 1], [], []>} : vector<256x32xf32>, vector<32x1024xf32>, vector<256x1024xf32> -> vector<256x1024xf32>
    %c0_6 = arith.constant 0 : index
    %c0_7 = arith.constant 0 : index
    %7 = vector.load %arg6[%c0_6, %c0_7] : memref<1x1024xf32, #tpu.memory_space<vmem>>, vector<1x1024xf32>
    %8 = vector.broadcast %7 : vector<1x1024xf32> to vector<256x1024xf32>
    %9 = arith.mulf %6, %8 : vector<256x1024xf32>
    %c0_8 = arith.constant 0 : index
    %c0_9 = arith.constant 0 : index
    %10 = vector.load %arg7[%c0_8, %c0_9] : memref<256x1024xf32, #tpu.memory_space<vmem>>, vector<256x1024xf32>
    tpu.vector_store %arg7[%c0_8, %c0_9], %9 {strides = array<i32>} : memref<256x1024xf32, #tpu.memory_space<vmem>>, vector<256x1024xf32>,
    %11 = vector.broadcast %0 : f32 to vector<256x1024xf32>
    %12 = arith.mulf %11, %9 : vector<256x1024xf32>
    %13 = math.exp %12 : vector<256x1024xf32>
    %c0_i32 = arith.constant 0 : i32
    %14 = arith.cmpi eq, %arg1, %c0_i32 : i32
    %15 = arith.extui %14 : i1 to i32
    %c0_i32_10 = arith.constant 0 : i32
    %16 = arith.cmpi ne, %15, %c0_i32_10 : i32
    scf.if %16 {
      %cst_17 = arith.constant 0.000000e+00 : f32
      %26 = vector.broadcast %cst_17 : f32 to vector<256x128xf32>
      %c0_18 = arith.constant 0 : index
      %c0_19 = arith.constant 0 : index
      %27 = vector.load %arg9[%c0_18, %c0_19] : memref<256x128xf32, #tpu.memory_space<vmem>>, vector<256x128xf32>
      tpu.vector_store %arg9[%c0_18, %c0_19], %26 {strides = array<i32>} : memref<256x128xf32, #tpu.memory_space<vmem>>, vector<256x128xf32>,
    } else {
    }
    %c0_i32_11 = arith.constant 0 : i32
    %17 = arith.cmpi ne, %arg1, %c0_i32_11 : i32
    %18 = arith.extui %17 : i1 to i32
    %c0_i32_12 = arith.constant 0 : i32
    %19 = arith.cmpi ne, %18, %c0_i32_12 : i32
    scf.if %19 {
      %c0_17 = arith.constant 0 : index
      %c0_18 = arith.constant 0 : index
      %26 = vector.load %arg9[%c0_17, %c0_18] : memref<256x128xf32, #tpu.memory_space<vmem>>, vector<256x128xf32>
      %27 = vector.extract_strided_slice %13 {offsets = [0, 0], sizes = [256, 128], strides = [1, 1]} : vector<256x1024xf32> to vector<256x128xf32>
      %28 = vector.extract_strided_slice %13 {offsets = [0, 128], sizes = [256, 128], strides = [1, 1]} : vector<256x1024xf32> to vector<256x128xf32>
      %29 = arith.addf %27, %28 : vector<256x128xf32>
      %30 = vector.extract_strided_slice %13 {offsets = [0, 256], sizes = [256, 128], strides = [1, 1]} : vector<256x1024xf32> to vector<256x128xf32>
      %31 = arith.addf %29, %30 : vector<256x128xf32>
      %32 = vector.extract_strided_slice %13 {offsets = [0, 384], sizes = [256, 128], strides = [1, 1]} : vector<256x1024xf32> to vector<256x128xf32>
      %33 = arith.addf %31, %32 : vector<256x128xf32>
      %34 = vector.extract_strided_slice %13 {offsets = [0, 512], sizes = [256, 128], strides = [1, 1]} : vector<256x1024xf32> to vector<256x128xf32>
      %35 = arith.addf %33, %34 : vector<256x128xf32>
      %36 = vector.extract_strided_slice %13 {offsets = [0, 640], sizes = [256, 128], strides = [1, 1]} : vector<256x1024xf32> to vector<256x128xf32>
      %37 = arith.addf %35, %36 : vector<256x128xf32>
      %38 = vector.extract_strided_slice %13 {offsets = [0, 768], sizes = [256, 128], strides = [1, 1]} : vector<256x1024xf32> to vector<256x128xf32>
      %39 = arith.addf %37, %38 : vector<256x128xf32>
      %40 = vector.extract_strided_slice %13 {offsets = [0, 896], sizes = [256, 128], strides = [1, 1]} : vector<256x1024xf32> to vector<256x128xf32>
      %41 = arith.addf %39, %40 : vector<256x128xf32>
      %42 = arith.addf %26, %41 : vector<256x128xf32>
      %c0_19 = arith.constant 0 : index
      %c0_20 = arith.constant 0 : index
      %43 = vector.load %arg9[%c0_19, %c0_20] : memref<256x128xf32, #tpu.memory_space<vmem>>, vector<256x128xf32>
      tpu.vector_store %arg9[%c0_19, %c0_20], %42 {strides = array<i32>} : memref<256x128xf32, #tpu.memory_space<vmem>>, vector<256x128xf32>,
    } else {
    }
    %c0_i32_13 = arith.constant 0 : i32
    %20 = arith.cmpi eq, %arg1, %c0_i32_13 : i32
    %21 = arith.extui %20 : i1 to i32
    %c0_i32_14 = arith.constant 0 : i32
    %22 = arith.cmpi ne, %21, %c0_i32_14 : i32
    scf.if %22 {
      %26 = tpu.iota {dimensions = array<i32: 1>} : vector<256x1024xi32>
      %c600_i32 = arith.constant 600 : i32
      %27 = vector.broadcast %c600_i32 : i32 to vector<256x1024xi32>
      %28 = arith.cmpi slt, %26, %27 : vector<256x1024xi32>
      %cst_17 = arith.constant 0.000000e+00 : f32
      %29 = vector.broadcast %cst_17 : f32 to vector<256x1024xf32>
      %30 = arith.select %28, %13, %29 : vector<256x1024xi1>, vector<256x1024xf32>
      %c0_18 = arith.constant 0 : index
      %c0_19 = arith.constant 0 : index
      %31 = vector.load %arg9[%c0_18, %c0_19] : memref<256x128xf32, #tpu.memory_space<vmem>>, vector<256x128xf32>
      %32 = vector.extract_strided_slice %30 {offsets = [0, 0], sizes = [256, 128], strides = [1, 1]} : vector<256x1024xf32> to vector<256x128xf32>
      %33 = vector.extract_strided_slice %30 {offsets = [0, 128], sizes = [256, 128], strides = [1, 1]} : vector<256x1024xf32> to vector<256x128xf32>
      %34 = arith.addf %32, %33 : vector<256x128xf32>
      %35 = vector.extract_strided_slice %30 {offsets = [0, 256], sizes = [256, 128], strides = [1, 1]} : vector<256x1024xf32> to vector<256x128xf32>
      %36 = arith.addf %34, %35 : vector<256x128xf32>
      %37 = vector.extract_strided_slice %30 {offsets = [0, 384], sizes = [256, 128], strides = [1, 1]} : vector<256x1024xf32> to vector<256x128xf32>
      %38 = arith.addf %36, %37 : vector<256x128xf32>
      %39 = vector.extract_strided_slice %30 {offsets = [0, 512], sizes = [256, 128], strides = [1, 1]} : vector<256x1024xf32> to vector<256x128xf32>
      %40 = arith.addf %38, %39 : vector<256x128xf32>
      %41 = vector.extract_strided_slice %30 {offsets = [0, 640], sizes = [256, 128], strides = [1, 1]} : vector<256x1024xf32> to vector<256x128xf32>
      %42 = arith.addf %40, %41 : vector<256x128xf32>
      %43 = vector.extract_strided_slice %30 {offsets = [0, 768], sizes = [256, 128], strides = [1, 1]} : vector<256x1024xf32> to vector<256x128xf32>
      %44 = arith.addf %42, %43 : vector<256x128xf32>
      %45 = vector.extract_strided_slice %30 {offsets = [0, 896], sizes = [256, 128], strides = [1, 1]} : vector<256x1024xf32> to vector<256x128xf32>
      %46 = arith.addf %44, %45 : vector<256x128xf32>
      %47 = arith.addf %31, %46 : vector<256x128xf32>
      %c0_20 = arith.constant 0 : index
      %c0_21 = arith.constant 0 : index
      %48 = vector.load %arg9[%c0_20, %c0_21] : memref<256x128xf32, #tpu.memory_space<vmem>>, vector<256x128xf32>
      tpu.vector_store %arg9[%c0_20, %c0_21], %47 {strides = array<i32>} : memref<256x128xf32, #tpu.memory_space<vmem>>, vector<256x128xf32>,
    } else {
    }
    %c0_i32_15 = arith.constant 0 : i32
    %23 = arith.cmpi eq, %arg1, %c0_i32_15 : i32
    %24 = arith.extui %23 : i1 to i32
    %c0_i32_16 = arith.constant 0 : i32
    %25 = arith.cmpi ne, %24, %c0_i32_16 : i32
    scf.if %25 {
      %c0_17 = arith.constant 0 : index
      %c0_18 = arith.constant 0 : index
      %26 = vector.load %arg9[%c0_17, %c0_18] : memref<256x128xf32, #tpu.memory_space<vmem>>, vector<256x128xf32>
      %cst_19 = arith.constant dense<0.000000e+00> : vector<256xf32>
      %27 = vector.multi_reduction <add>, %26, %cst_19 [1] : vector<256x128xf32> to vector<256xf32>
      %28 = vector.shape_cast %27 : vector<256xf32> to vector<256x1xf32>
      %c0_20 = arith.constant 0 : index
      %c0_21 = arith.constant 0 : index
      %29 = vector.load %arg8[%c0_20, %c0_21] : memref<256x1xf32, #tpu.memory_space<vmem>>, vector<256x1xf32>
      tpu.vector_store %arg8[%c0_20, %c0_21], %28 {strides = array<i32>} : memref<256x1xf32, #tpu.memory_space<vmem>>, vector<256x1xf32>,
    } else {
    }
    return
  }
  func.func @transform_0(%arg0: i32, %arg1: i32, %arg2: memref<3xf32, #tpu.memory_space<smem>>) -> (i32, i32) {
    %c0_i32 = arith.constant 0 : i32
    %c0_i32_0 = arith.constant 0 : i32
    return %arg0, %c0_i32 : i32, i32
  }
  func.func @transform_1(%arg0: i32, %arg1: i32, %arg2: memref<3xf32, #tpu.memory_space<smem>>) -> (i32, i32) {
    %c0_i32 = arith.constant 0 : i32
    %c0_i32_0 = arith.constant 0 : i32
    return %arg0, %c0_i32 : i32, i32
  }
  func.func @transform_2(%arg0: i32, %arg1: i32, %arg2: memref<3xf32, #tpu.memory_space<smem>>) -> (i32, i32) {
    %c0_i32 = arith.constant 0 : i32
    %c0_i32_0 = arith.constant 0 : i32
    return %c0_i32, %arg1 : i32, i32
  }
  func.func @transform_3(%arg0: i32, %arg1: i32, %arg2: memref<3xf32, #tpu.memory_space<smem>>) -> (i32, i32) {
    %c0_i32 = arith.constant 0 : i32
    %c0_i32_0 = arith.constant 0 : i32
    return %c0_i32, %arg1 : i32, i32
  }
  func.func @transform_4(%arg0: i32, %arg1: i32, %arg2: memref<3xf32, #tpu.memory_space<smem>>) -> (i32, i32) {
    %c0_i32 = arith.constant 0 : i32
    return %arg0, %arg1 : i32, i32
  }
  func.func @transform_5(%arg0: i32, %arg1: i32, %arg2: memref<3xf32, #tpu.memory_space<smem>>) -> (i32, i32) {
    %c0_i32 = arith.constant 0 : i32
    %c0_i32_0 = arith.constant 0 : i32
    return %arg0, %c0_i32 : i32, i32
  }
}

</mosaic_0001>

<bundles_post_ra>
// kernel: tpu_custom_call.1
= control target key start
LH: loop header
LB: loop body
LE: loop exit
PB: predicated region body
PF: predicated region fallthrough
CT: control target
= control target key end

     0   :  { %s6278_s0 = inlined_call_operand.vmem [shape: f32[3], index: 0, kind: input, shape index: {}]   ;;  %s6279_s1 = inlined_call_operand.vmem [shape: f32[256,32], index: 1, kind: input, shape index: {}]   ;;  %s6280_s2 = inlined_call_operand.vmem [shape: f32[256,1], index: 2, kind: input, shape index: {}]   ;;  %s6281_s3 = inlined_call_operand.vmem [shape: f32[32,1024], index: 3, kind: input, shape index: {}]   ;;  %s6282_s4 = inlined_call_operand.vmem [shape: f32[1,1024], index: 4, kind: input, shape index: {}]   ;;  %s6283_s5 = inlined_call_operand.hbm [shape: f32[256,1024], index: 5, kind: output, shape index: {0}]   ;;  %s6284_s6 = inlined_call_operand.vmem [shape: f32[256,1], index: 6, kind: output, shape index: {1}]  }
   0x1   :  { %s12_s23 = sshll.u32 %s6278_s0, 4  ;;  %s13_s23 = int_to_ptr.vmem [resolvable:$true] %s12_s23 }
   0x2   :  { %s4325_s24 = scalar_lea.vmem %s13_s23, 16  ;;  %p4330_p1 = scmp.lt.s32.totalorder %s13_s23, %s13_s23 }
   0x3   :  { %p4326_p0 = scmp.ne.s32.totalorder %s13_s23, %s4325_s24  ;;  %p4331_p2 = scmp.lt.s32.totalorder %s4325_s24, %s4325_s24 }
   0x5   :  { %p4332_p3 = por %p4331_p2, %p4330_p1 }
   0x7   :  { %p4333_p4 = pnand %p4332_p3, %p4326_p0 }
   0x9   :  { %4336 = shalt.err (!%p4333_p4)  }
   0xa   :  { %s4361_s25 = smov [#allocation4]  }
   0xb   :  { %15 = dma.vmem_to_smem %s13_s23, 16, %s4361_s25, [#allocation3] }
   0xc   :  { %4357 = dma.done.wait [#allocation3], 16 }
   0xd   :  { %4358 = vsyncadd [#allocation3], 4294967280 }
   0xe   :  { %17 = sfence }
   0xf   :  { %v62_v0 = vld [vmem:[%s6280_s2 + $0x10] sm:$0xff]  ;;  %v60_v1 = vld [vmem:[%s6280_s2] sm:$0xff]  ;;  %v4362_v2 = vmov 0   ;;  %v63_v3 = vld [vmem:[%s6280_s2 + $0x18] sm:$0xff]  ;;  %v6286_v5 = vmov 0.0  }
  0x10   :  { %4004 = vset.pattern.permute.xlu1 %v4362_v2  ;;  %4003 = vset.pattern.permute.xlu0 %v4362_v2  ;;  %v61_v4 = vld [vmem:[%s6280_s2 + $0x8] sm:$0xff]  ;;  %v64_v7 = vld [vmem:[%s6280_s2 + $0x20] sm:$0xff]  ;;  %v67_v8 = vld [vmem:[%s6280_s2 + $0x38] sm:$0xff] }
  0x11   :  { %104 = vperm.xlu1 %4004, %v62_v0   ;;  %94 = vperm.xlu0 %4003, %v60_v1   ;;  %v65_v6 = vld [vmem:[%s6280_s2 + $0x28] sm:$0xff]  ;;  %v66_v9 = vld [vmem:[%s6280_s2 + $0x30] sm:$0xff]  ;;  %v308_v11 = vld [vmem:[%s6281_s3 + $0xc0] sm:$0xff] }
  0x12   :  { %477 = vmatprep.mubr.f32.mxu0 %v6286_v5  ;;  %734 = vmatprep.mubr.f32.mxu1 %v6286_v5  ;;  %v309_v10 = vld [vmem:[%s6281_s3 + $0xc8] sm:$0xff]  ;;  %v311_v12 = vld [vmem:[%s6281_s3 + $0xd8] sm:$0xff]  ;;  %v310_v14 = vld [vmem:[%s6281_s3 + $0xd0] sm:$0xff] }
  0x13   :  { %437 = vmatprep.subr.mxu0 %v309_v10  ;;  %v301_v13 = vld [vmem:[%s6281_s3 + $0x88] sm:$0xff]  ;;  %694 = vmatprep.subr.mxu1 %v311_v12  ;;  %v300_v15 = vld [vmem:[%s6281_s3 + $0x80] sm:$0xff]  ;;  %v303_v16 = vld [vmem:[%s6281_s3 + $0x98] sm:$0xff] }
  0x14   :  { %438 = vmatpush1.msra.mxu0 %v308_v11  ;;  %695 = vmatpush1.msra.mxu1 %v310_v14  ;;  %v293_v17 = vld [vmem:[%s6281_s3 + $0x48] sm:$0xff]  ;;  %v302_v18 = vld [vmem:[%s6281_s3 + $0x90] sm:$0xff]  ;;  %v292_v19 = vld [vmem:[%s6281_s3 + $0x40] sm:$0xff] }
  0x15   :  { %109 = vperm.xlu1 %4004, %v63_v3   ;;  %99 = vperm.xlu0 %4003, %v61_v4   ;;  %v295_v20 = vld [vmem:[%s6281_s3 + $0x58] sm:$0xff]  ;;  %v69_v21 = vld [vmem:[%s6280_s2 + $0x48] sm:$0xff]  ;;  %v68_v22 = vld [vmem:[%s6280_s2 + $0x40] sm:$0xff] }
  0x16   :  { %439 = vmatprep.subr.mxu0 %v301_v13  ;;  %696 = vmatprep.subr.mxu1 %v303_v16  ;;  %v285_v23 = vld [vmem:[%s6281_s3 + $0x8] sm:$0xff]  ;;  %v294_v24 = vld [vmem:[%s6281_s3 + $0x50] sm:$0xff]  ;;  %v284_v25 = vld [vmem:[%s6281_s3] sm:$0xff] }
  0x17   :  { %440 = vmatpush1.msra.mxu0 %v300_v15  ;;  %697 = vmatpush1.msra.mxu1 %v302_v18  ;;  %v287_v26 = vld [vmem:[%s6281_s3 + $0x18] sm:$0xff]  ;;  %v286_v27 = vld [vmem:[%s6281_s3 + $0x10] sm:$0xff]  ;;  %v313_v28 = vld [vmem:[%s6281_s3 + $0xe8] sm:$0xff] }
  0x18   :  { %441 = vmatprep.subr.mxu0 %v293_v17  ;;  %698 = vmatprep.subr.mxu1 %v295_v20  ;;  %v71_v29 = vld [vmem:[%s6280_s2 + $0x58] sm:$0xff]  ;;  %v70_v30 = vld [vmem:[%s6280_s2 + $0x50] sm:$0xff] }
  0x19   :  { %119 = vperm.xlu1 %4004, %v65_v6   ;;  %114 = vperm.xlu0 %4003, %v64_v7  }
  0x1a   :  { %442 = vmatpush1.msra.mxu0 %v292_v19  ;;  %699 = vmatpush1.msra.mxu1 %v294_v24 }
  0x1b   :  { %443 = vmatprep.subr.mxu0 %v285_v23  ;;  %700 = vmatprep.subr.mxu1 %v287_v26 }
  0x1c   :  { %444 = vmatpush1.msra.mxu0 %v284_v25 }
  0x1d   :  { %129 = vperm.xlu1 %4004, %v67_v8   ;;  %124 = vperm.xlu0 %4003, %v66_v9  }
  0x21   :  { %139 = vperm.xlu1 %4004, %v69_v21   ;;  %134 = vperm.xlu0 %4003, %v68_v22  }
  0x22   :  { %18 = vsyncpa [#allocation6], 0  ;;  %701 = vmatpush1.msra.mxu1 %v286_v27  ;;  %951 = vmatprep.subr.mxu0 %v313_v28  ;;  %v73_v31 = vld [vmem:[%s6280_s2 + $0x68] sm:$0xff]  ;;  %v72_v32 = vld [vmem:[%s6280_s2 + $0x60] sm:$0xff]  ;;  %vm316_vm0 = vcmask 261120   ;;  %vm3816_vm2 = vcmask 7168  }
  0x23   :  { %v75_v33 = vld [vmem:[%s6280_s2 + $0x78] sm:$0xff]  ;;  %v74_v34 = vld [vmem:[%s6280_s2 + $0x70] sm:$0xff]  ;;  %v77_v35 = vld [vmem:[%s6280_s2 + $0x88] sm:$0xff] }
  0x24   :  { %v76_v36 = vld [vmem:[%s6280_s2 + $0x80] sm:$0xff]  ;;  %v79_v37 = vld [vmem:[%s6280_s2 + $0x98] sm:$0xff]  ;;  %v78_v38 = vld [vmem:[%s6280_s2 + $0x90] sm:$0xff] }
  0x25   :  { %149 = vperm.xlu1 %4004, %v71_v29   ;;  %144 = vperm.xlu0 %4003, %v70_v30   ;;  %v81_v39 = vld [vmem:[%s6280_s2 + $0xa8] sm:$0xff]  ;;  %v80_v40 = vld [vmem:[%s6280_s2 + $0xa0] sm:$0xff]  ;;  %v83_v41 = vld [vmem:[%s6280_s2 + $0xb8] sm:$0xff] }
  0x26   :  { %v82_v42 = vld [vmem:[%s6280_s2 + $0xb0] sm:$0xff]  ;;  %v85_v43 = vld [vmem:[%s6280_s2 + $0xc8] sm:$0xff]  ;;  %v84_v44 = vld [vmem:[%s6280_s2 + $0xc0] sm:$0xff] }
  0x27   :  { %v87_v45 = vld [vmem:[%s6280_s2 + $0xd8] sm:$0xff]  ;;  %v86_v46 = vld [vmem:[%s6280_s2 + $0xd0] sm:$0xff]  ;;  %v89_v47 = vld [vmem:[%s6280_s2 + $0xe8] sm:$0xff] }
  0x28   :  { %v88_v48 = vld [vmem:[%s6280_s2 + $0xe0] sm:$0xff]  ;;  %v91_v49 = vld [vmem:[%s6280_s2 + $0xf8] sm:$0xff]  ;;  %v90_v50 = vld [vmem:[%s6280_s2 + $0xf0] sm:$0xff] }
  0x29   :  { %159 = vperm.xlu1 %4004, %v73_v31   ;;  %154 = vperm.xlu0 %4003, %v72_v32   ;;  %v315_v51 = vld [vmem:[%s6281_s3 + $0xf8] sm:$0xff]  ;;  %v28_v52 = vld [vmem:[%s6279_s1] sm:$0xff]  ;;  %v29_v56 = vld [vmem:[%s6279_s1 + $0x8] sm:$0xff] }
  0x2a   :  { %1208 = vmatprep.subr.mxu1 %v315_v51  ;;  %v312_v55 = vld [vmem:[%s6281_s3 + $0xe0] sm:$0xff]  ;;  %v305_v57 = vld [vmem:[%s6281_s3 + $0xa8] sm:$0xff]  ;;  %v314_v59 = vld [vmem:[%s6281_s3 + $0xf0] sm:$0xff] }
  0x2b   :  { %v304_v58 = vld [vmem:[%s6281_s3 + $0xa0] sm:$0xff]  ;;  %v30_v60 = vld [vmem:[%s6279_s1 + $0x10] sm:$0xff]  ;;  %v297_v0 = vld [vmem:[%s6281_s3 + $0x68] sm:$0xff] }
  0x2c   :  { %v307_v1 = vld [vmem:[%s6281_s3 + $0xb8] sm:$0xff]  ;;  %v296_v3 = vld [vmem:[%s6281_s3 + $0x60] sm:$0xff]  ;;  %v306_v4 = vld [vmem:[%s6281_s3 + $0xb0] sm:$0xff] }
  0x2d   :  { %169 = vperm.xlu1 %4004, %v75_v33   ;;  %164 = vperm.xlu0 %4003, %v74_v34   ;;  %v31_v6 = vld [vmem:[%s6279_s1 + $0x18] sm:$0xff]  ;;  %v289_v7 = vld [vmem:[%s6281_s3 + $0x28] sm:$0xff]  ;;  %v288_v9 = vld [vmem:[%s6281_s3 + $0x20] sm:$0xff] }
  0x2e   :  { %v299_v8 = vld [vmem:[%s6281_s3 + $0x78] sm:$0xff]  ;;  %v298_v10 = vld [vmem:[%s6281_s3 + $0x70] sm:$0xff]  ;;  %v32_v14 = vld [vmem:[%s6279_s1 + $0x20] sm:$0xff] }
  0x2f   :  { %v291_v15 = vld [vmem:[%s6281_s3 + $0x38] sm:$0xff]  ;;  %v290_v16 = vld [vmem:[%s6281_s3 + $0x30] sm:$0xff]  ;;  %v33_v19 = vld [vmem:[%s6279_s1 + $0x28] sm:$0xff] }
  0x30   :  { %v34_v22 = vld [vmem:[%s6279_s1 + $0x30] sm:$0xff]  ;;  %v35_v25 = vld [vmem:[%s6279_s1 + $0x38] sm:$0xff]  ;;  %v36_v28 = vld [vmem:[%s6279_s1 + $0x40] sm:$0xff] }
  0x31   :  { %179 = vperm.xlu1 %4004, %v77_v35   ;;  %174 = vperm.xlu0 %4003, %v76_v36   ;;  %v37_v31 = vld [vmem:[%s6279_s1 + $0x48] sm:$0xff]  ;;  %v38_v34 = vld [vmem:[%s6279_s1 + $0x50] sm:$0xff] }
  0x35   :  { %189 = vperm.xlu1 %4004, %v79_v37   ;;  %184 = vperm.xlu0 %4003, %v78_v38   ;;  %v39_v37 = vld [vmem:[%s6279_s1 + $0x58] sm:$0xff] }
  0x39   :  { %199 = vperm.xlu1 %4004, %v81_v39   ;;  %194 = vperm.xlu0 %4003, %v80_v40   ;;  %v40_v40 = vld [vmem:[%s6279_s1 + $0x60] sm:$0xff] }
  0x3d   :  { %209 = vperm.xlu1 %4004, %v83_v41   ;;  %204 = vperm.xlu0 %4003, %v82_v42  }
  0x41   :  { %219 = vperm.xlu1 %4004, %v85_v43   ;;  %214 = vperm.xlu0 %4003, %v84_v44   ;;  %v41_v43 = vld [vmem:[%s6279_s1 + $0x68] sm:$0xff] }
  0x45   :  { %229 = vperm.xlu1 %4004, %v87_v45   ;;  %224 = vperm.xlu0 %4003, %v86_v46   ;;  %v42_v46 = vld [vmem:[%s6279_s1 + $0x70] sm:$0xff] }
  0x49   :  { %239 = vperm.xlu1 %4004, %v89_v47   ;;  %234 = vperm.xlu0 %4003, %v88_v48  }
  0x4d   :  { %249 = vperm.xlu1 %4004, %v91_v49   ;;  %244 = vperm.xlu0 %4003, %v90_v50   ;;  %v43_v49 = vld [vmem:[%s6279_s1 + $0x78] sm:$0xff] }
  0x8c   :  { %v95_v53 = vpop.permute.xlu0 %94  ;;  %v105_v63 = vpop.permute.xlu1 %104 }
  0x8d   :  { %v4560_v54 = vmul.f32 %v95_v53, %v28_v52  ;;  %v4594_v2 = vmul.f32 %v105_v63, %v30_v60  ;;  %v44_v52 = vld [vmem:[%s6279_s1 + $0x80] sm:$0xff]  ;;  %v47_v63 = vld [vmem:[%s6279_s1 + $0x98] sm:$0xff] }
  0x8f   :  { %3869 = vmatmul.mubr.msk.f32.vlgmr.msra.gmra.mxu0 %vm316_vm0, %v4560_v54  ;;  %3901 = vmatmul.mubr.msk.f32.vlgmr.msra.gmra.mxu1 %vm316_vm0, %v4560_v54 }
  0x90   :  { %952 = vmatpush1.msra.mxu0 %v312_v55  ;;  %v100_v61 = vpop.permute.xlu0 %99  ;;  %483 = vmatprep.mubr.f32.mxu0 %v6286_v5  ;;  %v110_v11 = vpop.permute.xlu1 %109 }
  0x91   :  { %v4585_v62 = vmul.f32 %v100_v61, %v29_v56  ;;  %740 = vmatprep.mubr.f32.mxu1 %v6286_v5  ;;  %953 = vmatprep.subr.mxu0 %v305_v57  ;;  %v4629_v12 = vmul.f32 %v110_v11, %v31_v6  ;;  %v45_v56 = vld [vmem:[%s6279_s1 + $0x88] sm:$0xff] }
  0x92   :  { %954 = vmatpush1.msra.mxu0 %v304_v58  ;;  %1209 = vmatpush1.msra.mxu1 %v314_v59  ;;  %v46_v59 = vld [vmem:[%s6279_s1 + $0x90] sm:$0xff] }
  0x93   :  { %3870 = vmatmul.mubr.msk.f32.gmra.mxu0 %vm316_vm0, %v4585_v62  ;;  %3902 = vmatmul.mubr.msk.f32.gmra.mxu1 %vm316_vm0, %v4585_v62 }
  0x94   :  { %489 = vmatprep.mubr.f32.mxu0 %v6286_v5  ;;  %746 = vmatprep.mubr.f32.mxu1 %v6286_v5  ;;  %v115_v13 = vpop.permute.xlu0 %114  ;;  %v120_v18 = vpop.permute.xlu1 %119 }
  0x95   :  { %955 = vmatprep.subr.mxu0 %v297_v0  ;;  %1210 = vmatprep.subr.mxu1 %v307_v1  ;;  %v4646_v17 = vmul.f32 %v115_v13, %v32_v14  ;;  %v4657_v20 = vmul.f32 %v120_v18, %v33_v19  ;;  %v51_v14 = vld [vmem:[%s6279_s1 + $0xb8] sm:$0xff]  ;;  %v52_v18 = vld [vmem:[%s6279_s1 + $0xc0] sm:$0xff] }
  0x96   :  { %956 = vmatpush1.msra.mxu0 %v296_v3  ;;  %1211 = vmatpush1.msra.mxu1 %v306_v4  ;;  %v48_v3 = vld [vmem:[%s6279_s1 + $0xa0] sm:$0xff] }
  0x97   :  { %3871 = vmatmul.mubr.msk.f32.gmra.mxu0 %vm316_vm0, %v4594_v2  ;;  %3903 = vmatmul.mubr.msk.f32.gmra.mxu1 %vm316_vm0, %v4594_v2 }
  0x98   :  { %495 = vmatprep.mubr.f32.mxu0 %v6286_v5  ;;  %752 = vmatprep.mubr.f32.mxu1 %v6286_v5  ;;  %v125_v21 = vpop.permute.xlu0 %124  ;;  %v130_v24 = vpop.permute.xlu1 %129 }
  0x99   :  { %957 = vmatprep.subr.mxu0 %v289_v7  ;;  %1212 = vmatprep.subr.mxu1 %v299_v8  ;;  %v4668_v23 = vmul.f32 %v125_v21, %v34_v22  ;;  %v4679_v26 = vmul.f32 %v130_v24, %v35_v25  ;;  %v49_v7 = vld [vmem:[%s6279_s1 + $0xa8] sm:$0xff] }
  0x9a   :  { %958 = vmatpush1.msra.mxu0 %v288_v9  ;;  %1213 = vmatpush1.msra.mxu1 %v298_v10  ;;  %v50_v10 = vld [vmem:[%s6279_s1 + $0xb0] sm:$0xff]  ;;  %v53_v22 = vld [vmem:[%s6279_s1 + $0xc8] sm:$0xff] }
  0x9b   :  { %3872 = vmatmul.mubr.msk.f32.gmra.mxu0 %vm316_vm0, %v4629_v12  ;;  %3904 = vmatmul.mubr.msk.f32.gmra.mxu1 %vm316_vm0, %v4629_v12 }
  0x9c   :  { %501 = vmatprep.mubr.f32.mxu0 %v6286_v5  ;;  %758 = vmatprep.mubr.f32.mxu1 %v6286_v5  ;;  %v135_v27 = vpop.permute.xlu0 %134  ;;  %v140_v30 = vpop.permute.xlu1 %139 }
  0x9d   :  { %1214 = vmatprep.subr.mxu1 %v291_v15  ;;  %v4690_v29 = vmul.f32 %v135_v27, %v36_v28  ;;  %v4701_v32 = vmul.f32 %v140_v30, %v37_v31  ;;  %v54_v27 = vld [vmem:[%s6279_s1 + $0xd0] sm:$0xff]  ;;  %v55_v31 = vld [vmem:[%s6279_s1 + $0xd8] sm:$0xff] }
  0x9e   :  { %1215 = vmatpush1.msra.mxu1 %v290_v16 }
  0x9f   :  { %3873 = vmatmul.mubr.msk.f32.gmra.mxu0 %vm316_vm0, %v4646_v17  ;;  %3905 = vmatmul.mubr.msk.f32.gmra.mxu1 %vm316_vm0, %v4646_v17 }
  0xa0   :  { %507 = vmatprep.mubr.f32.mxu0 %v6286_v5  ;;  %764 = vmatprep.mubr.f32.mxu1 %v6286_v5  ;;  %v145_v33 = vpop.permute.xlu0 %144  ;;  %v150_v36 = vpop.permute.xlu1 %149 }
  0xa1   :  { %v4712_v35 = vmul.f32 %v145_v33, %v38_v34  ;;  %v4723_v38 = vmul.f32 %v150_v36, %v39_v37  ;;  %v56_v36 = vld [vmem:[%s6279_s1 + $0xe0] sm:$0xff] }
  0xa3   :  { %3874 = vmatmul.mubr.msk.f32.gmra.mxu0 %vm316_vm0, %v4657_v20  ;;  %3906 = vmatmul.mubr.msk.f32.gmra.mxu1 %vm316_vm0, %v4657_v20 }
  0xa4   :  { %513 = vmatprep.mubr.f32.mxu0 %v6286_v5  ;;  %770 = vmatprep.mubr.f32.mxu1 %v6286_v5  ;;  %v155_v39 = vpop.permute.xlu0 %154  ;;  %v160_v42 = vpop.permute.xlu1 %159 }
  0xa5   :  { %v4734_v41 = vmul.f32 %v155_v39, %v40_v40  ;;  %v4745_v44 = vmul.f32 %v160_v42, %v41_v43  ;;  %v57_v40 = vld [vmem:[%s6279_s1 + $0xe8] sm:$0xff] }
  0xa7   :  { %3875 = vmatmul.mubr.msk.f32.gmra.mxu0 %vm316_vm0, %v4668_v23  ;;  %3907 = vmatmul.mubr.msk.f32.gmra.mxu1 %vm316_vm0, %v4668_v23 }
  0xa8   :  { %519 = vmatprep.mubr.f32.mxu0 %v6286_v5  ;;  %776 = vmatprep.mubr.f32.mxu1 %v6286_v5  ;;  %v165_v45 = vpop.permute.xlu0 %164  ;;  %v170_v48 = vpop.permute.xlu1 %169 }
  0xa9   :  { %v4756_v47 = vmul.f32 %v165_v45, %v42_v46  ;;  %v4767_v50 = vmul.f32 %v170_v48, %v43_v49  ;;  %v58_v45 = vld [vmem:[%s6279_s1 + $0xf0] sm:$0xff]  ;;  %v59_v49 = vld [vmem:[%s6279_s1 + $0xf8] sm:$0xff]  ;;  %s27_s1 = sld [smem:[#allocation4]] }
  0xab   :  { %3876 = vmatmul.mubr.msk.f32.gmra.mxu0 %vm316_vm0, %v4679_v26  ;;  %3908 = vmatmul.mubr.msk.f32.gmra.mxu1 %vm316_vm0, %v4679_v26 }
  0xac   :  { %525 = vmatprep.mubr.f32.mxu0 %v6286_v5  ;;  %782 = vmatprep.mubr.f32.mxu1 %v6286_v5  ;;  %v175_v51 = vpop.permute.xlu0 %174  ;;  %v180_v55 = vpop.permute.xlu1 %179 }
  0xad   :  { %v4778_v53 = vmul.f32 %v175_v51, %v44_v52  ;;  %v4789_v57 = vmul.f32 %v180_v55, %v45_v56 }
  0xaf   :  { %3877 = vmatmul.mubr.msk.f32.gmra.mxu0 %vm316_vm0, %v4690_v29  ;;  %3909 = vmatmul.mubr.msk.f32.gmra.mxu1 %vm316_vm0, %v4690_v29 }
  0xb0   :  { %531 = vmatprep.mubr.f32.mxu0 %v6286_v5  ;;  %788 = vmatprep.mubr.f32.mxu1 %v6286_v5  ;;  %v185_v58 = vpop.permute.xlu0 %184  ;;  %v190_v61 = vpop.permute.xlu1 %189 }
  0xb1   :  { %v4800_v60 = vmul.f32 %v185_v58, %v46_v59  ;;  %v4811_v0 = vmul.f32 %v190_v61, %v47_v63 }
  0xb3   :  { %3878 = vmatmul.mubr.msk.f32.gmra.mxu0 %vm316_vm0, %v4701_v32  ;;  %3910 = vmatmul.mubr.msk.f32.gmra.mxu1 %vm316_vm0, %v4701_v32 }
  0xb4   :  { %537 = vmatprep.mubr.f32.mxu0 %v6286_v5  ;;  %794 = vmatprep.mubr.f32.mxu1 %v6286_v5  ;;  %v195_v1 = vpop.permute.xlu0 %194  ;;  %v200_v6 = vpop.permute.xlu1 %199 }
  0xb5   :  { %v4822_v4 = vmul.f32 %v195_v1, %v48_v3  ;;  %v4833_v8 = vmul.f32 %v200_v6, %v49_v7 }
  0xb7   :  { %3879 = vmatmul.mubr.msk.f32.gmra.mxu0 %vm316_vm0, %v4712_v35  ;;  %3911 = vmatmul.mubr.msk.f32.gmra.mxu1 %vm316_vm0, %v4712_v35 }
  0xb8   :  { %543 = vmatprep.mubr.f32.mxu0 %v6286_v5  ;;  %800 = vmatprep.mubr.f32.mxu1 %v6286_v5  ;;  %v205_v9 = vpop.permute.xlu0 %204  ;;  %v210_v13 = vpop.permute.xlu1 %209 }
  0xb9   :  { %v4844_v11 = vmul.f32 %v205_v9, %v50_v10  ;;  %v4855_v15 = vmul.f32 %v210_v13, %v51_v14 }
  0xbb   :  { %3880 = vmatmul.mubr.msk.f32.gmra.mxu0 %vm316_vm0, %v4723_v38  ;;  %3912 = vmatmul.mubr.msk.f32.gmra.mxu1 %vm316_vm0, %v4723_v38 }
  0xbc   :  { %549 = vmatprep.mubr.f32.mxu0 %v6286_v5  ;;  %806 = vmatprep.mubr.f32.mxu1 %v6286_v5  ;;  %v215_v16 = vpop.permute.xlu0 %214  ;;  %v220_v21 = vpop.permute.xlu1 %219 }
  0xbd   :  { %v4866_v19 = vmul.f32 %v215_v16, %v52_v18  ;;  %v4877_v24 = vmul.f32 %v220_v21, %v53_v22 }
  0xbf   :  { %3881 = vmatmul.mubr.msk.f32.gmra.mxu0 %vm316_vm0, %v4734_v41  ;;  %3913 = vmatmul.mubr.msk.f32.gmra.mxu1 %vm316_vm0, %v4734_v41 }
  0xc0   :  { %555 = vmatprep.mubr.f32.mxu0 %v6286_v5  ;;  %812 = vmatprep.mubr.f32.mxu1 %v6286_v5  ;;  %v225_v25 = vpop.permute.xlu0 %224  ;;  %v230_v30 = vpop.permute.xlu1 %229 }
  0xc1   :  { %v4888_v28 = vmul.f32 %v225_v25, %v54_v27  ;;  %v4899_v33 = vmul.f32 %v230_v30, %v55_v31 }
  0xc3   :  { %3882 = vmatmul.mubr.msk.f32.gmra.mxu0 %vm316_vm0, %v4745_v44  ;;  %3914 = vmatmul.mubr.msk.f32.gmra.mxu1 %vm316_vm0, %v4745_v44 }
  0xc4   :  { %561 = vmatprep.mubr.f32.mxu0 %v6286_v5  ;;  %818 = vmatprep.mubr.f32.mxu1 %v6286_v5  ;;  %v235_v34 = vpop.permute.xlu0 %234  ;;  %v240_v39 = vpop.permute.xlu1 %239 }
  0xc5   :  { %v4910_v37 = vmul.f32 %v235_v34, %v56_v36  ;;  %v4921_v42 = vmul.f32 %v240_v39, %v57_v40 }
  0xc7   :  { %3883 = vmatmul.mubr.msk.f32.gmra.mxu0 %vm316_vm0, %v4756_v47  ;;  %3915 = vmatmul.mubr.msk.f32.gmra.mxu1 %vm316_vm0, %v4756_v47 }
  0xc8   :  { %567 = vmatprep.mubr.f32.mxu0 %v6286_v5  ;;  %824 = vmatprep.mubr.f32.mxu1 %v6286_v5  ;;  %v245_v43 = vpop.permute.xlu0 %244  ;;  %v250_v48 = vpop.permute.xlu1 %249 }
  0xc9   :  { %v4932_v46 = vmul.f32 %v245_v43, %v58_v45  ;;  %v4943_v51 = vmul.f32 %v250_v48, %v59_v49 }
  0xcb   :  { %3884 = vmatmul.mubr.msk.f32.gmra.mxu0 %vm316_vm0, %v4767_v50  ;;  %3916 = vmatmul.mubr.msk.f32.gmra.mxu1 %vm316_vm0, %v4767_v50 }
  0xcc   :  { %573 = vmatprep.mubr.f32.mxu0 %v6286_v5  ;;  %830 = vmatprep.mubr.f32.mxu1 %v6286_v5 }
  0xcf   :  { %3885 = vmatmul.mubr.msk.f32.gmra.mxu0 %vm316_vm0, %v4778_v53  ;;  %3917 = vmatmul.mubr.msk.f32.gmra.mxu1 %vm316_vm0, %v4778_v53 }
  0xd0   :  { %579 = vmatprep.mubr.f32.mxu0 %v6286_v5  ;;  %836 = vmatprep.mubr.f32.mxu1 %v6286_v5 }
  0xd3   :  { %3886 = vmatmul.mubr.msk.f32.gmra.mxu0 %vm316_vm0, %v4789_v57  ;;  %3918 = vmatmul.mubr.msk.f32.gmra.mxu1 %vm316_vm0, %v4789_v57 }
  0xd4   :  { %585 = vmatprep.mubr.f32.mxu0 %v6286_v5  ;;  %842 = vmatprep.mubr.f32.mxu1 %v6286_v5 }
  0xd7   :  { %3887 = vmatmul.mubr.msk.f32.gmra.mxu0 %vm316_vm0, %v4800_v60  ;;  %3919 = vmatmul.mubr.msk.f32.gmra.mxu1 %vm316_vm0, %v4800_v60 }
  0xd8   :  { %591 = vmatprep.mubr.f32.mxu0 %v6286_v5  ;;  %848 = vmatprep.mubr.f32.mxu1 %v6286_v5 }
  0xdb   :  { %3888 = vmatmul.mubr.msk.f32.gmra.mxu0 %vm316_vm0, %v4811_v0  ;;  %3920 = vmatmul.mubr.msk.f32.gmra.mxu1 %vm316_vm0, %v4811_v0 }
  0xdc   :  { %597 = vmatprep.mubr.f32.mxu0 %v6286_v5  ;;  %854 = vmatprep.mubr.f32.mxu1 %v6286_v5 }
  0xdf   :  { %3889 = vmatmul.mubr.msk.f32.gmra.mxu0 %vm316_vm0, %v4822_v4  ;;  %3921 = vmatmul.mubr.msk.f32.gmra.mxu1 %vm316_vm0, %v4822_v4 }
  0xe0   :  { %603 = vmatprep.mubr.f32.mxu0 %v6286_v5  ;;  %860 = vmatprep.mubr.f32.mxu1 %v6286_v5 }
  0xe3   :  { %3890 = vmatmul.mubr.msk.f32.gmra.mxu0 %vm316_vm0, %v4833_v8  ;;  %3922 = vmatmul.mubr.msk.f32.gmra.mxu1 %vm316_vm0, %v4833_v8 }
  0xe4   :  { %609 = vmatprep.mubr.f32.mxu0 %v6286_v5  ;;  %866 = vmatprep.mubr.f32.mxu1 %v6286_v5 }
  0xe7   :  { %3891 = vmatmul.mubr.msk.f32.gmra.mxu0 %vm316_vm0, %v4844_v11  ;;  %3923 = vmatmul.mubr.msk.f32.gmra.mxu1 %vm316_vm0, %v4844_v11 }
  0xe8   :  { %615 = vmatprep.mubr.f32.mxu0 %v6286_v5  ;;  %872 = vmatprep.mubr.f32.mxu1 %v6286_v5 }
  0xeb   :  { %3892 = vmatmul.mubr.msk.f32.gmra.mxu0 %vm316_vm0, %v4855_v15  ;;  %3924 = vmatmul.mubr.msk.f32.gmra.mxu1 %vm316_vm0, %v4855_v15 }
  0xec   :  { %621 = vmatprep.mubr.f32.mxu0 %v6286_v5  ;;  %878 = vmatprep.mubr.f32.mxu1 %v6286_v5 }
  0xef   :  { %3893 = vmatmul.mubr.msk.f32.gmra.mxu0 %vm316_vm0, %v4866_v19  ;;  %3925 = vmatmul.mubr.msk.f32.gmra.mxu1 %vm316_vm0, %v4866_v19 }
  0xf0   :  { %627 = vmatprep.mubr.f32.mxu0 %v6286_v5  ;;  %884 = vmatprep.mubr.f32.mxu1 %v6286_v5 }
  0xf3   :  { %3894 = vmatmul.mubr.msk.f32.gmra.mxu0 %vm316_vm0, %v4877_v24  ;;  %3926 = vmatmul.mubr.msk.f32.gmra.mxu1 %vm316_vm0, %v4877_v24 }
  0xf4   :  { %633 = vmatprep.mubr.f32.mxu0 %v6286_v5  ;;  %890 = vmatprep.mubr.f32.mxu1 %v6286_v5 }
  0xf7   :  { %3895 = vmatmul.mubr.msk.f32.gmra.mxu0 %vm316_vm0, %v4888_v28  ;;  %3927 = vmatmul.mubr.msk.f32.gmra.mxu1 %vm316_vm0, %v4888_v28 }
  0xf8   :  { %639 = vmatprep.mubr.f32.mxu0 %v6286_v5  ;;  %896 = vmatprep.mubr.f32.mxu1 %v6286_v5 }
  0xfb   :  { %3896 = vmatmul.mubr.msk.f32.gmra.mxu0 %vm316_vm0, %v4899_v33  ;;  %3928 = vmatmul.mubr.msk.f32.gmra.mxu1 %vm316_vm0, %v4899_v33 }
  0xfc   :  { %645 = vmatprep.mubr.f32.mxu0 %v6286_v5  ;;  %902 = vmatprep.mubr.f32.mxu1 %v6286_v5 }
  0xff   :  { %3897 = vmatmul.mubr.msk.f32.gmra.mxu0 %vm316_vm0, %v4910_v37  ;;  %3929 = vmatmul.mubr.msk.f32.gmra.mxu1 %vm316_vm0, %v4910_v37 }
 0x100   :  { %651 = vmatprep.mubr.f32.mxu0 %v6286_v5  ;;  %908 = vmatprep.mubr.f32.mxu1 %v6286_v5 }
 0x103   :  { %3898 = vmatmul.mubr.msk.f32.gmra.mxu0 %vm316_vm0, %v4921_v42  ;;  %3930 = vmatmul.mubr.msk.f32.gmra.mxu1 %vm316_vm0, %v4921_v42 }
 0x104   :  { %657 = vmatprep.mubr.f32.mxu0 %v6286_v5  ;;  %914 = vmatprep.mubr.f32.mxu1 %v6286_v5 }
 0x107   :  { %3899 = vmatmul.mubr.msk.f32.gmra.mxu0 %vm316_vm0, %v4932_v46  ;;  %3931 = vmatmul.mubr.msk.f32.gmra.mxu1 %vm316_vm0, %v4932_v46 }
 0x108   :  { %663 = vmatprep.mubr.f32.mxu0 %v6286_v5  ;;  %920 = vmatprep.mubr.f32.mxu1 %v6286_v5 }
 0x10b   :  { %3900 = vmatmul.mubr.msk.f32.gmra.mxu0 %vm316_vm0, %v4943_v51  ;;  %3932 = vmatmul.mubr.msk.f32.gmra.mxu1 %vm316_vm0, %v4943_v51 }
 0x10c   :  { %991 = vmatprep.mubr.f32.mxu0 %v6286_v5  ;;  %1248 = vmatprep.mubr.f32.mxu1 %v6286_v5 }
 0x10f   :  { %3933 = vmatmul.mubr.msk.f32.vlgmr.msra.gmra.mxu0 %vm316_vm0, %v4560_v54  ;;  %3965 = vmatmul.mubr.msk.f32.vlgmr.msra.gmra.mxu1 %vm316_vm0, %v4560_v54  ;;  %v6285_v54 = vlaneseq }
 0x110   :  { %997 = vmatprep.mubr.f32.mxu0 %v6286_v5  ;;  %1254 = vmatprep.mubr.f32.mxu1 %v6286_v5 }
 0x113   :  { %3934 = vmatmul.mubr.msk.f32.gmra.mxu0 %vm316_vm0, %v4585_v62  ;;  %3966 = vmatmul.mubr.msk.f32.gmra.mxu1 %vm316_vm0, %v4585_v62  ;;  %v5036_v62 = vshrl.u32 %v6285_v54, 7 }
 0x114   :  { %1003 = vmatprep.mubr.f32.mxu0 %v6286_v5  ;;  %1260 = vmatprep.mubr.f32.mxu1 %v6286_v5 }
 0x115   :  { %v1465_v59 = vsub.s32 5, %v5036_v62  ;;  %v1473_v27 = vsub.s32 7, %v5036_v62 }
 0x117   :  { %3935 = vmatmul.mubr.msk.f32.gmra.mxu0 %vm316_vm0, %v4594_v2  ;;  %3967 = vmatmul.mubr.msk.f32.gmra.mxu1 %vm316_vm0, %v4594_v2  ;;  %v1445_v2 = vsub.s32 0, %v5036_v62 }
 0x118   :  { %1009 = vmatprep.mubr.f32.mxu0 %v6286_v5  ;;  %1266 = vmatprep.mubr.f32.mxu1 %v6286_v5 }
 0x11b   :  { %3936 = vmatmul.mubr.msk.f32.gmra.mxu0 %vm316_vm0, %v4629_v12  ;;  %3968 = vmatmul.mubr.msk.f32.gmra.mxu1 %vm316_vm0, %v4629_v12  ;;  %v1453_v12 = vsub.s32 2, %v5036_v62 }
 0x11c   :  { %1015 = vmatprep.mubr.f32.mxu0 %v6286_v5  ;;  %1272 = vmatprep.mubr.f32.mxu1 %v6286_v5 }
 0x11f   :  { %3937 = vmatmul.mubr.msk.f32.gmra.mxu0 %vm316_vm0, %v4646_v17  ;;  %3969 = vmatmul.mubr.msk.f32.gmra.mxu1 %vm316_vm0, %v4646_v17  ;;  %v5049_v17 = vld [vmem:[%s6282_s4] sm:$0xff]  ;;  %s4364_s4 = smov [#allocation5]  }
 0x120   :  { %1021 = vmatprep.mubr.f32.mxu0 %v6286_v5  ;;  %1278 = vmatprep.mubr.f32.mxu1 %v6286_v5  ;;  %v5105_v25 = vrot.slane %v5049_v17, %v1465_v59  ;;  %v5131_v59 = vrot.slane %v5049_v17, %v1473_v27  ;;  %s3854_s3 = sshll.u32 %s4364_s4, 4  ;;  %s3855_s3 = int_to_ptr.vmem [resolvable:$true] %s3854_s3 }
 0x121   :  { %s4337_s14 = scalar_lea.vmem %s3855_s3, 32768  ;;  %p4342_p6 = scmp.lt.s32.totalorder %s3855_s3, %s3855_s3 }
 0x122   :  { %p4338_p5 = scmp.ne.s32.totalorder %s3855_s3, %s4337_s14  ;;  %p4343_p7 = scmp.lt.s32.totalorder %s4337_s14, %s4337_s14 }
 0x123   :  { %3938 = vmatmul.mubr.msk.f32.gmra.mxu0 %vm316_vm0, %v4657_v20  ;;  %3970 = vmatmul.mubr.msk.f32.gmra.mxu1 %vm316_vm0, %v4657_v20  ;;  %v1449_v20 = vsub.s32 1, %v5036_v62 }
 0x124   :  { %1027 = vmatprep.mubr.f32.mxu0 %v6286_v5  ;;  %1284 = vmatprep.mubr.f32.mxu1 %v6286_v5  ;;  %p4344_p8 = por %p4343_p7, %p4342_p6 }
 0x126   :  { %p4345_p9 = pnand %p4344_p8, %p4338_p5 }
 0x127   :  { %3939 = vmatmul.mubr.msk.f32.gmra.mxu0 %vm316_vm0, %v4668_v23  ;;  %3971 = vmatmul.mubr.msk.f32.gmra.mxu1 %vm316_vm0, %v4668_v23  ;;  %v1457_v23 = vsub.s32 3, %v5036_v62 }
 0x128   :  { %1033 = vmatprep.mubr.f32.mxu0 %v6286_v5  ;;  %1290 = vmatprep.mubr.f32.mxu1 %v6286_v5 }
 0x12b   :  { %3940 = vmatmul.mubr.msk.f32.gmra.mxu0 %vm316_vm0, %v4679_v26  ;;  %3972 = vmatmul.mubr.msk.f32.gmra.mxu1 %vm316_vm0, %v4679_v26  ;;  %v5060_v26 = vrot.slane %v5049_v17, %v1445_v2 }
 0x12c   :  { %1039 = vmatprep.mubr.f32.mxu0 %v6286_v5  ;;  %1296 = vmatprep.mubr.f32.mxu1 %v6286_v5 }
 0x12f   :  { %3941 = vmatmul.mubr.msk.f32.gmra.mxu0 %vm316_vm0, %v4690_v29  ;;  %3973 = vmatmul.mubr.msk.f32.gmra.mxu1 %vm316_vm0, %v4690_v29  ;;  %v5063_v29 = vrot.slane %v5049_v17, %v1453_v12 }
 0x130   :  { %1045 = vmatprep.mubr.f32.mxu0 %v6286_v5  ;;  %1302 = vmatprep.mubr.f32.mxu1 %v6286_v5 }
 0x133   :  { %3942 = vmatmul.mubr.msk.f32.gmra.mxu0 %vm316_vm0, %v4701_v32  ;;  %3974 = vmatmul.mubr.msk.f32.gmra.mxu1 %vm316_vm0, %v4701_v32  ;;  %v5066_v32 = vrot.slane %v5049_v17, %v1449_v20 }
 0x134   :  { %1051 = vmatprep.mubr.f32.mxu0 %v6286_v5  ;;  %1308 = vmatprep.mubr.f32.mxu1 %v6286_v5 }
 0x137   :  { %3943 = vmatmul.mubr.msk.f32.gmra.mxu0 %vm316_vm0, %v4712_v35  ;;  %3975 = vmatmul.mubr.msk.f32.gmra.mxu1 %vm316_vm0, %v4712_v35  ;;  %v5069_v35 = vrot.slane %v5049_v17, %v1457_v23 }
 0x138   :  { %1057 = vmatprep.mubr.f32.mxu0 %v6286_v5  ;;  %1314 = vmatprep.mubr.f32.mxu1 %v6286_v5 }
 0x13b   :  { %3944 = vmatmul.mubr.msk.f32.gmra.mxu0 %vm316_vm0, %v4723_v38  ;;  %3976 = vmatmul.mubr.msk.f32.gmra.mxu1 %vm316_vm0, %v4723_v38 }
 0x13c   :  { %1063 = vmatprep.mubr.f32.mxu0 %v6286_v5  ;;  %1320 = vmatprep.mubr.f32.mxu1 %v6286_v5 }
 0x13f   :  { %3945 = vmatmul.mubr.msk.f32.gmra.mxu0 %vm316_vm0, %v4734_v41  ;;  %3977 = vmatmul.mubr.msk.f32.gmra.mxu1 %vm316_vm0, %v4734_v41  ;;  %v5071_v41 = vstv %s27_s1 }
 0x140   :  { %1069 = vmatprep.mubr.f32.mxu0 %v6286_v5  ;;  %1326 = vmatprep.mubr.f32.mxu1 %v6286_v5 }
 0x143   :  { %3946 = vmatmul.mubr.msk.f32.gmra.mxu0 %vm316_vm0, %v4745_v44  ;;  %3978 = vmatmul.mubr.msk.f32.gmra.mxu1 %vm316_vm0, %v4745_v44 }
 0x144   :  { %1075 = vmatprep.mubr.f32.mxu0 %v6286_v5  ;;  %1332 = vmatprep.mubr.f32.mxu1 %v6286_v5 }
 0x147   :  { %3947 = vmatmul.mubr.msk.f32.gmra.mxu0 %vm316_vm0, %v4756_v47  ;;  %3979 = vmatmul.mubr.msk.f32.gmra.mxu1 %vm316_vm0, %v4756_v47  ;;  %v1461_v47 = vsub.s32 4, %v5036_v62 }
 0x148   :  { %1081 = vmatprep.mubr.f32.mxu0 %v6286_v5  ;;  %1338 = vmatprep.mubr.f32.mxu1 %v6286_v5 }
 0x149   :  { %v5093_v7 = vrot.slane %v5049_v17, %v1461_v47 }
 0x14b   :  { %3948 = vmatmul.mubr.msk.f32.gmra.mxu0 %vm316_vm0, %v4767_v50  ;;  %3980 = vmatmul.mubr.msk.f32.gmra.mxu1 %vm316_vm0, %v4767_v50  ;;  %v1469_v50 = vsub.s32 6, %v5036_v62 }
 0x14c   :  { %1087 = vmatprep.mubr.f32.mxu0 %v6286_v5  ;;  %1344 = vmatprep.mubr.f32.mxu1 %v6286_v5 }
 0x14d   :  { %v5096_v9 = vrot.slane %v5049_v17, %v1469_v50 }
 0x14f   :  { %v479_v38 = vpop.f32.mrf.mxu0  ;;  %v736_v44 = vpop.f32.mrf.mxu1  ;;  %3949 = vmatmul.mubr.msk.f32.gmra.mxu0 %vm316_vm0, %v4778_v53  ;;  %3981 = vmatmul.mubr.msk.f32.gmra.mxu1 %vm316_vm0, %v4778_v53 }
 0x150   :  { %v1483_v52 = vmul.f32 %v5060_v26, %v479_v38  ;;  %v1485_v55 = vmul.f32 %v5063_v29, %v736_v44  ;;  %1093 = vmatprep.mubr.f32.mxu0 %v6286_v5  ;;  %1350 = vmatprep.mubr.f32.mxu1 %v6286_v5 }
 0x151   :  { %v481_v56 = vpop.f32.mrf.mxu0  ;;  %v738_v58 = vpop.f32.mrf.mxu1 }
 0x152   :  { %1739 = vst [vmem:[#allocation5] sm:$0xff] %v1483_v52  ;;  %v1996_v61 = vmul.f32 %v5071_v41, %v1483_v52  ;;  %1741 = vst [vmem:[#allocation5 + $0x10] sm:$0xff] %v1485_v55  ;;  %v1998_v53 = vmul.f32 %v5071_v41, %v1485_v55  ;;  %v1484_v63 = vmul.f32 %v5066_v32, %v481_v56 }
 0x153   :  { %v1486_v1 = vmul.f32 %v5069_v35, %v738_v58  ;;  %v485_v3 = vpop.f32.mrf.mxu0  ;;  %v742_v6 = vpop.f32.mrf.mxu1  ;;  %3950 = vmatmul.mubr.msk.f32.gmra.mxu0 %vm316_vm0, %v4789_v57  ;;  %3982 = vmatmul.mubr.msk.f32.gmra.mxu1 %vm316_vm0, %v4789_v57 }
 0x154   :  { %v2252_v10 = vmul.f32 1.442695, %v1996_v61  ;;  %v2256_v13 = vmul.f32 1.442695, %v1998_v53  ;;  %1740 = vst [vmem:[#allocation5 + $0x8] sm:$0xff] %v1484_v63  ;;  %v1997_v14 = vmul.f32 %v5071_v41, %v1484_v63  ;;  %1099 = vmatprep.mubr.f32.mxu0 %v6286_v5  ;;  %1356 = vmatprep.mubr.f32.mxu1 %v6286_v5  ;;  %v1491_v57 = vmul.f32 %v5060_v26, %v485_v3 }
 0x155   :  { %1742 = vst [vmem:[#allocation5 + $0x18] sm:$0xff] %v1486_v1  ;;  %v1999_v16 = vmul.f32 %v5071_v41, %v1486_v1  ;;  %v1493_v18 = vmul.f32 %v5063_v29, %v742_v6  ;;  %v487_v21 = vpop.f32.mrf.mxu0  ;;  %v744_v22 = vpop.f32.mrf.mxu1 }
 0x156   :  { %4005 = vpow2.f32 %v2252_v10  ;;  %v2254_v30 = vmul.f32 1.442695, %v1997_v14  ;;  %v1492_v34 = vmul.f32 %v5066_v32, %v487_v21  ;;  %1747 = vst [vmem:[#allocation5 + $0x40] sm:$0xff] %v1491_v57  ;;  %v2004_v36 = vmul.f32 %v5071_v41, %v1491_v57 }
 0x157   :  { %v2258_v31 = vmul.f32 1.442695, %v1999_v16  ;;  %4007 = vpow2.f32 %v2256_v13  ;;  %1749 = vst [vmem:[#allocation5 + $0x50] sm:$0xff] %v1493_v18  ;;  %v2006_v39 = vmul.f32 %v5071_v41, %v1493_v18  ;;  %v1494_v40 = vmul.f32 %v5069_v35, %v744_v22  ;;  %v491_v43 = vpop.f32.mrf.mxu0  ;;  %v748_v45 = vpop.f32.mrf.mxu1  ;;  %3951 = vmatmul.mubr.msk.f32.gmra.mxu0 %vm316_vm0, %v4800_v60  ;;  %3983 = vmatmul.mubr.msk.f32.gmra.mxu1 %vm316_vm0, %v4800_v60 }
 0x158   :  { %4009 = vpow2.f32 %v2254_v30  ;;  %1748 = vst [vmem:[#allocation5 + $0x48] sm:$0xff] %v1492_v34  ;;  %v2005_v48 = vmul.f32 %v5071_v41, %v1492_v34  ;;  %v1499_v49 = vmul.f32 %v5060_v26, %v491_v43  ;;  %v1501_v62 = vmul.f32 %v5063_v29, %v748_v45  ;;  %1105 = vmatprep.mubr.f32.mxu0 %v6286_v5 }
 0x159   :  { %1362 = vmatprep.mubr.f32.mxu1 %v6286_v5  ;;  %4011 = vpow2.f32 %v2258_v31  ;;  %v2268_v2 = vmul.f32 1.442695, %v2004_v36  ;;  %v2272_v12 = vmul.f32 1.442695, %v2006_v39  ;;  %1750 = vst [vmem:[#allocation5 + $0x58] sm:$0xff] %v1494_v40  ;;  %v2007_v20 = vmul.f32 %v5071_v41, %v1494_v40  ;;  %v493_v23 = vpop.f32.mrf.mxu0  ;;  %v750_v60 = vpop.f32.mrf.mxu1 }
 0x15a   :  { %v2270_v38 = vmul.f32 1.442695, %v2005_v48  ;;  %1755 = vst [vmem:[#allocation5 + $0x80] sm:$0xff] %v1499_v49  ;;  %v2012_v44 = vmul.f32 %v5071_v41, %v1499_v49  ;;  %1757 = vst [vmem:[#allocation5 + $0x90] sm:$0xff] %v1501_v62  ;;  %v2014_v47 = vmul.f32 %v5071_v41, %v1501_v62  ;;  %v1500_v50 = vmul.f32 %v5066_v32, %v493_v23 }
 0x15b   :  { %4013 = vpow2.f32 %v2268_v2  ;;  %v2274_v52 = vmul.f32 1.442695, %v2007_v20  ;;  %v1502_v55 = vmul.f32 %v5069_v35, %v750_v60  ;;  %v497_v56 = vpop.f32.mrf.mxu0  ;;  %v754_v58 = vpop.f32.mrf.mxu1  ;;  %3952 = vmatmul.mubr.msk.f32.gmra.mxu0 %vm316_vm0, %v4811_v0  ;;  %3984 = vmatmul.mubr.msk.f32.gmra.mxu1 %vm316_vm0, %v4811_v0 }
 0x15c   :  { %4015 = vpow2.f32 %v2272_v12  ;;  %v2284_v61 = vmul.f32 1.442695, %v2012_v44  ;;  %v2288_v53 = vmul.f32 1.442695, %v2014_v47  ;;  %1756 = vst [vmem:[#allocation5 + $0x88] sm:$0xff] %v1500_v50  ;;  %v2013_v63 = vmul.f32 %v5071_v41, %v1500_v50  ;;  %1111 = vmatprep.mubr.f32.mxu0 %v6286_v5  ;;  %1368 = vmatprep.mubr.f32.mxu1 %v6286_v5 }
 0x15d   :  { %4017 = vpow2.f32 %v2270_v38  ;;  %1758 = vst [vmem:[#allocation5 + $0x98] sm:$0xff] %v1502_v55  ;;  %v2015_v1 = vmul.f32 %v5071_v41, %v1502_v55  ;;  %v1507_v3 = vmul.f32 %v5060_v26, %v497_v56  ;;  %v1509_v0 = vmul.f32 %v5063_v29, %v754_v58  ;;  %v499_v17 = vpop.f32.mrf.mxu0  ;;  %v756_v6 = vpop.f32.mrf.mxu1 }
 0x15e   :  { %4019 = vpow2.f32 %v2274_v52  ;;  %v2286_v10 = vmul.f32 1.442695, %v2013_v63  ;;  %v1508_v13 = vmul.f32 %v5066_v32, %v499_v17  ;;  %v1510_v14 = vmul.f32 %v5069_v35, %v756_v6 }
 0x15f   :  { %4021 = vpow2.f32 %v2284_v61  ;;  %v2290_v16 = vmul.f32 1.442695, %v2015_v1  ;;  %1763 = vst [vmem:[#allocation5 + $0xc0] sm:$0xff] %v1507_v3  ;;  %v2020_v57 = vmul.f32 %v5071_v41, %v1507_v3  ;;  %1765 = vst [vmem:[#allocation5 + $0xd0] sm:$0xff] %v1509_v0  ;;  %v2022_v18 = vmul.f32 %v5071_v41, %v1509_v0  ;;  %v503_v21 = vpop.f32.mrf.mxu0  ;;  %v760_v22 = vpop.f32.mrf.mxu1  ;;  %3953 = vmatmul.mubr.msk.f32.gmra.mxu0 %vm316_vm0, %v4822_v4 }
 0x160   :  { %3985 = vmatmul.mubr.msk.f32.gmra.mxu1 %vm316_vm0, %v4822_v4  ;;  %4023 = vpow2.f32 %v2288_v53  ;;  %1764 = vst [vmem:[#allocation5 + $0xc8] sm:$0xff] %v1508_v13  ;;  %v2021_v27 = vmul.f32 %v5071_v41, %v1508_v13  ;;  %1766 = vst [vmem:[#allocation5 + $0xd8] sm:$0xff] %v1510_v14  ;;  %v2023_v30 = vmul.f32 %v5071_v41, %v1510_v14  ;;  %1117 = vmatprep.mubr.f32.mxu0 %v6286_v5 }
 0x161   :  { %v1515_v31 = vmul.f32 %v5060_v26, %v503_v21  ;;  %1374 = vmatprep.mubr.f32.mxu1 %v6286_v5  ;;  %4025 = vpow2.f32 %v2286_v10  ;;  %v2300_v34 = vmul.f32 1.442695, %v2020_v57  ;;  %v2304_v36 = vmul.f32 1.442695, %v2022_v18  ;;  %v505_v40 = vpop.f32.mrf.mxu0  ;;  %v762_v4 = vpop.f32.mrf.mxu1 }
 0x162   :  { %v1517_v39 = vmul.f32 %v5063_v29, %v760_v22  ;;  %4027 = vpow2.f32 %v2290_v16  ;;  %v2302_v43 = vmul.f32 1.442695, %v2021_v27  ;;  %v2306_v45 = vmul.f32 1.442695, %v2023_v30 }
 0x163   :  { %1771 = vst [vmem:[#allocation5 + $0x100] sm:$0xff] %v1515_v31  ;;  %v2028_v48 = vmul.f32 %v5071_v41, %v1515_v31  ;;  %v5154_v49 = vpop.eup %4005  ;;  %4029 = vpow2.f32 %v2300_v34  ;;  %v1516_v2 = vmul.f32 %v5066_v32, %v505_v40  ;;  %v1518_v12 = vmul.f32 %v5069_v35, %v762_v4  ;;  %v509_v20 = vpop.f32.mrf.mxu0  ;;  %3954 = vmatmul.mubr.msk.f32.gmra.mxu0 %vm316_vm0, %v4833_v8 }
 0x164   :  { %1773 = vst [vmem:[#allocation5 + $0x110] sm:$0xff] %v1517_v39  ;;  %v2030_v62 = vmul.f32 %v5071_v41, %v1517_v39  ;;  %v766_v23 = vpop.f32.mrf.mxu1  ;;  %3986 = vmatmul.mubr.msk.f32.gmra.mxu1 %vm316_vm0, %v4833_v8  ;;  %v5163_v60 = vpop.eup %4007  ;;  %4031 = vpow2.f32 %v2304_v36  ;;  %v1523_v44 = vmul.f32 %v5060_v26, %v509_v20  ;;  %1123 = vmatprep.mubr.f32.mxu0 %v6286_v5 }
 0x165   :  { %v2316_v38 = vmul.f32 1.442695, %v2028_v48  ;;  %v1525_v47 = vmul.f32 %v5063_v29, %v766_v23  ;;  %1380 = vmatprep.mubr.f32.mxu1 %v6286_v5  ;;  %v5169_v50 = vpop.eup %4009  ;;  %4033 = vpow2.f32 %v2302_v43  ;;  %1772 = vst [vmem:[#allocation5 + $0x108] sm:$0xff] %v1516_v2  ;;  %v2029_v55 = vmul.f32 %v5071_v41, %v1516_v2  ;;  %1774 = vst [vmem:[#allocation5 + $0x118] sm:$0xff] %v1518_v12  ;;  %v511_v56 = vpop.f32.mrf.mxu0 }
 0x166   :  { %v2320_v52 = vmul.f32 1.442695, %v2030_v62  ;;  %v2031_v8 = vmul.f32 %v5071_v41, %v1518_v12  ;;  %v768_v58 = vpop.f32.mrf.mxu1  ;;  %v5173_v61 = vpop.eup %4011  ;;  %4035 = vpow2.f32 %v2306_v45  ;;  %1779 = vst [vmem:[#allocation5 + $0x140] sm:$0xff] %v1523_v44  ;;  %v2036_v53 = vmul.f32 %v5071_v41, %v1523_v44 }
 0x167   :  { %1781 = vst [vmem:[#allocation5 + $0x150] sm:$0xff] %v1525_v47  ;;  %v2038_v63 = vmul.f32 %v5071_v41, %v1525_v47  ;;  %v1524_v1 = vmul.f32 %v5066_v32, %v511_v56  ;;  %4037 = vpow2.f32 %v2316_v38  ;;  %v2318_v3 = vmul.f32 1.442695, %v2029_v55  ;;  %v515_v6 = vpop.f32.mrf.mxu0  ;;  %3955 = vmatmul.mubr.msk.f32.gmra.mxu0 %vm316_vm0, %v4844_v11 }
 0x168   :  { %v2322_v0 = vmul.f32 1.442695, %v2031_v8  ;;  %v1526_v17 = vmul.f32 %v5069_v35, %v768_v58  ;;  %v772_v10 = vpop.f32.mrf.mxu1  ;;  %3987 = vmatmul.mubr.msk.f32.gmra.mxu1 %vm316_vm0, %v4844_v11  ;;  %v5183_v13 = vpop.eup %4013  ;;  %4039 = vpow2.f32 %v2320_v52  ;;  %v2332_v14 = vmul.f32 1.442695, %v2036_v53  ;;  %1129 = vmatprep.mubr.f32.mxu0 %v6286_v5 }
 0x169   :  { %v2336_v16 = vmul.f32 1.442695, %v2038_v63  ;;  %1780 = vst [vmem:[#allocation5 + $0x148] sm:$0xff] %v1524_v1  ;;  %v2037_v57 = vmul.f32 %v5071_v41, %v1524_v1  ;;  %1386 = vmatprep.mubr.f32.mxu1 %v6286_v5  ;;  %v5188_v18 = vpop.eup %4015  ;;  %4041 = vpow2.f32 %v2318_v3  ;;  %v1531_v11 = vmul.f32 %v5060_v26, %v515_v6  ;;  %v517_v27 = vpop.f32.mrf.mxu0 }
 0x16a   :  { %1782 = vst [vmem:[#allocation5 + $0x158] sm:$0xff] %v1526_v17  ;;  %v2039_v21 = vmul.f32 %v5071_v41, %v1526_v17  ;;  %v1533_v22 = vmul.f32 %v5063_v29, %v772_v10  ;;  %v774_v30 = vpop.f32.mrf.mxu1  ;;  %v5193_v31 = vpop.eup %4017  ;;  %4043 = vpow2.f32 %v2322_v0  ;;  %v1532_v36 = vmul.f32 %v5066_v32, %v517_v27 }
 0x16b   :  { %v2334_v34 = vmul.f32 1.442695, %v2037_v57  ;;  %v1534_v39 = vmul.f32 %v5069_v35, %v774_v30  ;;  %v5197_v40 = vpop.eup %4019  ;;  %4045 = vpow2.f32 %v2332_v14  ;;  %1787 = vst [vmem:[#allocation5 + $0x180] sm:$0xff] %v1531_v11  ;;  %v2044_v43 = vmul.f32 %v5071_v41, %v1531_v11  ;;  %v521_v48 = vpop.f32.mrf.mxu0  ;;  %3956 = vmatmul.mubr.msk.f32.gmra.mxu0 %vm316_vm0, %v4855_v15 }
 0x16c   :  { %v2338_v4 = vmul.f32 1.442695, %v2039_v21  ;;  %1789 = vst [vmem:[#allocation5 + $0x190] sm:$0xff] %v1533_v22  ;;  %v2046_v45 = vmul.f32 %v5071_v41, %v1533_v22  ;;  %v778_v62 = vpop.f32.mrf.mxu1  ;;  %3988 = vmatmul.mubr.msk.f32.gmra.mxu1 %vm316_vm0, %v4855_v15  ;;  %v5205_v2 = vpop.eup %4021  ;;  %4047 = vpow2.f32 %v2336_v16  ;;  %1788 = vst [vmem:[#allocation5 + $0x188] sm:$0xff] %v1532_v36  ;;  %v2045_v12 = vmul.f32 %v5071_v41, %v1532_v36 }
 0x16d   :  { %1790 = vst [vmem:[#allocation5 + $0x198] sm:$0xff] %v1534_v39  ;;  %v2047_v20 = vmul.f32 %v5071_v41, %v1534_v39  ;;  %v1539_v23 = vmul.f32 %v5060_v26, %v521_v48  ;;  %1135 = vmatprep.mubr.f32.mxu0 %v6286_v5  ;;  %1392 = vmatprep.mubr.f32.mxu1 %v6286_v5  ;;  %v5212_v38 = vpop.eup %4023  ;;  %4049 = vpow2.f32 %v2334_v34  ;;  %v2348_v44 = vmul.f32 1.442695, %v2044_v43  ;;  %v523_v52 = vpop.f32.mrf.mxu0 }
 0x16e   :  { %v2352_v15 = vmul.f32 1.442695, %v2046_v45  ;;  %v1541_v47 = vmul.f32 %v5063_v29, %v778_v62  ;;  %v780_v55 = vpop.f32.mrf.mxu1  ;;  %v5215_v8 = vpop.eup %4025  ;;  %4051 = vpow2.f32 %v2338_v4  ;;  %v2350_v56 = vmul.f32 1.442695, %v2045_v12 }
 0x16f   :  { %v2354_v58 = vmul.f32 1.442695, %v2047_v20  ;;  %1795 = vst [vmem:[#allocation5 + $0x1c0] sm:$0xff] %v1539_v23  ;;  %v2052_v53 = vmul.f32 %v5071_v41, %v1539_v23  ;;  %v5218_v63 = vpop.eup %4027  ;;  %4053 = vpow2.f32 %v2348_v44  ;;  %v1540_v3 = vmul.f32 %v5066_v32, %v523_v52  ;;  %v527_v17 = vpop.f32.mrf.mxu0  ;;  %3957 = vmatmul.mubr.msk.f32.gmra.mxu0 %vm316_vm0, %v4866_v19 }
 0x170   :  { %1797 = vst [vmem:[#allocation5 + $0x1d0] sm:$0xff] %v1541_v47  ;;  %v2054_v1 = vmul.f32 %v5071_v41, %v1541_v47  ;;  %v1542_v0 = vmul.f32 %v5069_v35, %v780_v55  ;;  %v784_v6 = vpop.f32.mrf.mxu1  ;;  %3989 = vmatmul.mubr.msk.f32.gmra.mxu1 %vm316_vm0, %v4866_v19  ;;  %v5227_v10 = vpop.eup %4029  ;;  %4055 = vpow2.f32 %v2352_v15  ;;  %v1547_v16 = vmul.f32 %v5060_v26, %v527_v17 }
 0x171   :  { %v2364_v14 = vmul.f32 1.442695, %v2052_v53  ;;  %v1549_v57 = vmul.f32 %v5063_v29, %v784_v6  ;;  %1141 = vmatprep.mubr.f32.mxu0 %v6286_v5  ;;  %1398 = vmatprep.mubr.f32.mxu1 %v6286_v5  ;;  %v5233_v21 = vpop.eup %4031  ;;  %4057 = vpow2.f32 %v2350_v56  ;;  %1796 = vst [vmem:[#allocation5 + $0x1c8] sm:$0xff] %v1540_v3  ;;  %v2053_v22 = vmul.f32 %v5071_v41, %v1540_v3  ;;  %v529_v27 = vpop.f32.mrf.mxu0 }
 0x172   :  { %v2368_v11 = vmul.f32 1.442695, %v2054_v1  ;;  %1798 = vst [vmem:[#allocation5 + $0x1d8] sm:$0xff] %v1542_v0  ;;  %v2055_v19 = vmul.f32 %v5071_v41, %v1542_v0  ;;  %v786_v30 = vpop.f32.mrf.mxu1  ;;  %v5237_v34 = vpop.eup %4033  ;;  %4059 = vpow2.f32 %v2354_v58  ;;  %1803 = vst [vmem:[#allocation5 + $0x200] sm:$0xff] %v1547_v16  ;;  %v2060_v36 = vmul.f32 %v5071_v41, %v1547_v16 }
 0x173   :  { %1805 = vst [vmem:[#allocation5 + $0x210] sm:$0xff] %v1549_v57  ;;  %v2062_v39 = vmul.f32 %v5071_v41, %v1549_v57  ;;  %v1548_v4 = vmul.f32 %v5066_v32, %v529_v27  ;;  %v5242_v43 = vpop.eup %4035  ;;  %4061 = vpow2.f32 %v2364_v14  ;;  %v2366_v45 = vmul.f32 1.442695, %v2053_v22  ;;  %v533_v12 = vpop.f32.mrf.mxu0  ;;  %3958 = vmatmul.mubr.msk.f32.gmra.mxu0 %vm316_vm0, %v4877_v24 }
 0x174   :  { %v2370_v48 = vmul.f32 1.442695, %v2055_v19  ;;  %v1550_v62 = vmul.f32 %v5069_v35, %v786_v30  ;;  %v790_v20 = vpop.f32.mrf.mxu1  ;;  %3990 = vmatmul.mubr.msk.f32.gmra.mxu1 %vm316_vm0, %v4877_v24  ;;  %v5249_v23 = vpop.eup %4037  ;;  %4063 = vpow2.f32 %v2368_v11  ;;  %v2380_v44 = vmul.f32 1.442695, %v2060_v36  ;;  %1147 = vmatprep.mubr.f32.mxu0 %v6286_v5 }
 0x175   :  { %v2384_v15 = vmul.f32 1.442695, %v2062_v39  ;;  %1804 = vst [vmem:[#allocation5 + $0x208] sm:$0xff] %v1548_v4  ;;  %v2061_v47 = vmul.f32 %v5071_v41, %v1548_v4  ;;  %1404 = vmatprep.mubr.f32.mxu1 %v6286_v5  ;;  %v5254_v52 = vpop.eup %4039  ;;  %4065 = vpow2.f32 %v2366_v45  ;;  %v1555_v24 = vmul.f32 %v5060_v26, %v533_v12  ;;  %v535_v58 = vpop.f32.mrf.mxu0 }
 0x176   :  { %1806 = vst [vmem:[#allocation5 + $0x218] sm:$0xff] %v1550_v62  ;;  %v2063_v55 = vmul.f32 %v5071_v41, %v1550_v62  ;;  %v1557_v56 = vmul.f32 %v5063_v29, %v790_v20  ;;  %v792_v53 = vpop.f32.mrf.mxu1  ;;  %v5259_v1 = vpop.eup %4041  ;;  %4067 = vpow2.f32 %v2370_v48  ;;  %v1556_v0 = vmul.f32 %v5066_v32, %v535_v58 }
 0x177   :  { %v2382_v3 = vmul.f32 1.442695, %v2061_v47  ;;  %v1558_v17 = vmul.f32 %v5069_v35, %v792_v53  ;;  %v5263_v6 = vpop.eup %4043  ;;  %4069 = vpow2.f32 %v2380_v44  ;;  %1811 = vst [vmem:[#allocation5 + $0x240] sm:$0xff] %v1555_v24  ;;  %v2068_v16 = vmul.f32 %v5071_v41, %v1555_v24  ;;  %v539_v11 = vpop.f32.mrf.mxu0  ;;  %3959 = vmatmul.mubr.msk.f32.gmra.mxu0 %vm316_vm0, %v4888_v28 }
 0x178   :  { %v2386_v14 = vmul.f32 1.442695, %v2063_v55  ;;  %1813 = vst [vmem:[#allocation5 + $0x250] sm:$0xff] %v1557_v56  ;;  %v2070_v57 = vmul.f32 %v5071_v41, %v1557_v56  ;;  %v796_v22 = vpop.f32.mrf.mxu1  ;;  %3991 = vmatmul.mubr.msk.f32.gmra.mxu1 %vm316_vm0, %v4888_v28  ;;  %v5271_v19 = vpop.eup %4045  ;;  %4071 = vpow2.f32 %v2384_v15  ;;  %1812 = vst [vmem:[#allocation5 + $0x248] sm:$0xff] %v1556_v0  ;;  %v2069_v27 = vmul.f32 %v5071_v41, %v1556_v0 }
 0x179   :  { %1814 = vst [vmem:[#allocation5 + $0x258] sm:$0xff] %v1558_v17  ;;  %v2071_v30 = vmul.f32 %v5071_v41, %v1558_v17  ;;  %v1563_v36 = vmul.f32 %v5060_v26, %v539_v11  ;;  %1153 = vmatprep.mubr.f32.mxu0 %v6286_v5  ;;  %1410 = vmatprep.mubr.f32.mxu1 %v6286_v5  ;;  %v5278_v39 = vpop.eup %4047  ;;  %4073 = vpow2.f32 %v2382_v3  ;;  %v2396_v4 = vmul.f32 1.442695, %v2068_v16  ;;  %v541_v48 = vpop.f32.mrf.mxu0 }
 0x17a   :  { %v2400_v28 = vmul.f32 1.442695, %v2070_v57  ;;  %v1565_v45 = vmul.f32 %v5063_v29, %v796_v22  ;;  %v798_v62 = vpop.f32.mrf.mxu1  ;;  %v5281_v12 = vpop.eup %4049  ;;  %4075 = vpow2.f32 %v2386_v14  ;;  %v2398_v20 = vmul.f32 1.442695, %v2069_v27 }
 0x17b   :  { %v2402_v44 = vmul.f32 1.442695, %v2071_v30  ;;  %1819 = vst [vmem:[#allocation5 + $0x280] sm:$0xff] %v1563_v36  ;;  %v2076_v15 = vmul.f32 %v5071_v41, %v1563_v36  ;;  %v5284_v47 = vpop.eup %4051  ;;  %4077 = vpow2.f32 %v2396_v4  ;;  %v1564_v24 = vmul.f32 %v5066_v32, %v541_v48  ;;  %v545_v58 = vpop.f32.mrf.mxu0  ;;  %3960 = vmatmul.mubr.msk.f32.gmra.mxu0 %vm316_vm0, %v4899_v33 }
 0x17c   :  { %1821 = vst [vmem:[#allocation5 + $0x290] sm:$0xff] %v1565_v45  ;;  %v2078_v55 = vmul.f32 %v5071_v41, %v1565_v45  ;;  %v1566_v56 = vmul.f32 %v5069_v35, %v798_v62  ;;  %v802_v53 = vpop.f32.mrf.mxu1  ;;  %3992 = vmatmul.mubr.msk.f32.gmra.mxu1 %vm316_vm0, %v4899_v33  ;;  %v5293_v3 = vpop.eup %4053  ;;  %4079 = vpow2.f32 %v2400_v28  ;;  %v1571_v17 = vmul.f32 %v5060_v26, %v545_v58 }
 0x17d   :  { %v2412_v0 = vmul.f32 1.442695, %v2076_v15  ;;  %v1573_v14 = vmul.f32 %v5063_v29, %v802_v53  ;;  %1159 = vmatprep.mubr.f32.mxu0 %v6286_v5  ;;  %1416 = vmatprep.mubr.f32.mxu1 %v6286_v5  ;;  %v5299_v16 = vpop.eup %4055  ;;  %4081 = vpow2.f32 %v2398_v20  ;;  %1820 = vst [vmem:[#allocation5 + $0x288] sm:$0xff] %v1564_v24  ;;  %v2077_v11 = vmul.f32 %v5071_v41, %v1564_v24  ;;  %v547_v22 = vpop.f32.mrf.mxu0 }
 0x17e   :  { %v2416_v57 = vmul.f32 1.442695, %v2078_v55  ;;  %1822 = vst [vmem:[#allocation5 + $0x298] sm:$0xff] %v1566_v56  ;;  %v2079_v33 = vmul.f32 %v5071_v41, %v1566_v56  ;;  %v804_v27 = vpop.f32.mrf.mxu1  ;;  %v5303_v30 = vpop.eup %4057  ;;  %4083 = vpow2.f32 %v2402_v44  ;;  %1827 = vst [vmem:[#allocation5 + $0x2c0] sm:$0xff] %v1571_v17  ;;  %v2084_v36 = vmul.f32 %v5071_v41, %v1571_v17 }
 0x17f   :  { %1829 = vst [vmem:[#allocation5 + $0x2d0] sm:$0xff] %v1573_v14  ;;  %v2086_v4 = vmul.f32 %v5071_v41, %v1573_v14  ;;  %v1572_v28 = vmul.f32 %v5066_v32, %v547_v22  ;;  %v5308_v45 = vpop.eup %4059  ;;  %4085 = vpow2.f32 %v2412_v0  ;;  %v2414_v48 = vmul.f32 1.442695, %v2077_v11  ;;  %v551_v15 = vpop.f32.mrf.mxu0  ;;  %3961 = vmatmul.mubr.msk.f32.gmra.mxu0 %vm316_vm0, %v4910_v37 }
 0x180   :  { %v2418_v62 = vmul.f32 1.442695, %v2079_v33  ;;  %v1574_v20 = vmul.f32 %v5069_v35, %v804_v27  ;;  %v808_v55 = vpop.f32.mrf.mxu1  ;;  %3993 = vmatmul.mubr.msk.f32.gmra.mxu1 %vm316_vm0, %v4910_v37  ;;  %v5315_v44 = vpop.eup %4061  ;;  %4087 = vpow2.f32 %v2416_v57  ;;  %v2428_v24 = vmul.f32 1.442695, %v2084_v36  ;;  %1165 = vmatprep.mubr.f32.mxu0 %v6286_v5 }
 0x181   :  { %v2432_v56 = vmul.f32 1.442695, %v2086_v4  ;;  %1828 = vst [vmem:[#allocation5 + $0x2c8] sm:$0xff] %v1572_v28  ;;  %v2085_v58 = vmul.f32 %v5071_v41, %v1572_v28  ;;  %1422 = vmatprep.mubr.f32.mxu1 %v6286_v5  ;;  %v5320_v53 = vpop.eup %4063  ;;  %4089 = vpow2.f32 %v2414_v48  ;;  %v1579_v37 = vmul.f32 %v5060_v26, %v551_v15  ;;  %v553_v14 = vpop.f32.mrf.mxu0 }
 0x182   :  { %1830 = vst [vmem:[#allocation5 + $0x2d8] sm:$0xff] %v1574_v20  ;;  %v2087_v0 = vmul.f32 %v5071_v41, %v1574_v20  ;;  %v1581_v17 = vmul.f32 %v5063_v29, %v808_v55  ;;  %v810_v57 = vpop.f32.mrf.mxu1  ;;  %v5325_v11 = vpop.eup %4065  ;;  %4091 = vpow2.f32 %v2418_v62  ;;  %v1580_v22 = vmul.f32 %v5066_v32, %v553_v14 }
 0x183   :  { %v2430_v33 = vmul.f32 1.442695, %v2085_v58  ;;  %v1582_v27 = vmul.f32 %v5069_v35, %v810_v57  ;;  %v5329_v36 = vpop.eup %4067  ;;  %4093 = vpow2.f32 %v2428_v24  ;;  %1835 = vst [vmem:[#allocation5 + $0x300] sm:$0xff] %v1579_v37  ;;  %v2092_v28 = vmul.f32 %v5071_v41, %v1579_v37  ;;  %v557_v20 = vpop.f32.mrf.mxu0  ;;  %3962 = vmatmul.mubr.msk.f32.gmra.mxu0 %vm316_vm0, %v4921_v42 }
 0x184   :  { %6288 = vst [vmem:[#allocation9_spill] sm:$0xff] %v5329_v36  ;;  %v2434_v4 = vmul.f32 1.442695, %v2087_v0  ;;  %1837 = vst [vmem:[#allocation5 + $0x310] sm:$0xff] %v1581_v17  ;;  %v2094_v48 = vmul.f32 %v5071_v41, %v1581_v17  ;;  %v814_v15 = vpop.f32.mrf.mxu1  ;;  %3994 = vmatmul.mubr.msk.f32.gmra.mxu1 %vm316_vm0, %v4921_v42  ;;  %v5337_v62 = vpop.eup %4069  ;;  %4095 = vpow2.f32 %v2432_v56  ;;  %v2093_v55 = vmul.f32 %v5071_v41, %v1580_v22 }
 0x185   :  { %1836 = vst [vmem:[#allocation5 + $0x308] sm:$0xff] %v1580_v22  ;;  %1838 = vst [vmem:[#allocation5 + $0x318] sm:$0xff] %v1582_v27  ;;  %v2095_v24 = vmul.f32 %v5071_v41, %v1582_v27  ;;  %v1587_v58 = vmul.f32 %v5060_v26, %v557_v20  ;;  %1171 = vmatprep.mubr.f32.mxu0 %v6286_v5  ;;  %1428 = vmatprep.mubr.f32.mxu1 %v6286_v5  ;;  %v5344_v0 = vpop.eup %4071  ;;  %4097 = vpow2.f32 %v2430_v33  ;;  %v559_v56 = vpop.f32.mrf.mxu0 }
 0x186   :  { %6289 = vst [vmem:[#allocation10_spill] sm:$0xff] %v5344_v0  ;;  %v2444_v37 = vmul.f32 1.442695, %v2092_v28  ;;  %v2448_v42 = vmul.f32 1.442695, %v2094_v48  ;;  %v1589_v17 = vmul.f32 %v5063_v29, %v814_v15  ;;  %v816_v14 = vpop.f32.mrf.mxu1  ;;  %v5347_v57 = vpop.eup %4073  ;;  %4099 = vpow2.f32 %v2434_v4 }
 0x187   :  { %v2446_v22 = vmul.f32 1.442695, %v2093_v55  ;;  %v2450_v27 = vmul.f32 1.442695, %v2095_v24  ;;  %1843 = vst [vmem:[#allocation5 + $0x340] sm:$0xff] %v1587_v58  ;;  %v2100_v20 = vmul.f32 %v5071_v41, %v1587_v58  ;;  %v5350_v54 = vpop.eup %4075  ;;  %v1588_v28 = vmul.f32 %v5066_v32, %v559_v56  ;;  %v563_v15 = vpop.f32.mrf.mxu0  ;;  %3963 = vmatmul.mubr.msk.f32.gmra.mxu0 %vm316_vm0, %v4932_v46 }
 0x188   :  { %6290 = vst [vmem:[#allocation11_spill] sm:$0xff] %v5350_v54  ;;  %4101 = vpow2.f32 %v2444_v37  ;;  %1845 = vst [vmem:[#allocation5 + $0x350] sm:$0xff] %v1589_v17  ;;  %v2102_v33 = vmul.f32 %v5071_v41, %v1589_v17  ;;  %v1590_v48 = vmul.f32 %v5069_v35, %v816_v14  ;;  %v820_v5 = vpop.f32.mrf.mxu1  ;;  %3995 = vmatmul.mubr.msk.f32.gmra.mxu1 %vm316_vm0, %v4932_v46  ;;  %v5359_v4 = vpop.eup %4077  ;;  %v6291_v37 = vmov 0.0  }
 0x189   :  { %4103 = vpow2.f32 %v2448_v42  ;;  %v2460_v55 = vmul.f32 1.442695, %v2100_v20  ;;  %v1595_v24 = vmul.f32 %v5060_v26, %v563_v15  ;;  %v1597_v58 = vmul.f32 %v5063_v29, %v820_v5  ;;  %1177 = vmatprep.mubr.f32.mxu0 %v6291_v37  ;;  %1434 = vmatprep.mubr.f32.mxu1 %v6291_v37  ;;  %v5365_v17 = vpop.eup %4079  ;;  %1844 = vst [vmem:[#allocation5 + $0x348] sm:$0xff] %v1588_v28  ;;  %v565_v42 = vpop.f32.mrf.mxu0 }
 0x18a   :  { %6292 = vst [vmem:[#allocation12_spill] sm:$0xff] %v5365_v17  ;;  %4105 = vpow2.f32 %v2446_v22  ;;  %v2464_v56 = vmul.f32 1.442695, %v2102_v33  ;;  %v2101_v14 = vmul.f32 %v5071_v41, %v1588_v28  ;;  %1846 = vst [vmem:[#allocation5 + $0x358] sm:$0xff] %v1590_v48  ;;  %v2103_v46 = vmul.f32 %v5071_v41, %v1590_v48  ;;  %v822_v20 = vpop.f32.mrf.mxu1  ;;  %v5369_v54 = vpop.eup %4081 }
 0x18b   :  { %4107 = vpow2.f32 %v2450_v27  ;;  %1851 = vst [vmem:[#allocation5 + $0x380] sm:$0xff] %v1595_v24  ;;  %v2108_v5 = vmul.f32 %v5071_v41, %v1595_v24  ;;  %1853 = vst [vmem:[#allocation5 + $0x390] sm:$0xff] %v1597_v58  ;;  %v2110_v15 = vmul.f32 %v5071_v41, %v1597_v58  ;;  %v1596_v22 = vmul.f32 %v5066_v32, %v565_v42  ;;  %v5374_v33 = vpop.eup %4083  ;;  %v569_v17 = vpop.f32.mrf.mxu0 }
 0x18c   :  { %6293 = vst [vmem:[#allocation13_spill] sm:$0xff] %v5374_v33  ;;  %4109 = vpow2.f32 %v2460_v55  ;;  %v2462_v28 = vmul.f32 1.442695, %v2101_v14  ;;  %v2466_v37 = vmul.f32 1.442695, %v2103_v46  ;;  %v1598_v48 = vmul.f32 %v5069_v35, %v822_v20  ;;  %v826_v36 = vpop.f32.mrf.mxu1  ;;  %3964 = vmatmul.mubr.msk.f32.gmra.mxu0 %vm316_vm0, %v4943_v51  ;;  %3996 = vmatmul.mubr.msk.f32.gmra.mxu1 %vm316_vm0, %v4943_v51  ;;  %v5381_v27 = vpop.eup %4085 }
 0x18d   :  { %6294 = vst [vmem:[#allocation14_spill] sm:$0xff] %v5381_v27  ;;  %4111 = vpow2.f32 %v2464_v56  ;;  %v2476_v24 = vmul.f32 1.442695, %v2108_v5  ;;  %v2480_v58 = vmul.f32 1.442695, %v2110_v15  ;;  %1852 = vst [vmem:[#allocation5 + $0x388] sm:$0xff] %v1596_v22  ;;  %v2109_v55 = vmul.f32 %v5071_v41, %v1596_v22  ;;  %v5384_v14 = vpop.eup %4087  ;;  %v571_v33 = vpop.f32.mrf.mxu0 }
 0x18e   :  { %6295 = vst [vmem:[#allocation15_spill] sm:$0xff] %v5384_v14  ;;  %4113 = vpow2.f32 %v2462_v28  ;;  %1854 = vst [vmem:[#allocation5 + $0x398] sm:$0xff] %v1598_v48  ;;  %v2111_v46 = vmul.f32 %v5071_v41, %v1598_v48  ;;  %v1603_v42 = vmul.f32 %v5060_v26, %v569_v17  ;;  %v1605_v20 = vmul.f32 %v5063_v29, %v826_v36  ;;  %v828_v51 = vpop.f32.mrf.mxu1  ;;  %v5389_v0 = vpop.eup %4089 }
 0x18f   :  { %6296 = vst [vmem:[#allocation16_spill] sm:$0xff] %v5389_v0  ;;  %4115 = vpow2.f32 %v2466_v37  ;;  %v2478_v56 = vmul.f32 1.442695, %v2109_v55  ;;  %v1604_v5 = vmul.f32 %v5066_v32, %v571_v33  ;;  %v1606_v15 = vmul.f32 %v5069_v35, %v828_v51  ;;  %v5393_v22 = vpop.eup %4091  ;;  %v575_v17 = vpop.f32.mrf.mxu0 }
 0x190   :  { %6297 = vst [vmem:[#allocation17_spill] sm:$0xff] %v5393_v22  ;;  %4117 = vpow2.f32 %v2476_v24  ;;  %v2482_v28 = vmul.f32 1.442695, %v2111_v46  ;;  %1859 = vst [vmem:[#allocation5 + $0x3c0] sm:$0xff] %v1603_v42  ;;  %v2116_v48 = vmul.f32 %v5071_v41, %v1603_v42  ;;  %v2118_v36 = vmul.f32 %v5071_v41, %v1605_v20  ;;  %v832_v14 = vpop.f32.mrf.mxu1  ;;  %v5397_v27 = vpop.eup %4093 }
 0x191   :  { %1861 = vst [vmem:[#allocation5 + $0x3d0] sm:$0xff] %v1605_v20  ;;  %6298 = vst [vmem:[#allocation18_spill] sm:$0xff] %v5397_v27  ;;  %4119 = vpow2.f32 %v2480_v58  ;;  %v2117_v33 = vmul.f32 %v5071_v41, %v1604_v5  ;;  %v2119_v37 = vmul.f32 %v5071_v41, %v1606_v15  ;;  %v1611_v24 = vmul.f32 %v5060_v26, %v575_v17  ;;  %v5402_v55 = vpop.eup %4095  ;;  %v577_v51 = vpop.f32.mrf.mxu0 }
 0x192   :  { %1860 = vst [vmem:[#allocation5 + $0x3c8] sm:$0xff] %v1604_v5  ;;  %1862 = vst [vmem:[#allocation5 + $0x3d8] sm:$0xff] %v1606_v15  ;;  %4121 = vpow2.f32 %v2478_v56  ;;  %v2492_v46 = vmul.f32 1.442695, %v2116_v48  ;;  %v2496_v42 = vmul.f32 1.442695, %v2118_v36  ;;  %v1613_v20 = vmul.f32 %v5063_v29, %v832_v14  ;;  %v834_v22 = vpop.f32.mrf.mxu1  ;;  %v5405_v0 = vpop.eup %4097 }
 0x193   :  { %6299 = vst [vmem:[#allocation19_spill] sm:$0xff] %v5402_v55  ;;  %6300 = vst [vmem:[#allocation20_spill] sm:$0xff] %v5405_v0  ;;  %4123 = vpow2.f32 %v2482_v28  ;;  %v2494_v58 = vmul.f32 1.442695, %v2117_v33  ;;  %v2498_v27 = vmul.f32 1.442695, %v2119_v37  ;;  %v2124_v5 = vmul.f32 %v5071_v41, %v1611_v24  ;;  %v5408_v15 = vpop.eup %4099  ;;  %v581_v36 = vpop.f32.mrf.mxu0 }
 0x194   :  { %1867 = vst [vmem:[#allocation5 + $0x400] sm:$0xff] %v1611_v24  ;;  %6301 = vst [vmem:[#allocation21_spill] sm:$0xff] %v5408_v15  ;;  %4125 = vpow2.f32 %v2492_v46  ;;  %v2126_v56 = vmul.f32 %v5071_v41, %v1613_v20  ;;  %v1612_v48 = vmul.f32 %v5066_v32, %v577_v51  ;;  %v1614_v14 = vmul.f32 %v5069_v35, %v834_v22  ;;  %v838_v17 = vpop.f32.mrf.mxu1 }
 0x195   :  { %1869 = vst [vmem:[#allocation5 + $0x410] sm:$0xff] %v1613_v20  ;;  %v5413_v55 = vpop.eup %4101  ;;  %4127 = vpow2.f32 %v2496_v42  ;;  %v2508_v28 = vmul.f32 1.442695, %v2124_v5  ;;  %v1619_v33 = vmul.f32 %v5060_v26, %v581_v36  ;;  %v1621_v37 = vmul.f32 %v5063_v29, %v838_v17  ;;  %v583_v51 = vpop.f32.mrf.mxu0 }
 0x196   :  { %6302 = vst [vmem:[#allocation22_spill] sm:$0xff] %v5413_v55  ;;  %v5417_v24 = vpop.eup %4103  ;;  %4129 = vpow2.f32 %v2494_v58  ;;  %v2512_v46 = vmul.f32 1.442695, %v2126_v56  ;;  %1868 = vst [vmem:[#allocation5 + $0x408] sm:$0xff] %v1612_v48  ;;  %v2125_v20 = vmul.f32 %v5071_v41, %v1612_v48  ;;  %v2127_v22 = vmul.f32 %v5071_v41, %v1614_v14  ;;  %v840_v15 = vpop.f32.mrf.mxu1 }
 0x197   :  { %6303 = vst [vmem:[#allocation23_spill] sm:$0xff] %v5417_v24  ;;  %1870 = vst [vmem:[#allocation5 + $0x418] sm:$0xff] %v1614_v14  ;;  %v5421_v0 = vpop.eup %4105  ;;  %4131 = vpow2.f32 %v2498_v27  ;;  %v2132_v42 = vmul.f32 %v5071_v41, %v1619_v33  ;;  %v2134_v5 = vmul.f32 %v5071_v41, %v1621_v37  ;;  %v1620_v58 = vmul.f32 %v5066_v32, %v583_v51  ;;  %v587_v17 = vpop.f32.mrf.mxu0 }
 0x198   :  { %6304 = vst [vmem:[#allocation24_spill] sm:$0xff] %v5421_v0  ;;  %1875 = vst [vmem:[#allocation5 + $0x440] sm:$0xff] %v1619_v33  ;;  %v5426_v56 = vpop.eup %4107  ;;  %4133 = vpow2.f32 %v2508_v28  ;;  %v2510_v48 = vmul.f32 1.442695, %v2125_v20  ;;  %v2514_v36 = vmul.f32 1.442695, %v2127_v22  ;;  %v1622_v14 = vmul.f32 %v5069_v35, %v840_v15  ;;  %v844_v24 = vpop.f32.mrf.mxu1 }
 0x199   :  { %1877 = vst [vmem:[#allocation5 + $0x450] sm:$0xff] %v1621_v37  ;;  %6305 = vst [vmem:[#allocation25_spill] sm:$0xff] %v5426_v56  ;;  %v5429_v55 = vpop.eup %4109  ;;  %4135 = vpow2.f32 %v2512_v46  ;;  %v2524_v27 = vmul.f32 1.442695, %v2132_v42  ;;  %v2528_v0 = vmul.f32 1.442695, %v2134_v5  ;;  %v2133_v33 = vmul.f32 %v5071_v41, %v1620_v58  ;;  %v589_v22 = vpop.f32.mrf.mxu0 }
 0x19a   :  { %6306 = vst [vmem:[#allocation26_spill] sm:$0xff] %v5429_v55  ;;  %1876 = vst [vmem:[#allocation5 + $0x448] sm:$0xff] %v1620_v58  ;;  %v5432_v37 = vpop.eup %4111  ;;  %4137 = vpow2.f32 %v2510_v48  ;;  %v2135_v28 = vmul.f32 %v5071_v41, %v1622_v14  ;;  %v1627_v20 = vmul.f32 %v5060_v26, %v587_v17  ;;  %v1629_v15 = vmul.f32 %v5063_v29, %v844_v24  ;;  %v846_v51 = vpop.f32.mrf.mxu1 }
 0x19b   :  { %6307 = vst [vmem:[#allocation27_spill] sm:$0xff] %v5432_v37  ;;  %1878 = vst [vmem:[#allocation5 + $0x458] sm:$0xff] %v1622_v14  ;;  %v5437_v56 = vpop.eup %4113  ;;  %4139 = vpow2.f32 %v2514_v36  ;;  %v2526_v46 = vmul.f32 1.442695, %v2133_v33  ;;  %v1628_v42 = vmul.f32 %v5066_v32, %v589_v22  ;;  %v1630_v5 = vmul.f32 %v5069_v35, %v846_v51  ;;  %v593_v17 = vpop.f32.mrf.mxu0 }
 0x19c   :  { %6308 = vst [vmem:[#allocation28_spill] sm:$0xff] %v5437_v56  ;;  %v5441_v58 = vpop.eup %4115  ;;  %4141 = vpow2.f32 %v2524_v27  ;;  %v2530_v48 = vmul.f32 1.442695, %v2135_v28  ;;  %1883 = vst [vmem:[#allocation5 + $0x480] sm:$0xff] %v1627_v20  ;;  %v2140_v14 = vmul.f32 %v5071_v41, %v1627_v20  ;;  %v2142_v24 = vmul.f32 %v5071_v41, %v1629_v15  ;;  %v850_v37 = vpop.f32.mrf.mxu1 }
 0x19d   :  { %6309 = vst [vmem:[#allocation29_spill] sm:$0xff] %v5441_v58  ;;  %1885 = vst [vmem:[#allocation5 + $0x490] sm:$0xff] %v1629_v15  ;;  %v5445_v55 = vpop.eup %4117  ;;  %4143 = vpow2.f32 %v2528_v0  ;;  %v2141_v36 = vmul.f32 %v5071_v41, %v1628_v42  ;;  %v2143_v33 = vmul.f32 %v5071_v41, %v1630_v5  ;;  %v1635_v27 = vmul.f32 %v5060_v26, %v593_v17  ;;  %v595_v51 = vpop.f32.mrf.mxu0 }
 0x19e   :  { %6310 = vst [vmem:[#allocation30_spill] sm:$0xff] %v5445_v55  ;;  %1884 = vst [vmem:[#allocation5 + $0x488] sm:$0xff] %v1628_v42  ;;  %v5450_v28 = vpop.eup %4119  ;;  %4145 = vpow2.f32 %v2526_v46  ;;  %v2540_v20 = vmul.f32 1.442695, %v2140_v14  ;;  %v2544_v22 = vmul.f32 1.442695, %v2142_v24  ;;  %v1637_v15 = vmul.f32 %v5063_v29, %v850_v37  ;;  %v852_v58 = vpop.f32.mrf.mxu1 }
 0x19f   :  { %1886 = vst [vmem:[#allocation5 + $0x498] sm:$0xff] %v1630_v5  ;;  %6311 = vst [vmem:[#allocation31_spill] sm:$0xff] %v5450_v28  ;;  %v5453_v56 = vpop.eup %4121  ;;  %4147 = vpow2.f32 %v2530_v48  ;;  %v2542_v0 = vmul.f32 1.442695, %v2141_v36  ;;  %v2546_v55 = vmul.f32 1.442695, %v2143_v33  ;;  %v2148_v42 = vmul.f32 %v5071_v41, %v1635_v27  ;;  %v599_v24 = vpop.f32.mrf.mxu0 }
 0x1a0   :  { %6312 = vst [vmem:[#allocation32_spill] sm:$0xff] %v5453_v56  ;;  %1891 = vst [vmem:[#allocation5 + $0x4c0] sm:$0xff] %v1635_v27  ;;  %v5456_v5 = vpop.eup %4123  ;;  %4149 = vpow2.f32 %v2540_v20  ;;  %v2150_v46 = vmul.f32 %v5071_v41, %v1637_v15  ;;  %v1636_v14 = vmul.f32 %v5066_v32, %v595_v51  ;;  %v1638_v37 = vmul.f32 %v5069_v35, %v852_v58  ;;  %v856_v17 = vpop.f32.mrf.mxu1 }
 0x1a1   :  { %6313 = vst [vmem:[#allocation33_spill] sm:$0xff] %v5456_v5  ;;  %1893 = vst [vmem:[#allocation5 + $0x4d0] sm:$0xff] %v1637_v15  ;;  %v5461_v28 = vpop.eup %4125  ;;  %4151 = vpow2.f32 %v2544_v22  ;;  %v2556_v48 = vmul.f32 1.442695, %v2148_v42  ;;  %v1643_v36 = vmul.f32 %v5060_v26, %v599_v24  ;;  %v1645_v33 = vmul.f32 %v5063_v29, %v856_v17  ;;  %v601_v51 = vpop.f32.mrf.mxu0 }
 0x1a2   :  { %6314 = vst [vmem:[#allocation34_spill] sm:$0xff] %v5461_v28  ;;  %v5465_v27 = vpop.eup %4127  ;;  %4153 = vpow2.f32 %v2542_v0  ;;  %v2560_v20 = vmul.f32 1.442695, %v2150_v46  ;;  %1892 = vst [vmem:[#allocation5 + $0x4c8] sm:$0xff] %v1636_v14  ;;  %v2149_v15 = vmul.f32 %v5071_v41, %v1636_v14  ;;  %v2151_v58 = vmul.f32 %v5071_v41, %v1638_v37  ;;  %v858_v5 = vpop.f32.mrf.mxu1 }
 0x1a3   :  { %6315 = vst [vmem:[#allocation35_spill] sm:$0xff] %v5465_v27  ;;  %1894 = vst [vmem:[#allocation5 + $0x4d8] sm:$0xff] %v1638_v37  ;;  %v5469_v56 = vpop.eup %4129  ;;  %4155 = vpow2.f32 %v2546_v55  ;;  %v2156_v22 = vmul.f32 %v5071_v41, %v1643_v36  ;;  %v2158_v42 = vmul.f32 %v5071_v41, %v1645_v33  ;;  %v1644_v0 = vmul.f32 %v5066_v32, %v601_v51  ;;  %v605_v17 = vpop.f32.mrf.mxu0 }
 0x1a4   :  { %6316 = vst [vmem:[#allocation36_spill] sm:$0xff] %v5469_v56  ;;  %1899 = vst [vmem:[#allocation5 + $0x500] sm:$0xff] %v1643_v36  ;;  %v5474_v46 = vpop.eup %4131  ;;  %4157 = vpow2.f32 %v2556_v48  ;;  %v2558_v14 = vmul.f32 1.442695, %v2149_v15  ;;  %v2562_v24 = vmul.f32 1.442695, %v2151_v58  ;;  %v1646_v37 = vmul.f32 %v5069_v35, %v858_v5  ;;  %v862_v27 = vpop.f32.mrf.mxu1 }
 0x1a5   :  { %1901 = vst [vmem:[#allocation5 + $0x510] sm:$0xff] %v1645_v33  ;;  %6317 = vst [vmem:[#allocation37_spill] sm:$0xff] %v5474_v46  ;;  %v5477_v28 = vpop.eup %4133  ;;  %4159 = vpow2.f32 %v2560_v20  ;;  %v2572_v55 = vmul.f32 1.442695, %v2156_v22  ;;  %v2576_v56 = vmul.f32 1.442695, %v2158_v42  ;;  %v2157_v36 = vmul.f32 %v5071_v41, %v1644_v0  ;;  %v607_v58 = vpop.f32.mrf.mxu0 }
 0x1a6   :  { %6318 = vst [vmem:[#allocation38_spill] sm:$0xff] %v5477_v28  ;;  %1900 = vst [vmem:[#allocation5 + $0x508] sm:$0xff] %v1644_v0  ;;  %v5480_v33 = vpop.eup %4135  ;;  %4161 = vpow2.f32 %v2558_v14  ;;  %v2159_v48 = vmul.f32 %v5071_v41, %v1646_v37  ;;  %v1651_v15 = vmul.f32 %v5060_v26, %v605_v17  ;;  %v1653_v5 = vmul.f32 %v5063_v29, %v862_v27  ;;  %v864_v51 = vpop.f32.mrf.mxu1 }
 0x1a7   :  { %6319 = vst [vmem:[#allocation39_spill] sm:$0xff] %v5480_v33  ;;  %1902 = vst [vmem:[#allocation5 + $0x518] sm:$0xff] %v1646_v37  ;;  %v5485_v46 = vpop.eup %4137  ;;  %4163 = vpow2.f32 %v2562_v24  ;;  %v2574_v20 = vmul.f32 1.442695, %v2157_v36  ;;  %v1652_v22 = vmul.f32 %v5066_v32, %v607_v58  ;;  %v1654_v42 = vmul.f32 %v5069_v35, %v864_v51  ;;  %v611_v17 = vpop.f32.mrf.mxu0 }
 0x1a8   :  { %6320 = vst [vmem:[#allocation40_spill] sm:$0xff] %v5485_v46  ;;  %v5489_v0 = vpop.eup %4139  ;;  %4165 = vpow2.f32 %v2572_v55  ;;  %v2578_v14 = vmul.f32 1.442695, %v2159_v48  ;;  %1907 = vst [vmem:[#allocation5 + $0x540] sm:$0xff] %v1651_v15  ;;  %v2164_v37 = vmul.f32 %v5071_v41, %v1651_v15  ;;  %v2166_v27 = vmul.f32 %v5071_v41, %v1653_v5  ;;  %v868_v33 = vpop.f32.mrf.mxu1 }
 0x1a9   :  { %6321 = vst [vmem:[#allocation41_spill] sm:$0xff] %v5489_v0  ;;  %1909 = vst [vmem:[#allocation5 + $0x550] sm:$0xff] %v1653_v5  ;;  %v5493_v28 = vpop.eup %4141  ;;  %4167 = vpow2.f32 %v2576_v56  ;;  %v2165_v24 = vmul.f32 %v5071_v41, %v1652_v22  ;;  %v2167_v36 = vmul.f32 %v5071_v41, %v1654_v42  ;;  %v1659_v55 = vmul.f32 %v5060_v26, %v611_v17  ;;  %v613_v51 = vpop.f32.mrf.mxu0 }
 0x1aa   :  { %6322 = vst [vmem:[#allocation42_spill] sm:$0xff] %v5493_v28  ;;  %1908 = vst [vmem:[#allocation5 + $0x548] sm:$0xff] %v1652_v22  ;;  %v5498_v48 = vpop.eup %4143  ;;  %4169 = vpow2.f32 %v2574_v20  ;;  %v2588_v15 = vmul.f32 1.442695, %v2164_v37  ;;  %v2592_v58 = vmul.f32 1.442695, %v2166_v27  ;;  %v1661_v5 = vmul.f32 %v5063_v29, %v868_v33  ;;  %v870_v0 = vpop.f32.mrf.mxu1 }
 0x1ab   :  { %1910 = vst [vmem:[#allocation5 + $0x558] sm:$0xff] %v1654_v42  ;;  %6323 = vst [vmem:[#allocation43_spill] sm:$0xff] %v5498_v48  ;;  %v5501_v46 = vpop.eup %4145  ;;  %4171 = vpow2.f32 %v2578_v14  ;;  %v2590_v56 = vmul.f32 1.442695, %v2165_v24  ;;  %v2594_v28 = vmul.f32 1.442695, %v2167_v36  ;;  %v2172_v22 = vmul.f32 %v5071_v41, %v1659_v55  ;;  %v617_v27 = vpop.f32.mrf.mxu0 }
 0x1ac   :  { %6324 = vst [vmem:[#allocation44_spill] sm:$0xff] %v5501_v46  ;;  %1915 = vst [vmem:[#allocation5 + $0x580] sm:$0xff] %v1659_v55  ;;  %v5504_v42 = vpop.eup %4147  ;;  %4173 = vpow2.f32 %v2588_v15  ;;  %v2174_v20 = vmul.f32 %v5071_v41, %v1661_v5  ;;  %v1660_v37 = vmul.f32 %v5066_v32, %v613_v51  ;;  %v1662_v33 = vmul.f32 %v5069_v35, %v870_v0  ;;  %v874_v17 = vpop.f32.mrf.mxu1 }
 0x1ad   :  { %6325 = vst [vmem:[#allocation45_spill] sm:$0xff] %v5504_v42  ;;  %1917 = vst [vmem:[#allocation5 + $0x590] sm:$0xff] %v1661_v5  ;;  %v5509_v48 = vpop.eup %4149  ;;  %4175 = vpow2.f32 %v2592_v58  ;;  %v2604_v14 = vmul.f32 1.442695, %v2172_v22  ;;  %v1667_v24 = vmul.f32 %v5060_v26, %v617_v27  ;;  %v1669_v36 = vmul.f32 %v5063_v29, %v874_v17  ;;  %v619_v51 = vpop.f32.mrf.mxu0 }
 0x1ae   :  { %6326 = vst [vmem:[#allocation46_spill] sm:$0xff] %v5509_v48  ;;  %v5513_v55 = vpop.eup %4151  ;;  %4177 = vpow2.f32 %v2590_v56  ;;  %v2608_v15 = vmul.f32 1.442695, %v2174_v20  ;;  %1916 = vst [vmem:[#allocation5 + $0x588] sm:$0xff] %v1660_v37  ;;  %v2173_v5 = vmul.f32 %v5071_v41, %v1660_v37  ;;  %v2175_v0 = vmul.f32 %v5071_v41, %v1662_v33  ;;  %v876_v42 = vpop.f32.mrf.mxu1 }
 0x1af   :  { %6327 = vst [vmem:[#allocation47_spill] sm:$0xff] %v5513_v55  ;;  %1918 = vst [vmem:[#allocation5 + $0x598] sm:$0xff] %v1662_v33  ;;  %v5517_v46 = vpop.eup %4153  ;;  %4179 = vpow2.f32 %v2594_v28  ;;  %v2180_v58 = vmul.f32 %v5071_v41, %v1667_v24  ;;  %v2182_v22 = vmul.f32 %v5071_v41, %v1669_v36  ;;  %v1668_v56 = vmul.f32 %v5066_v32, %v619_v51  ;;  %v623_v17 = vpop.f32.mrf.mxu0 }
 0x1b0   :  { %6328 = vst [vmem:[#allocation48_spill] sm:$0xff] %v5517_v46  ;;  %1923 = vst [vmem:[#allocation5 + $0x5c0] sm:$0xff] %v1667_v24  ;;  %v5522_v20 = vpop.eup %4155  ;;  %4181 = vpow2.f32 %v2604_v14  ;;  %v2606_v37 = vmul.f32 1.442695, %v2173_v5  ;;  %v2610_v27 = vmul.f32 1.442695, %v2175_v0  ;;  %v1670_v33 = vmul.f32 %v5069_v35, %v876_v42  ;;  %v880_v55 = vpop.f32.mrf.mxu1 }
 0x1b1   :  { %1925 = vst [vmem:[#allocation5 + $0x5d0] sm:$0xff] %v1669_v36  ;;  %6329 = vst [vmem:[#allocation49_spill] sm:$0xff] %v5522_v20  ;;  %v5525_v48 = vpop.eup %4157  ;;  %4183 = vpow2.f32 %v2608_v15  ;;  %v2620_v28 = vmul.f32 1.442695, %v2180_v58  ;;  %v2624_v46 = vmul.f32 1.442695, %v2182_v22  ;;  %v2181_v24 = vmul.f32 %v5071_v41, %v1668_v56  ;;  %v625_v0 = vpop.f32.mrf.mxu0 }
 0x1b2   :  { %6330 = vst [vmem:[#allocation50_spill] sm:$0xff] %v5525_v48  ;;  %1924 = vst [vmem:[#allocation5 + $0x5c8] sm:$0xff] %v1668_v56  ;;  %v5528_v36 = vpop.eup %4159  ;;  %4185 = vpow2.f32 %v2606_v37  ;;  %v2183_v14 = vmul.f32 %v5071_v41, %v1670_v33  ;;  %v1675_v5 = vmul.f32 %v5060_v26, %v623_v17  ;;  %v1677_v42 = vmul.f32 %v5063_v29, %v880_v55  ;;  %v882_v51 = vpop.f32.mrf.mxu1 }
 0x1b3   :  { %6331 = vst [vmem:[#allocation51_spill] sm:$0xff] %v5528_v36  ;;  %1926 = vst [vmem:[#allocation5 + $0x5d8] sm:$0xff] %v1670_v33  ;;  %v5533_v20 = vpop.eup %4161  ;;  %4187 = vpow2.f32 %v2610_v27  ;;  %v2622_v15 = vmul.f32 1.442695, %v2181_v24  ;;  %v1676_v58 = vmul.f32 %v5066_v32, %v625_v0  ;;  %v1678_v22 = vmul.f32 %v5069_v35, %v882_v51  ;;  %v629_v17 = vpop.f32.mrf.mxu0 }
 0x1b4   :  { %6332 = vst [vmem:[#allocation52_spill] sm:$0xff] %v5533_v20  ;;  %v5537_v56 = vpop.eup %4163  ;;  %4189 = vpow2.f32 %v2620_v28  ;;  %v2626_v37 = vmul.f32 1.442695, %v2183_v14  ;;  %1931 = vst [vmem:[#allocation5 + $0x600] sm:$0xff] %v1675_v5  ;;  %v2188_v33 = vmul.f32 %v5071_v41, %v1675_v5  ;;  %v2190_v55 = vmul.f32 %v5071_v41, %v1677_v42  ;;  %v886_v36 = vpop.f32.mrf.mxu1 }
 0x1b5   :  { %6333 = vst [vmem:[#allocation53_spill] sm:$0xff] %v5537_v56  ;;  %1933 = vst [vmem:[#allocation5 + $0x610] sm:$0xff] %v1677_v42  ;;  %v5541_v48 = vpop.eup %4165  ;;  %4191 = vpow2.f32 %v2624_v46  ;;  %v2189_v27 = vmul.f32 %v5071_v41, %v1676_v58  ;;  %v2191_v24 = vmul.f32 %v5071_v41, %v1678_v22  ;;  %v1683_v28 = vmul.f32 %v5060_v26, %v629_v17  ;;  %v631_v51 = vpop.f32.mrf.mxu0 }
 0x1b6   :  { %6334 = vst [vmem:[#allocation54_spill] sm:$0xff] %v5541_v48  ;;  %1932 = vst [vmem:[#allocation5 + $0x608] sm:$0xff] %v1676_v58  ;;  %v5546_v14 = vpop.eup %4167  ;;  %4193 = vpow2.f32 %v2622_v15  ;;  %v2636_v5 = vmul.f32 1.442695, %v2188_v33  ;;  %v2640_v0 = vmul.f32 1.442695, %v2190_v55  ;;  %v1685_v42 = vmul.f32 %v5063_v29, %v886_v36  ;;  %v888_v56 = vpop.f32.mrf.mxu1 }
 0x1b7   :  { %1934 = vst [vmem:[#allocation5 + $0x618] sm:$0xff] %v1678_v22  ;;  %6335 = vst [vmem:[#allocation55_spill] sm:$0xff] %v5546_v14  ;;  %v5549_v20 = vpop.eup %4169  ;;  %4195 = vpow2.f32 %v2626_v37  ;;  %v2638_v46 = vmul.f32 1.442695, %v2189_v27  ;;  %v2642_v48 = vmul.f32 1.442695, %v2191_v24  ;;  %v2196_v58 = vmul.f32 %v5071_v41, %v1683_v28  ;;  %v635_v55 = vpop.f32.mrf.mxu0 }
 0x1b8   :  { %6336 = vst [vmem:[#allocation56_spill] sm:$0xff] %v5549_v20  ;;  %1939 = vst [vmem:[#allocation5 + $0x640] sm:$0xff] %v1683_v28  ;;  %v5552_v22 = vpop.eup %4171  ;;  %4197 = vpow2.f32 %v2636_v5  ;;  %v2198_v15 = vmul.f32 %v5071_v41, %v1685_v42  ;;  %v1684_v33 = vmul.f32 %v5066_v32, %v631_v51  ;;  %v1686_v36 = vmul.f32 %v5069_v35, %v888_v56  ;;  %v892_v17 = vpop.f32.mrf.mxu1 }
 0x1b9   :  { %6337 = vst [vmem:[#allocation57_spill] sm:$0xff] %v5552_v22  ;;  %1941 = vst [vmem:[#allocation5 + $0x650] sm:$0xff] %v1685_v42  ;;  %v5557_v14 = vpop.eup %4173  ;;  %4199 = vpow2.f32 %v2640_v0  ;;  %v2652_v37 = vmul.f32 1.442695, %v2196_v58  ;;  %v1691_v27 = vmul.f32 %v5060_v26, %v635_v55  ;;  %v1693_v24 = vmul.f32 %v5063_v29, %v892_v17  ;;  %v637_v51 = vpop.f32.mrf.mxu0 }
 0x1ba   :  { %6338 = vst [vmem:[#allocation58_spill] sm:$0xff] %v5557_v14  ;;  %v5561_v28 = vpop.eup %4175  ;;  %4201 = vpow2.f32 %v2638_v46  ;;  %v2656_v5 = vmul.f32 1.442695, %v2198_v15  ;;  %1940 = vst [vmem:[#allocation5 + $0x648] sm:$0xff] %v1684_v33  ;;  %v2197_v42 = vmul.f32 %v5071_v41, %v1684_v33  ;;  %v2199_v56 = vmul.f32 %v5071_v41, %v1686_v36  ;;  %v894_v22 = vpop.f32.mrf.mxu1 }
 0x1bb   :  { %6339 = vst [vmem:[#allocation59_spill] sm:$0xff] %v5561_v28  ;;  %1942 = vst [vmem:[#allocation5 + $0x658] sm:$0xff] %v1686_v36  ;;  %v5565_v20 = vpop.eup %4177  ;;  %4203 = vpow2.f32 %v2642_v48  ;;  %v2204_v0 = vmul.f32 %v5071_v41, %v1691_v27  ;;  %v2206_v58 = vmul.f32 %v5071_v41, %v1693_v24  ;;  %v1692_v46 = vmul.f32 %v5066_v32, %v637_v51  ;;  %v641_v17 = vpop.f32.mrf.mxu0 }
 0x1bc   :  { %6340 = vst [vmem:[#allocation60_spill] sm:$0xff] %v5565_v20  ;;  %1947 = vst [vmem:[#allocation5 + $0x680] sm:$0xff] %v1691_v27  ;;  %v5570_v15 = vpop.eup %4179  ;;  %4205 = vpow2.f32 %v2652_v37  ;;  %v2654_v33 = vmul.f32 1.442695, %v2197_v42  ;;  %v2658_v55 = vmul.f32 1.442695, %v2199_v56  ;;  %v1694_v36 = vmul.f32 %v5069_v35, %v894_v22  ;;  %v898_v28 = vpop.f32.mrf.mxu1 }
 0x1bd   :  { %1949 = vst [vmem:[#allocation5 + $0x690] sm:$0xff] %v1693_v24  ;;  %6341 = vst [vmem:[#allocation61_spill] sm:$0xff] %v5570_v15  ;;  %v5573_v14 = vpop.eup %4181  ;;  %4207 = vpow2.f32 %v2656_v5  ;;  %v2668_v48 = vmul.f32 1.442695, %v2204_v0  ;;  %v2672_v20 = vmul.f32 1.442695, %v2206_v58  ;;  %v2205_v27 = vmul.f32 %v5071_v41, %v1692_v46  ;;  %v643_v56 = vpop.f32.mrf.mxu0 }
 0x1be   :  { %6342 = vst [vmem:[#allocation62_spill] sm:$0xff] %v5573_v14  ;;  %1948 = vst [vmem:[#allocation5 + $0x688] sm:$0xff] %v1692_v46  ;;  %v5576_v24 = vpop.eup %4183  ;;  %4209 = vpow2.f32 %v2654_v33  ;;  %v2207_v37 = vmul.f32 %v5071_v41, %v1694_v36  ;;  %v1699_v42 = vmul.f32 %v5060_v26, %v641_v17  ;;  %v1701_v22 = vmul.f32 %v5063_v29, %v898_v28  ;;  %v900_v51 = vpop.f32.mrf.mxu1 }
 0x1bf   :  { %6343 = vst [vmem:[#allocation63_spill] sm:$0xff] %v5576_v24  ;;  %1950 = vst [vmem:[#allocation5 + $0x698] sm:$0xff] %v1694_v36  ;;  %v5581_v15 = vpop.eup %4185  ;;  %4211 = vpow2.f32 %v2658_v55  ;;  %v2670_v5 = vmul.f32 1.442695, %v2205_v27  ;;  %v1700_v0 = vmul.f32 %v5066_v32, %v643_v56  ;;  %v1702_v58 = vmul.f32 %v5069_v35, %v900_v51  ;;  %v647_v17 = vpop.f32.mrf.mxu0 }
 0x1c0   :  { %6344 = vst [vmem:[#allocation64_spill] sm:$0xff] %v5581_v15  ;;  %v5585_v46 = vpop.eup %4187  ;;  %4213 = vpow2.f32 %v2668_v48  ;;  %v2674_v33 = vmul.f32 1.442695, %v2207_v37  ;;  %1955 = vst [vmem:[#allocation5 + $0x6c0] sm:$0xff] %v1699_v42  ;;  %v2212_v36 = vmul.f32 %v5071_v41, %v1699_v42  ;;  %v2214_v28 = vmul.f32 %v5071_v41, %v1701_v22  ;;  %v904_v24 = vpop.f32.mrf.mxu1 }
 0x1c1   :  { %6345 = vst [vmem:[#allocation65_spill] sm:$0xff] %v5585_v46  ;;  %1957 = vst [vmem:[#allocation5 + $0x6d0] sm:$0xff] %v1701_v22  ;;  %v5589_v14 = vpop.eup %4189  ;;  %4215 = vpow2.f32 %v2672_v20  ;;  %v2213_v55 = vmul.f32 %v5071_v41, %v1700_v0  ;;  %v2215_v27 = vmul.f32 %v5071_v41, %v1702_v58  ;;  %v1707_v48 = vmul.f32 %v5060_v26, %v647_v17  ;;  %v649_v51 = vpop.f32.mrf.mxu0 }
 0x1c2   :  { %6346 = vst [vmem:[#allocation66_spill] sm:$0xff] %v5589_v14  ;;  %1956 = vst [vmem:[#allocation5 + $0x6c8] sm:$0xff] %v1700_v0  ;;  %v5594_v37 = vpop.eup %4191  ;;  %4217 = vpow2.f32 %v2670_v5  ;;  %v2684_v42 = vmul.f32 1.442695, %v2212_v36  ;;  %v2688_v56 = vmul.f32 1.442695, %v2214_v28  ;;  %v1709_v22 = vmul.f32 %v5063_v29, %v904_v24  ;;  %v906_v46 = vpop.f32.mrf.mxu1 }
 0x1c3   :  { %1958 = vst [vmem:[#allocation5 + $0x6d8] sm:$0xff] %v1702_v58  ;;  %6347 = vst [vmem:[#allocation67_spill] sm:$0xff] %v5594_v37  ;;  %v5597_v15 = vpop.eup %4193  ;;  %4219 = vpow2.f32 %v2674_v33  ;;  %v2686_v20 = vmul.f32 1.442695, %v2213_v55  ;;  %v2690_v14 = vmul.f32 1.442695, %v2215_v27  ;;  %v2220_v0 = vmul.f32 %v5071_v41, %v1707_v48  ;;  %v653_v28 = vpop.f32.mrf.mxu0 }
 0x1c4   :  { %6348 = vst [vmem:[#allocation68_spill] sm:$0xff] %v5597_v15  ;;  %1963 = vst [vmem:[#allocation5 + $0x700] sm:$0xff] %v1707_v48  ;;  %v5600_v58 = vpop.eup %4195  ;;  %4221 = vpow2.f32 %v2684_v42  ;;  %v2222_v5 = vmul.f32 %v5071_v41, %v1709_v22  ;;  %v1708_v36 = vmul.f32 %v5066_v32, %v649_v51  ;;  %v1710_v24 = vmul.f32 %v5069_v35, %v906_v46  ;;  %v910_v17 = vpop.f32.mrf.mxu1 }
 0x1c5   :  { %6349 = vst [vmem:[#allocation69_spill] sm:$0xff] %v5600_v58  ;;  %1965 = vst [vmem:[#allocation5 + $0x710] sm:$0xff] %v1709_v22  ;;  %v5605_v37 = vpop.eup %4197  ;;  %4223 = vpow2.f32 %v2688_v56  ;;  %v2700_v33 = vmul.f32 1.442695, %v2220_v0  ;;  %v1715_v55 = vmul.f32 %v5060_v26, %v653_v28  ;;  %v1717_v27 = vmul.f32 %v5063_v29, %v910_v17  ;;  %v655_v51 = vpop.f32.mrf.mxu0 }
 0x1c6   :  { %6350 = vst [vmem:[#allocation70_spill] sm:$0xff] %v5605_v37  ;;  %v5609_v48 = vpop.eup %4199  ;;  %4225 = vpow2.f32 %v2686_v20  ;;  %v2704_v42 = vmul.f32 1.442695, %v2222_v5  ;;  %1964 = vst [vmem:[#allocation5 + $0x708] sm:$0xff] %v1708_v36  ;;  %v2221_v22 = vmul.f32 %v5071_v41, %v1708_v36  ;;  %v2223_v46 = vmul.f32 %v5071_v41, %v1710_v24  ;;  %v912_v58 = vpop.f32.mrf.mxu1 }
 0x1c7   :  { %6351 = vst [vmem:[#allocation71_spill] sm:$0xff] %v5609_v48  ;;  %1966 = vst [vmem:[#allocation5 + $0x718] sm:$0xff] %v1710_v24  ;;  %v5613_v15 = vpop.eup %4201  ;;  %4227 = vpow2.f32 %v2690_v14  ;;  %v2228_v56 = vmul.f32 %v5071_v41, %v1715_v55  ;;  %v2230_v0 = vmul.f32 %v5071_v41, %v1717_v27  ;;  %v1716_v20 = vmul.f32 %v5066_v32, %v655_v51  ;;  %v659_v17 = vpop.f32.mrf.mxu0 }
 0x1c8   :  { %6352 = vst [vmem:[#allocation72_spill] sm:$0xff] %v5613_v15  ;;  %1971 = vst [vmem:[#allocation5 + $0x740] sm:$0xff] %v1715_v55  ;;  %v5618_v5 = vpop.eup %4203  ;;  %4229 = vpow2.f32 %v2700_v33  ;;  %v2702_v36 = vmul.f32 1.442695, %v2221_v22  ;;  %v2706_v28 = vmul.f32 1.442695, %v2223_v46  ;;  %v1718_v24 = vmul.f32 %v5069_v35, %v912_v58  ;;  %v916_v48 = vpop.f32.mrf.mxu1 }
 0x1c9   :  { %1973 = vst [vmem:[#allocation5 + $0x750] sm:$0xff] %v1717_v27  ;;  %6353 = vst [vmem:[#allocation73_spill] sm:$0xff] %v5618_v5  ;;  %v5621_v37 = vpop.eup %4205  ;;  %4231 = vpow2.f32 %v2704_v42  ;;  %v2716_v14 = vmul.f32 1.442695, %v2228_v56  ;;  %v2720_v15 = vmul.f32 1.442695, %v2230_v0  ;;  %v2229_v55 = vmul.f32 %v5071_v41, %v1716_v20  ;;  %v661_v46 = vpop.f32.mrf.mxu0 }
 0x1ca   :  { %6354 = vst [vmem:[#allocation74_spill] sm:$0xff] %v5621_v37  ;;  %1972 = vst [vmem:[#allocation5 + $0x748] sm:$0xff] %v1716_v20  ;;  %v5624_v27 = vpop.eup %4207  ;;  %4233 = vpow2.f32 %v2702_v36  ;;  %v2231_v33 = vmul.f32 %v5071_v41, %v1718_v24  ;;  %v1723_v22 = vmul.f32 %v5060_v26, %v659_v17  ;;  %v1725_v58 = vmul.f32 %v5063_v29, %v916_v48  ;;  %v918_v51 = vpop.f32.mrf.mxu1 }
 0x1cb   :  { %6355 = vst [vmem:[#allocation75_spill] sm:$0xff] %v5624_v27  ;;  %1974 = vst [vmem:[#allocation5 + $0x758] sm:$0xff] %v1718_v24  ;;  %v5629_v5 = vpop.eup %4209  ;;  %4235 = vpow2.f32 %v2706_v28  ;;  %v2718_v42 = vmul.f32 1.442695, %v2229_v55  ;;  %v1724_v56 = vmul.f32 %v5066_v32, %v661_v46  ;;  %v1726_v0 = vmul.f32 %v5069_v35, %v918_v51  ;;  %v665_v17 = vpop.f32.mrf.mxu0 }
 0x1cc   :  { %6356 = vst [vmem:[#allocation76_spill] sm:$0xff] %v5629_v5  ;;  %v5633_v20 = vpop.eup %4211  ;;  %4237 = vpow2.f32 %v2716_v14  ;;  %v2722_v36 = vmul.f32 1.442695, %v2231_v33  ;;  %1979 = vst [vmem:[#allocation5 + $0x780] sm:$0xff] %v1723_v22  ;;  %v2236_v24 = vmul.f32 %v5071_v41, %v1723_v22  ;;  %v2238_v48 = vmul.f32 %v5071_v41, %v1725_v58  ;;  %v922_v27 = vpop.f32.mrf.mxu1 }
 0x1cd   :  { %6357 = vst [vmem:[#allocation77_spill] sm:$0xff] %v5633_v20  ;;  %1981 = vst [vmem:[#allocation5 + $0x790] sm:$0xff] %v1725_v58  ;;  %v5637_v37 = vpop.eup %4213  ;;  %4239 = vpow2.f32 %v2720_v15  ;;  %v2237_v28 = vmul.f32 %v5071_v41, %v1724_v56  ;;  %v2239_v55 = vmul.f32 %v5071_v41, %v1726_v0  ;;  %v1731_v14 = vmul.f32 %v5060_v26, %v665_v17  ;;  %v667_v51 = vpop.f32.mrf.mxu0 }
 0x1ce   :  { %6358 = vst [vmem:[#allocation78_spill] sm:$0xff] %v5637_v37  ;;  %1980 = vst [vmem:[#allocation5 + $0x788] sm:$0xff] %v1724_v56  ;;  %v5642_v33 = vpop.eup %4215  ;;  %4241 = vpow2.f32 %v2718_v42  ;;  %v2732_v22 = vmul.f32 1.442695, %v2236_v24  ;;  %v2736_v46 = vmul.f32 1.442695, %v2238_v48  ;;  %v1733_v58 = vmul.f32 %v5063_v29, %v922_v27  ;;  %v924_v20 = vpop.f32.mrf.mxu1 }
 0x1cf   :  { %1982 = vst [vmem:[#allocation5 + $0x798] sm:$0xff] %v1726_v0  ;;  %v5645_v5 = vpop.eup %4217  ;;  %4243 = vpow2.f32 %v2722_v36  ;;  %v2734_v15 = vmul.f32 1.442695, %v2237_v28  ;;  %v2738_v37 = vmul.f32 1.442695, %v2239_v55  ;;  %1987 = vst [vmem:[#allocation5 + $0x7c0] sm:$0xff] %v1731_v14  ;;  %v2244_v56 = vmul.f32 %v5071_v41, %v1731_v14  ;;  %v993_v27 = vpop.f32.mrf.mxu0 }
 0x1d0   :  { %v5648_v0 = vpop.eup %4219  ;;  %4245 = vpow2.f32 %v2732_v22  ;;  %1989 = vst [vmem:[#allocation5 + $0x7d0] sm:$0xff] %v1733_v58  ;;  %v2246_v26 = vmul.f32 %v5071_v41, %v1733_v58  ;;  %v1732_v42 = vmul.f32 %v5066_v32, %v667_v51  ;;  %v1734_v29 = vmul.f32 %v5069_v35, %v924_v20  ;;  %v1250_v24 = vpop.f32.mrf.mxu1 }
 0x1d1   :  { %6359 = vst [vmem:[#allocation79_spill] sm:$0xff] %v5648_v0  ;;  %v5653_v48 = vpop.eup %4221  ;;  %4247 = vpow2.f32 %v2736_v46  ;;  %v2748_v36 = vmul.f32 1.442695, %v2244_v56  ;;  %v1487_v17 = vmul.f32 %v5093_v7, %v993_v27  ;;  %v1489_v28 = vmul.f32 %v5096_v9, %v1250_v24  ;;  %v995_v35 = vpop.f32.mrf.mxu0 }
 0x1d2   :  { %v5657_v55 = vpop.eup %4223  ;;  %4249 = vpow2.f32 %v2734_v15  ;;  %v2752_v14 = vmul.f32 1.442695, %v2246_v26  ;;  %1988 = vst [vmem:[#allocation5 + $0x7c8] sm:$0xff] %v1732_v42  ;;  %v2245_v22 = vmul.f32 %v5071_v41, %v1732_v42  ;;  %1990 = vst [vmem:[#allocation5 + $0x7d8] sm:$0xff] %v1734_v29  ;;  %v2247_v32 = vmul.f32 %v5071_v41, %v1734_v29  ;;  %v1252_v20 = vpop.f32.mrf.mxu1 }
 0x1d3   :  { %6360 = vst [vmem:[#allocation80_spill] sm:$0xff] %v5657_v55  ;;  %v5661_v58 = vpop.eup %4225  ;;  %4251 = vpow2.f32 %v2738_v37  ;;  %1743 = vst [vmem:[#allocation5 + $0x20] sm:$0xff] %v1487_v17  ;;  %v2000_v46 = vmul.f32 %v5071_v41, %v1487_v17  ;;  %v1488_v51 = vmul.f32 %v5105_v25, %v995_v35  ;;  %v1490_v15 = vmul.f32 %v5131_v59, %v1252_v20  ;;  %v999_v27 = vpop.f32.mrf.mxu0 }
 0x1d4   :  { %1745 = vst [vmem:[#allocation5 + $0x30] sm:$0xff] %v1489_v28  ;;  %v5666_v56 = vpop.eup %4227  ;;  %4253 = vpow2.f32 %v2748_v36  ;;  %v2750_v26 = vmul.f32 1.442695, %v2245_v22  ;;  %v2754_v42 = vmul.f32 1.442695, %v2247_v32  ;;  %v1256_v29 = vpop.f32.mrf.mxu1  ;;  %v6361_v24 = vlaneseq }
 0x1d5   :  { %v5669_v0 = vpop.eup %4229  ;;  %4255 = vpow2.f32 %v2752_v14  ;;  %v2260_v37 = vmul.f32 1.442695, %v2000_v46  ;;  %1744 = vst [vmem:[#allocation5 + $0x28] sm:$0xff] %v1488_v51  ;;  %1746 = vst [vmem:[#allocation5 + $0x38] sm:$0xff] %v1490_v15  ;;  %v1495_v17 = vmul.f32 %v5093_v7, %v999_v27  ;;  %v1497_v28 = vmul.f32 %v5096_v9, %v1256_v29  ;;  %v1001_v36 = vpop.f32.mrf.mxu0 }
 0x1d6   :  { %v3128_v55 = vand.u32 127, %v6361_v24  ;;  %v5673_v35 = vpop.eup %4231  ;;  %4257 = vpow2.f32 %v2750_v26  ;;  %v1258_v22 = vpop.f32.mrf.mxu1  ;;  %v3432_v20 = vadd.f32 %v5169_v50, %v5154_v49  ;;  %v3433_v14 = vadd.f32 %v5193_v31, %v5183_v13 }
 0x1d7   :  { %v5681_v46 = vpop.eup %4233  ;;  %4259 = vpow2.f32 %v2754_v42  ;;  %1751 = vst [vmem:[#allocation5 + $0x60] sm:$0xff] %v1495_v17  ;;  %v2008_v51 = vmul.f32 %v5071_v41, %v1495_v17  ;;  %1753 = vst [vmem:[#allocation5 + $0x70] sm:$0xff] %v1497_v28  ;;  %v1496_v15 = vmul.f32 %v5105_v25, %v1001_v36  ;;  %v1498_v26 = vmul.f32 %v5131_v59, %v1258_v22 }
 0x1d8   :  { %v5675_v32 = vadd.s32 512, %v3128_v55  ;;  %v5686_v27 = vpop.eup %4235  ;;  %4261 = vpow2.f32 %v2260_v37  ;;  %v1005_v55 = vpop.f32.mrf.mxu0  ;;  %v3464_v49 = vadd.f32 %v5163_v60, %v3432_v20  ;;  %v3465_v50 = vadd.f32 %v5188_v18, %v3433_v14 }
 0x1d9   :  { %v1262_v29 = vpop.f32.mrf.mxu1  ;;  %v5690_v13 = vpop.eup %4237  ;;  %v2276_v31 = vmul.f32 1.442695, %v2008_v51  ;;  %1752 = vst [vmem:[#allocation5 + $0x68] sm:$0xff] %v1496_v15  ;;  %1754 = vst [vmem:[#allocation5 + $0x78] sm:$0xff] %v1498_v26  ;;  %v1503_v42 = vmul.f32 %v5093_v7, %v1005_v55  ;;  %v3434_v17 = vadd.f32 %v5215_v8, %v5205_v2  ;;  %v3435_v22 = vadd.f32 %v5237_v34, %v5227_v10 }
 0x1da   :  { %v1505_v24 = vmul.f32 %v5096_v9, %v1262_v29  ;;  %v5696_v28 = vpop.eup %4239  ;;  %v1007_v37 = vpop.f32.mrf.mxu0  ;;  %v5699_v60 = vadd.f32 %v5173_v61, %v3464_v49  ;;  %v5702_v18 = vadd.f32 %v5197_v40, %v3465_v50  ;;  %v3436_v20 = vadd.f32 %v5259_v1, %v5249_v23 }
 0x1db   :  { %v1264_v36 = vpop.f32.mrf.mxu1  ;;  %v5708_v14 = vpop.eup %4241  ;;  %4263 = vpow2.f32 %v2276_v31  ;;  %1759 = vst [vmem:[#allocation5 + $0xa0] sm:$0xff] %v1503_v42  ;;  %v2016_v2 = vmul.f32 %v5071_v41, %v1503_v42  ;;  %v1504_v8 = vmul.f32 %v5105_v25, %v1007_v37  ;;  %vm3140_vm1 = vcmp.lt.s32.totalorder %v5675_v32, 600 }
 0x1dc   :  { %1761 = vst [vmem:[#allocation5 + $0xb0] sm:$0xff] %v1505_v24  ;;  %v1506_v61 = vmul.f32 %v5131_v59, %v1264_v36  ;;  %v5714_v40 = vpop.eup %4243  ;;  %v1011_v51 = vpop.f32.mrf.mxu0  ;;  %v3466_v34 = vadd.f32 %v5212_v38, %v3434_v17  ;;  %v3467_v23 = vadd.f32 %v5233_v21, %v3435_v22  ;;  %v3468_v1 = vadd.f32 %v5254_v52, %v3436_v20 }
 0x1dd   :  { %v1268_v10 = vpop.f32.mrf.mxu1  ;;  %v3437_v15 = vadd.f32 %v5281_v12, %v5271_v19  ;;  %v5721_v26 = vpop.eup %4245  ;;  %v2292_v55 = vmul.f32 1.442695, %v2016_v2  ;;  %1760 = vst [vmem:[#allocation5 + $0xa8] sm:$0xff] %v1504_v8  ;;  %v1511_v29 = vmul.f32 %v5093_v7, %v1011_v51  ;;  %v3438_v50 = vadd.f32 %v5303_v30, %v5293_v3 }
 0x1de   :  { %1762 = vst [vmem:[#allocation5 + $0xb8] sm:$0xff] %v1506_v61  ;;  %v1513_v49 = vmul.f32 %v5096_v9, %v1268_v10  ;;  %v5727_v38 = vpop.eup %4247  ;;  %v1013_v21 = vpop.f32.mrf.mxu0  ;;  %v5730_v52 = vadd.f32 %v5218_v63, %v3466_v34  ;;  %v5733_v19 = vadd.f32 %v5242_v43, %v3467_v23  ;;  %v5736_v12 = vadd.f32 %v5263_v6, %v3468_v1  ;;  %v6363_v34 = vld [vmem:[#allocation14_spill] sm:$0xff]  ;;  %v6364_v23 = vld [vmem:[#allocation16_spill] sm:$0xff] }
 0x1df   :  { %v1270_v31 = vpop.f32.mrf.mxu1  ;;  %v3469_v42 = vadd.f32 %v5278_v39, %v3437_v15  ;;  %v5739_v24 = vpop.eup %4249  ;;  %4265 = vpow2.f32 %v2292_v55  ;;  %1767 = vst [vmem:[#allocation5 + $0xe0] sm:$0xff] %v1511_v29  ;;  %v2024_v3 = vmul.f32 %v5071_v41, %v1511_v29  ;;  %v1512_v30 = vmul.f32 %v5105_v25, %v1013_v21  ;;  %v6366_v21 = vld [vmem:[#allocation11_spill] sm:$0xff] }
 0x1e0   :  { %1769 = vst [vmem:[#allocation5 + $0xf0] sm:$0xff] %v1513_v49  ;;  %v1514_v63 = vmul.f32 %v5131_v59, %v1270_v31  ;;  %v5744_v17 = vpop.eup %4251  ;;  %v1017_v43 = vpop.f32.mrf.mxu0  ;;  %v3470_v39 = vadd.f32 %v5299_v16, %v3438_v50  ;;  %v3439_v36 = vadd.f32 %v5325_v11, %v5315_v44  ;;  %v3440_v22 = vadd.f32 %v5347_v57, %v5337_v62  ;;  %v6362_v62 = vld [vmem:[#allocation10_spill] sm:$0xff]  ;;  %v6365_v49 = vld [vmem:[#allocation9_spill] sm:$0xff] }
 0x1e1   :  { %v1274_v37 = vpop.f32.mrf.mxu1  ;;  %v5747_v6 = vadd.f32 %v5284_v47, %v3469_v42  ;;  %v5754_v20 = vpop.eup %4253  ;;  %v2308_v2 = vmul.f32 1.442695, %v2024_v3  ;;  %1768 = vst [vmem:[#allocation5 + $0xe8] sm:$0xff] %v1512_v30  ;;  %v1519_v8 = vmul.f32 %v5093_v7, %v1017_v43  ;;  %v3441_v47 = vadd.f32 %v5369_v54, %v5359_v4  ;;  %v6367_v42 = vld [vmem:[#allocation12_spill] sm:$0xff]  ;;  %v6368_v30 = vld [vmem:[#allocation15_spill] sm:$0xff] }
 0x1e2   :  { %1770 = vst [vmem:[#allocation5 + $0xf8] sm:$0xff] %v1514_v63  ;;  %v1521_v61 = vmul.f32 %v5096_v9, %v1274_v37  ;;  %v5760_v51 = vpop.eup %4255  ;;  %v1019_v16 = vpop.f32.mrf.mxu0  ;;  %v5763_v44 = vadd.f32 %v5308_v45, %v3470_v39  ;;  %v3471_v11 = vadd.f32 %v5320_v53, %v3439_v36  ;;  %v3472_v57 = vadd.f32 %v6362_v62, %v3440_v22  ;;  %v6369_v22 = vld [vmem:[#allocation18_spill] sm:$0xff]  ;;  %v6372_v62 = vld [vmem:[#allocation17_spill] sm:$0xff] }
 0x1e3   :  { %v1276_v10 = vpop.f32.mrf.mxu1  ;;  %v3442_v1 = vadd.f32 %v6364_v23, %v6363_v34  ;;  %v5769_v15 = vpop.eup %4257  ;;  %4267 = vpow2.f32 %v2308_v2  ;;  %1775 = vst [vmem:[#allocation5 + $0x120] sm:$0xff] %v1519_v8  ;;  %v2032_v54 = vmul.f32 %v5071_v41, %v1519_v8  ;;  %v1520_v4 = vmul.f32 %v5105_v25, %v1019_v16  ;;  %v6370_v2 = vld [vmem:[#allocation20_spill] sm:$0xff]  ;;  %v6373_v34 = vld [vmem:[#allocation22_spill] sm:$0xff] }
 0x1e4   :  { %1777 = vst [vmem:[#allocation5 + $0x130] sm:$0xff] %v1521_v61  ;;  %v1522_v55 = vmul.f32 %v5131_v59, %v1276_v10  ;;  %v5774_v45 = vpop.eup %4259  ;;  %v1023_v29 = vpop.f32.mrf.mxu0  ;;  %v5777_v50 = vadd.f32 %v6365_v49, %v3471_v11  ;;  %v5780_v31 = vadd.f32 %v6366_v21, %v3472_v57  ;;  %v3473_v3 = vadd.f32 %v6367_v42, %v3441_v47  ;;  %v6371_v11 = vld [vmem:[#allocation13_spill] sm:$0xff]  ;;  %v6374_v23 = vld [vmem:[#allocation24_spill] sm:$0xff]  ;;  %v6375_v42 = vld [vmem:[#allocation19_spill] sm:$0xff] }
 0x1e5   :  { %v1280_v53 = vpop.f32.mrf.mxu1  ;;  %v3474_v63 = vadd.f32 %v6368_v30, %v3442_v1  ;;  %v4262_v43 = vpop.eup %4261  ;;  %v2324_v37 = vmul.f32 1.442695, %v2032_v54  ;;  %1776 = vst [vmem:[#allocation5 + $0x128] sm:$0xff] %v1520_v4  ;;  %v1527_v39 = vmul.f32 %v5093_v7, %v1023_v29  ;;  %v3443_v8 = vadd.f32 %v6370_v2, %v6369_v22  ;;  %v6376_v30 = vld [vmem:[#allocation23_spill] sm:$0xff]  ;;  %v6378_v22 = vld [vmem:[#allocation28_spill] sm:$0xff] }
 0x1e6   :  { %1778 = vst [vmem:[#allocation5 + $0x138] sm:$0xff] %v1522_v55  ;;  %v1529_v36 = vmul.f32 %v5096_v9, %v1280_v53  ;;  %v1025_v61 = vpop.f32.mrf.mxu0  ;;  %v3148_v10 = vsel %vm3140_vm1, %v4262_v43, 0.0  ;;  %v5791_v47 = vadd.f32 %v6371_v11, %v3473_v3  ;;  %v3444_v1 = vadd.f32 %v6374_v23, %v6373_v34  ;;  %v6377_v43 = vld [vmem:[#allocation26_spill] sm:$0xff]  ;;  %v6381_v23 = vld [vmem:[#allocation27_spill] sm:$0xff] }
 0x1e7   :  { %v1282_v16 = vpop.f32.mrf.mxu1  ;;  %v5794_v57 = vadd.f32 %v6372_v62, %v3474_v63  ;;  %4269 = vpow2.f32 %v2324_v37  ;;  %1783 = vst [vmem:[#allocation5 + $0x160] sm:$0xff] %v1527_v39  ;;  %v2040_v54 = vmul.f32 %v5071_v41, %v1527_v39  ;;  %v1528_v4 = vmul.f32 %v5105_v25, %v1025_v61  ;;  %v6380_v62 = vld [vmem:[#allocation25_spill] sm:$0xff] }
 0x1e8   :  { %1785 = vst [vmem:[#allocation5 + $0x170] sm:$0xff] %v1529_v36  ;;  %v1530_v55 = vmul.f32 %v5131_v59, %v1282_v16  ;;  %v4264_v29 = vpop.eup %4263  ;;  %v1029_v53 = vpop.f32.mrf.mxu0  ;;  %v3528_v21 = vadd.f32 %v5699_v60, %v3148_v10  ;;  %v3475_v3 = vadd.f32 %v6375_v42, %v3443_v8  ;;  %v3476_v63 = vadd.f32 %v6376_v30, %v3444_v1  ;;  %v6379_v10 = vld [vmem:[#allocation21_spill] sm:$0xff]  ;;  %v6383_v42 = vld [vmem:[#allocation30_spill] sm:$0xff] }
 0x1e9   :  { %v1286_v49 = vpop.f32.mrf.mxu1  ;;  %v3445_v37 = vadd.f32 %v6378_v22, %v6377_v43  ;;  %v2340_v2 = vmul.f32 1.442695, %v2040_v54  ;;  %1784 = vst [vmem:[#allocation5 + $0x168] sm:$0xff] %v1528_v4  ;;  %v1535_v39 = vmul.f32 %v5093_v7, %v1029_v53  ;;  %v3156_v61 = vsel %vm3140_vm1, %v4264_v29, 0.0  ;;  %v6386_v43 = vld [vmem:[#allocation36_spill] sm:$0xff] }
 0x1ea   :  { %1786 = vst [vmem:[#allocation5 + $0x178] sm:$0xff] %v1530_v55  ;;  %v1537_v36 = vmul.f32 %v5096_v9, %v1286_v49  ;;  %3752 = vadd.xlane.f32.xlu0 %v3528_v21  ;;  %v1031_v16 = vpop.f32.mrf.mxu0  ;;  %v3529_v8 = vadd.f32 %v5702_v18, %v3156_v61  ;;  %v5812_v11 = vadd.f32 %v6379_v10, %v3475_v3  ;;  %v6382_v49 = vld [vmem:[#allocation29_spill] sm:$0xff]  ;;  %v6384_v3 = vld [vmem:[#allocation32_spill] sm:$0xff] }
 0x1eb   :  { %v1288_v60 = vpop.f32.mrf.mxu1  ;;  %v5815_v34 = vadd.f32 %v6380_v62, %v3476_v63  ;;  %v3477_v1 = vadd.f32 %v6381_v23, %v3445_v37  ;;  %4271 = vpow2.f32 %v2340_v2  ;;  %1791 = vst [vmem:[#allocation5 + $0x1a0] sm:$0xff] %v1535_v39  ;;  %v2048_v54 = vmul.f32 %v5071_v41, %v1535_v39  ;;  %v6385_v63 = vld [vmem:[#allocation34_spill] sm:$0xff]  ;;  %v6388_v2 = vld [vmem:[#allocation40_spill] sm:$0xff]  ;;  %v6389_v23 = vld [vmem:[#allocation31_spill] sm:$0xff] }
 0x1ec   :  { %1793 = vst [vmem:[#allocation5 + $0x1b0] sm:$0xff] %v1537_v36  ;;  %v1536_v4 = vmul.f32 %v5105_v25, %v1031_v16  ;;  %v1538_v55 = vmul.f32 %v5131_v59, %v1288_v60  ;;  %v4266_v29 = vpop.eup %4265  ;;  %v1035_v53 = vpop.f32.mrf.mxu0  ;;  %3754 = vadd.xlane.f32.xlu1 %v3529_v8  ;;  %v3446_v30 = vadd.f32 %v6384_v3, %v6383_v42  ;;  %v6387_v37 = vld [vmem:[#allocation38_spill] sm:$0xff]  ;;  %v6391_v3 = vld [vmem:[#allocation39_spill] sm:$0xff] }
 0x1ed   :  { %v1292_v18 = vpop.f32.mrf.mxu1  ;;  %v5822_v21 = vadd.f32 %v6382_v49, %v3477_v1  ;;  %v3447_v22 = vadd.f32 %v6386_v43, %v6385_v63  ;;  %v3448_v39 = vadd.f32 %v6388_v2, %v6387_v37  ;;  %v2356_v36 = vmul.f32 1.442695, %v2048_v54  ;;  %v6390_v49 = vld [vmem:[#allocation35_spill] sm:$0xff]  ;;  %v6394_v37 = vld [vmem:[#allocation41_spill] sm:$0xff] }
 0x1ee   :  { %1792 = vst [vmem:[#allocation5 + $0x1a8] sm:$0xff] %v1536_v4  ;;  %1794 = vst [vmem:[#allocation5 + $0x1b8] sm:$0xff] %v1538_v55  ;;  %v1543_v61 = vmul.f32 %v5093_v7, %v1035_v53  ;;  %v1545_v16 = vmul.f32 %v5096_v9, %v1292_v18  ;;  %v3164_v60 = vsel %vm3140_vm1, %v4266_v29, 0.0  ;;  %v1037_v8 = vpop.f32.mrf.mxu0  ;;  %v3478_v1 = vadd.f32 %v6389_v23, %v3446_v30  ;;  %v6393_v30 = vld [vmem:[#allocation37_spill] sm:$0xff] }
 0x1ef   :  { %v1294_v10 = vpop.f32.mrf.mxu1  ;;  %v3530_v62 = vadd.f32 %v5730_v52, %v3164_v60  ;;  %v3479_v42 = vadd.f32 %v6390_v49, %v3447_v22  ;;  %v3480_v63 = vadd.f32 %v6391_v3, %v3448_v39  ;;  %4273 = vpow2.f32 %v2356_v36  ;;  %v6392_v52 = vld [vmem:[#allocation33_spill] sm:$0xff]  ;;  %v6395_v39 = vld [vmem:[#allocation42_spill] sm:$0xff]  ;;  %v6396_v36 = vld [vmem:[#allocation44_spill] sm:$0xff] }
 0x1f0   :  { %1799 = vst [vmem:[#allocation5 + $0x1e0] sm:$0xff] %v1543_v61  ;;  %v2056_v54 = vmul.f32 %v5071_v41, %v1543_v61  ;;  %1801 = vst [vmem:[#allocation5 + $0x1f0] sm:$0xff] %v1545_v16  ;;  %v1544_v4 = vmul.f32 %v5105_v25, %v1037_v8  ;;  %v1546_v55 = vmul.f32 %v5131_v59, %v1294_v10  ;;  %v4268_v29 = vpop.eup %4267  ;;  %v1041_v53 = vpop.f32.mrf.mxu0  ;;  %v6397_v49 = vld [vmem:[#allocation43_spill] sm:$0xff]  ;;  %v6398_v3 = vld [vmem:[#allocation46_spill] sm:$0xff] }
 0x1f1   :  { %v1298_v18 = vpop.f32.mrf.mxu1  ;;  %3756 = vadd.xlane.f32.xlu0 %v3530_v62  ;;  %v5842_v43 = vadd.f32 %v6392_v52, %v3478_v1  ;;  %v5845_v22 = vadd.f32 %v6393_v30, %v3479_v42  ;;  %v5848_v2 = vadd.f32 %v6394_v37, %v3480_v63  ;;  %v3449_v61 = vadd.f32 %v6396_v36, %v6395_v39  ;;  %v6399_v63 = vld [vmem:[#allocation48_spill] sm:$0xff]  ;;  %v6400_v30 = vld [vmem:[#allocation50_spill] sm:$0xff]  ;;  %v6402_v39 = vld [vmem:[#allocation45_spill] sm:$0xff] }
 0x1f2   :  { %v2372_v16 = vmul.f32 1.442695, %v2056_v54  ;;  %1800 = vst [vmem:[#allocation5 + $0x1e8] sm:$0xff] %v1544_v4  ;;  %1802 = vst [vmem:[#allocation5 + $0x1f8] sm:$0xff] %v1546_v55  ;;  %v1551_v60 = vmul.f32 %v5093_v7, %v1041_v53  ;;  %v1553_v8 = vmul.f32 %v5096_v9, %v1298_v18  ;;  %v3172_v10 = vsel %vm3140_vm1, %v4268_v29, 0.0  ;;  %v1043_v62 = vpop.f32.mrf.mxu0  ;;  %v6401_v54 = vld [vmem:[#allocation52_spill] sm:$0xff] }
 0x1f3   :  { %v1300_v23 = vpop.f32.mrf.mxu1  ;;  %v3531_v1 = vadd.f32 %v5733_v19, %v3172_v10  ;;  %v3481_v42 = vadd.f32 %v6397_v49, %v3449_v61  ;;  %v3450_v52 = vadd.f32 %v6399_v63, %v6398_v3  ;;  %v3451_v4 = vadd.f32 %v6401_v54, %v6400_v30  ;;  %v6403_v61 = vld [vmem:[#allocation47_spill] sm:$0xff]  ;;  %v6406_v63 = vld [vmem:[#allocation56_spill] sm:$0xff] }
 0x1f4   :  { %4275 = vpow2.f32 %v2372_v16  ;;  %1807 = vst [vmem:[#allocation5 + $0x220] sm:$0xff] %v1551_v60  ;;  %v2064_v55 = vmul.f32 %v5071_v41, %v1551_v60  ;;  %1809 = vst [vmem:[#allocation5 + $0x230] sm:$0xff] %v1553_v8  ;;  %v1552_v53 = vmul.f32 %v5105_v25, %v1043_v62  ;;  %v1554_v29 = vmul.f32 %v5131_v59, %v1300_v23  ;;  %v4270_v18 = vpop.eup %4269  ;;  %v1047_v37 = vpop.f32.mrf.mxu0  ;;  %v6404_v49 = vld [vmem:[#allocation51_spill] sm:$0xff]  ;;  %v6405_v16 = vld [vmem:[#allocation54_spill] sm:$0xff] }
 0x1f5   :  { %v1304_v19 = vpop.f32.mrf.mxu1  ;;  %3758 = vadd.xlane.f32.xlu0 %v3531_v1  ;;  %v5866_v36 = vadd.f32 %v6402_v39, %v3481_v42  ;;  %v3482_v10 = vadd.f32 %v6403_v61, %v3450_v52  ;;  %v3483_v3 = vadd.f32 %v6404_v49, %v3451_v4  ;;  %v3452_v30 = vadd.f32 %v6406_v63, %v6405_v16  ;;  %v6407_v52 = vld [vmem:[#allocation49_spill] sm:$0xff]  ;;  %v6414_v63 = vld [vmem:[#allocation60_spill] sm:$0xff] }
 0x1f6   :  { %v2388_v60 = vmul.f32 1.442695, %v2064_v55  ;;  %1808 = vst [vmem:[#allocation5 + $0x228] sm:$0xff] %v1552_v53  ;;  %1810 = vst [vmem:[#allocation5 + $0x238] sm:$0xff] %v1554_v29  ;;  %v1559_v8 = vmul.f32 %v5093_v7, %v1047_v37  ;;  %v1561_v62 = vmul.f32 %v5096_v9, %v1304_v19  ;;  %v3180_v23 = vsel %vm3140_vm1, %v4270_v18, 0.0  ;;  %v1049_v1 = vpop.f32.mrf.mxu0  ;;  %v6408_v4 = vld [vmem:[#allocation53_spill] sm:$0xff] }
 0x1f7   :  { %v1306_v42 = vpop.f32.mrf.mxu1  ;;  %v3532_v54 = vadd.f32 %v5736_v12, %v3180_v23  ;;  %v5878_v39 = vadd.f32 %v6407_v52, %v3482_v10  ;;  %v5881_v61 = vadd.f32 %v6408_v4, %v3483_v3  ;;  %v6410_v55 = vld [vmem:[#allocation55_spill] sm:$0xff]  ;;  %v1560_v37 = vmul.f32 %v5105_v25, %v1049_v1  ;;  %v6411_v10 = vld [vmem:[#allocation57_spill] sm:$0xff]  ;;  %v6413_v3 = vld [vmem:[#allocation58_spill] sm:$0xff] }
 0x1f8   :  { %v3484_v53 = vadd.f32 %v6410_v55, %v3452_v30  ;;  %4277 = vpow2.f32 %v2388_v60  ;;  %1815 = vst [vmem:[#allocation5 + $0x260] sm:$0xff] %v1559_v8  ;;  %v2072_v29 = vmul.f32 %v5071_v41, %v1559_v8  ;;  %1817 = vst [vmem:[#allocation5 + $0x270] sm:$0xff] %v1561_v62  ;;  %v1562_v18 = vmul.f32 %v5131_v59, %v1306_v42  ;;  %v4272_v19 = vpop.eup %4271  ;;  %v1053_v49 = vpop.f32.mrf.mxu0  ;;  %v6415_v30 = vld [vmem:[#allocation62_spill] sm:$0xff]  ;;  %v6416_v60 = vld [vmem:[#allocation64_spill] sm:$0xff] }
 0x1f9   :  { %6409 = vst [vmem:[#allocation10_spill] sm:$0xff] %v5881_v61  ;;  %v1310_v12 = vpop.f32.mrf.mxu1  ;;  %3760 = vadd.xlane.f32.xlu1 %v3532_v54  ;;  %v3453_v23 = vadd.f32 %v6414_v63, %v6413_v3  ;;  %v3454_v52 = vadd.f32 %v6416_v60, %v6415_v30  ;;  %v6417_v4 = vld [vmem:[#allocation66_spill] sm:$0xff]  ;;  %v6418_v8 = vld [vmem:[#allocation68_spill] sm:$0xff]  ;;  %1816 = vst [vmem:[#allocation5 + $0x268] sm:$0xff] %v1560_v37  ;;  %v1567_v1 = vmul.f32 %v5093_v7, %v1053_v49 }
 0x1fa   :  { %v5888_v16 = vadd.f32 %v6411_v10, %v3484_v53  ;;  %v3455_v62 = vadd.f32 %v6418_v8, %v6417_v4  ;;  %v2404_v55 = vmul.f32 1.442695, %v2072_v29  ;;  %1818 = vst [vmem:[#allocation5 + $0x278] sm:$0xff] %v1562_v18  ;;  %v1569_v42 = vmul.f32 %v5096_v9, %v1310_v12  ;;  %v1055_v53 = vpop.f32.mrf.mxu0  ;;  %v6419_v63 = vld [vmem:[#allocation59_spill] sm:$0xff] }
 0x1fb   :  { %v3188_v54 = vsel %vm3140_vm1, %v4272_v19, 0.0  ;;  %v1312_v10 = vpop.f32.mrf.mxu1  ;;  %v6420_v30 = vld [vmem:[#allocation63_spill] sm:$0xff]  ;;  %1823 = vst [vmem:[#allocation5 + $0x2a0] sm:$0xff] %v1567_v1  ;;  %v2080_v29 = vmul.f32 %v5071_v41, %v1567_v1  ;;  %v1568_v37 = vmul.f32 %v5105_v25, %v1055_v53  ;;  %v6426_v1 = vld [vmem:[#allocation72_spill] sm:$0xff] }
 0x1fc   :  { %6412 = vst [vmem:[#allocation14_spill] sm:$0xff] %v5888_v16  ;;  %v3533_v3 = vadd.f32 %v5747_v6, %v3188_v54  ;;  %v3485_v16 = vadd.f32 %v6419_v63, %v3453_v23  ;;  %v3486_v60 = vadd.f32 %v6420_v30, %v3454_v52  ;;  %v6421_v61 = vld [vmem:[#allocation67_spill] sm:$0xff]  ;;  %4279 = vpow2.f32 %v2404_v55  ;;  %1825 = vst [vmem:[#allocation5 + $0x2b0] sm:$0xff] %v1569_v42  ;;  %v4274_v19 = vpop.eup %4273  ;;  %v1059_v49 = vpop.f32.mrf.mxu0  ;;  %v6422_v6 = vld [vmem:[#allocation61_spill] sm:$0xff] }
 0x1fd   :  { %v3487_v4 = vadd.f32 %v6421_v61, %v3455_v62  ;;  %v1570_v18 = vmul.f32 %v5131_v59, %v1312_v10  ;;  %v1316_v12 = vpop.f32.mrf.mxu1  ;;  %v6423_v23 = vld [vmem:[#allocation65_spill] sm:$0xff]  ;;  %v6425_v55 = vld [vmem:[#allocation70_spill] sm:$0xff]  ;;  %v2420_v54 = vmul.f32 1.442695, %v2080_v29  ;;  %1824 = vst [vmem:[#allocation5 + $0x2a8] sm:$0xff] %v1568_v37  ;;  %v1575_v53 = vmul.f32 %v5093_v7, %v1059_v49 }
 0x1fe   :  { %3762 = vadd.xlane.f32.xlu0 %v3533_v3  ;;  %v5908_v8 = vadd.f32 %v6422_v6, %v3485_v16  ;;  %v5911_v52 = vadd.f32 %v6423_v23, %v3486_v60  ;;  %v6424_v61 = vld [vmem:[#allocation69_spill] sm:$0xff]  ;;  %v3456_v42 = vadd.f32 %v6426_v1, %v6425_v55  ;;  %v1577_v10 = vmul.f32 %v5096_v9, %v1316_v12  ;;  %v1061_v3 = vpop.f32.mrf.mxu0  ;;  %v6427_v60 = vld [vmem:[#allocation71_spill] sm:$0xff]  ;;  %v6428_v6 = vld [vmem:[#allocation74_spill] sm:$0xff] }
 0x1ff   :  { %v5914_v62 = vadd.f32 %v6424_v61, %v3487_v4  ;;  %1826 = vst [vmem:[#allocation5 + $0x2b8] sm:$0xff] %v1570_v18  ;;  %v3196_v16 = vsel %vm3140_vm1, %v4274_v19, 0.0  ;;  %v1318_v63 = vpop.f32.mrf.mxu1  ;;  %v6429_v23 = vld [vmem:[#allocation76_spill] sm:$0xff]  ;;  %v6430_v55 = vld [vmem:[#allocation78_spill] sm:$0xff]  ;;  %4281 = vpow2.f32 %v2420_v54  ;;  %1831 = vst [vmem:[#allocation5 + $0x2e0] sm:$0xff] %v1575_v53  ;;  %v2088_v37 = vmul.f32 %v5071_v41, %v1575_v53 }
 0x200   :  { %v3534_v30 = vadd.f32 %v5763_v44, %v3196_v16  ;;  %v3488_v4 = vadd.f32 %v6427_v60, %v3456_v42  ;;  %v3457_v61 = vadd.f32 %v6429_v23, %v6428_v6  ;;  %v3458_v29 = vadd.f32 %v5645_v5, %v6430_v55  ;;  %1833 = vst [vmem:[#allocation5 + $0x2f0] sm:$0xff] %v1577_v10  ;;  %v1065_v12 = vpop.f32.mrf.mxu0  ;;  %v6431_v1 = vld [vmem:[#allocation73_spill] sm:$0xff]  ;;  %v6432_v16 = vld [vmem:[#allocation75_spill] sm:$0xff] }
 0x201   :  { %v1576_v18 = vmul.f32 %v5105_v25, %v1061_v3  ;;  %v1578_v19 = vmul.f32 %v5131_v59, %v1318_v63  ;;  %v4276_v49 = vpop.eup %4275  ;;  %v1322_v44 = vpop.f32.mrf.mxu1  ;;  %v3459_v54 = vadd.f32 %v5661_v58, %v5653_v48  ;;  %v2436_v53 = vmul.f32 1.442695, %v2088_v37  ;;  %v6433_v23 = vld [vmem:[#allocation77_spill] sm:$0xff]  ;;  %v6435_v48 = vld [vmem:[#allocation80_spill] sm:$0xff] }
 0x202   :  { %3764 = vadd.xlane.f32.xlu1 %v3534_v30  ;;  %v5932_v42 = vadd.f32 %v6431_v1, %v3488_v4  ;;  %v3489_v60 = vadd.f32 %v6432_v16, %v3457_v61  ;;  %v3490_v5 = vadd.f32 %v5642_v33, %v3458_v29  ;;  %v1583_v10 = vmul.f32 %v5093_v7, %v1065_v12  ;;  %v1067_v30 = vpop.f32.mrf.mxu0  ;;  %v6434_v33 = vld [vmem:[#allocation79_spill] sm:$0xff] }
 0x203   :  { %1832 = vst [vmem:[#allocation5 + $0x2e8] sm:$0xff] %v1576_v18  ;;  %1834 = vst [vmem:[#allocation5 + $0x2f8] sm:$0xff] %v1578_v19  ;;  %v1585_v3 = vmul.f32 %v5096_v9, %v1322_v44  ;;  %v3204_v63 = vsel %vm3140_vm1, %v4276_v49, 0.0  ;;  %v1324_v4 = vpop.f32.mrf.mxu1  ;;  %v3491_v58 = vadd.f32 %v6435_v48, %v3459_v54  ;;  %4283 = vpow2.f32 %v2436_v53 }
 0x204   :  { %v3535_v6 = vadd.f32 %v5777_v50, %v3204_v63  ;;  %v5944_v61 = vadd.f32 %v6433_v23, %v3489_v60  ;;  %v5947_v55 = vadd.f32 %v6434_v33, %v3490_v5  ;;  %1839 = vst [vmem:[#allocation5 + $0x320] sm:$0xff] %v1583_v10  ;;  %v2096_v29 = vmul.f32 %v5071_v41, %v1583_v10  ;;  %v1071_v49 = vpop.f32.mrf.mxu0 }
 0x205   :  { %1841 = vst [vmem:[#allocation5 + $0x330] sm:$0xff] %v1585_v3  ;;  %v1584_v37 = vmul.f32 %v5105_v25, %v1067_v30  ;;  %v1586_v18 = vmul.f32 %v5131_v59, %v1324_v4  ;;  %v4278_v19 = vpop.eup %4277  ;;  %v1328_v50 = vpop.f32.mrf.mxu1  ;;  %v5954_v12 = vadd.f32 %v5666_v56, %v3491_v58  ;;  %v3460_v44 = vadd.f32 %v5681_v46, %v5669_v0 }
 0x206   :  { %3766 = vadd.xlane.f32.xlu0 %v3535_v6  ;;  %v3461_v1 = vadd.f32 %v5708_v14, %v5690_v13  ;;  %v3462_v16 = vadd.f32 %v5739_v24, %v5721_v26  ;;  %v2452_v60 = vmul.f32 1.442695, %v2096_v29  ;;  %v1591_v5 = vmul.f32 %v5093_v7, %v1071_v49  ;;  %v1073_v53 = vpop.f32.mrf.mxu0 }
 0x207   :  { %1840 = vst [vmem:[#allocation5 + $0x328] sm:$0xff] %v1584_v37  ;;  %1842 = vst [vmem:[#allocation5 + $0x338] sm:$0xff] %v1586_v18  ;;  %v1593_v54 = vmul.f32 %v5096_v9, %v1328_v50  ;;  %v3212_v56 = vsel %vm3140_vm1, %v4278_v19, 0.0  ;;  %v1330_v10 = vpop.f32.mrf.mxu1  ;;  %v3492_v46 = vadd.f32 %v5673_v35, %v3460_v44  ;;  %v1592_v24 = vmul.f32 %v5105_v25, %v1073_v53 }
 0x208   :  { %v3536_v0 = vadd.f32 %v5780_v31, %v3212_v56  ;;  %v3493_v13 = vadd.f32 %v5696_v28, %v3461_v1  ;;  %v3494_v14 = vadd.f32 %v5727_v38, %v3462_v16  ;;  %4285 = vpow2.f32 %v2452_v60  ;;  %1847 = vst [vmem:[#allocation5 + $0x360] sm:$0xff] %v1591_v5  ;;  %v1077_v30 = vpop.f32.mrf.mxu0 }
 0x209   :  { %v2104_v26 = vmul.f32 %v5071_v41, %v1591_v5  ;;  %1849 = vst [vmem:[#allocation5 + $0x370] sm:$0xff] %v1593_v54  ;;  %v1594_v3 = vmul.f32 %v5131_v59, %v1330_v10  ;;  %v4280_v63 = vpop.eup %4279  ;;  %v1334_v4 = vpop.f32.mrf.mxu1  ;;  %v5974_v31 = vadd.f32 %v5686_v27, %v3492_v46  ;;  %v3463_v38 = vadd.f32 %v5769_v15, %v5754_v20 }
 0x20a   :  { %3768 = vadd.xlane.f32.xlu1 %v3536_v0  ;;  %v5977_v35 = vadd.f32 %v5714_v40, %v3493_v13  ;;  %v5980_v28 = vadd.f32 %v5744_v17, %v3494_v14  ;;  %1848 = vst [vmem:[#allocation5 + $0x368] sm:$0xff] %v1592_v24  ;;  %v1599_v23 = vmul.f32 %v5093_v7, %v1077_v30  ;;  %v3220_v27 = vsel %vm3140_vm1, %v4280_v63, 0.0  ;;  %v1079_v48 = vpop.f32.mrf.mxu0 }
 0x20b   :  { %v2468_v6 = vmul.f32 1.442695, %v2104_v26  ;;  %1850 = vst [vmem:[#allocation5 + $0x378] sm:$0xff] %v1594_v3  ;;  %v1601_v33 = vmul.f32 %v5096_v9, %v1334_v4  ;;  %v1336_v58 = vpop.f32.mrf.mxu1  ;;  %v3537_v40 = vadd.f32 %v5791_v47, %v3220_v27  ;;  %v3495_v17 = vadd.f32 %v5760_v51, %v3463_v38 }
 0x20c   :  { %1855 = vst [vmem:[#allocation5 + $0x3a0] sm:$0xff] %v1599_v23  ;;  %v2112_v20 = vmul.f32 %v5071_v41, %v1599_v23  ;;  %v1600_v15 = vmul.f32 %v5105_v25, %v1079_v48  ;;  %v1602_v29 = vmul.f32 %v5131_v59, %v1336_v58  ;;  %v4282_v37 = vpop.eup %4281  ;;  %v1083_v18 = vpop.f32.mrf.mxu0 }
 0x20d   :  { %4287 = vpow2.f32 %v2468_v6  ;;  %1857 = vst [vmem:[#allocation5 + $0x3b0] sm:$0xff] %v1601_v33  ;;  %v1340_v19 = vpop.f32.mrf.mxu1  ;;  %3770 = vadd.xlane.f32.xlu0 %v3537_v40  ;;  %v5994_v49 = vadd.f32 %v5774_v45, %v3495_v17  ;;  %v1607_v51 = vmul.f32 %v5093_v7, %v1083_v18  ;;  %v3228_v44 = vsel %vm3140_vm1, %v4282_v37, 0.0 }
 0x20e   :  { %v2484_v50 = vmul.f32 1.442695, %v2112_v20  ;;  %1856 = vst [vmem:[#allocation5 + $0x3a8] sm:$0xff] %v1600_v15  ;;  %1858 = vst [vmem:[#allocation5 + $0x3b8] sm:$0xff] %v1602_v29  ;;  %v1609_v47 = vmul.f32 %v5096_v9, %v1340_v19  ;;  %v1085_v1 = vpop.f32.mrf.mxu0  ;;  %v3538_v60 = vadd.f32 %v5794_v57, %v3228_v44 }
 0x20f   :  { %v1342_v16 = vpop.f32.mrf.mxu1  ;;  %1863 = vst [vmem:[#allocation5 + $0x3e0] sm:$0xff] %v1607_v51  ;;  %v2120_v5 = vmul.f32 %v5071_v41, %v1607_v51  ;;  %v1608_v45 = vmul.f32 %v5105_v25, %v1085_v1 }
 0x210   :  { %4289 = vpow2.f32 %v2484_v50  ;;  %1865 = vst [vmem:[#allocation5 + $0x3f0] sm:$0xff] %v1609_v47  ;;  %v1610_v54 = vmul.f32 %v5131_v59, %v1342_v16  ;;  %v4284_v56 = vpop.eup %4283  ;;  %v1089_v53 = vpop.f32.mrf.mxu0  ;;  %3772 = vadd.xlane.f32.xlu1 %v3538_v60 }
 0x211   :  { %v1346_v10 = vpop.f32.mrf.mxu1  ;;  %v2500_v0 = vmul.f32 1.442695, %v2120_v5  ;;  %1864 = vst [vmem:[#allocation5 + $0x3e8] sm:$0xff] %v1608_v45  ;;  %v1615_v46 = vmul.f32 %v5093_v7, %v1089_v53  ;;  %v3236_v13 = vsel %vm3140_vm1, %v4284_v56, 0.0 }
 0x212   :  { %1866 = vst [vmem:[#allocation5 + $0x3f8] sm:$0xff] %v1610_v54  ;;  %v1617_v57 = vmul.f32 %v5096_v9, %v1346_v10  ;;  %v1091_v14 = vpop.f32.mrf.mxu0  ;;  %v3539_v24 = vadd.f32 %v5812_v11, %v3236_v13 }
 0x213   :  { %v1348_v26 = vpop.f32.mrf.mxu1  ;;  %4291 = vpow2.f32 %v2500_v0  ;;  %1871 = vst [vmem:[#allocation5 + $0x420] sm:$0xff] %v1615_v46  ;;  %v2128_v3 = vmul.f32 %v5071_v41, %v1615_v46  ;;  %v1616_v63 = vmul.f32 %v5105_v25, %v1091_v14 }
 0x214   :  { %1873 = vst [vmem:[#allocation5 + $0x430] sm:$0xff] %v1617_v57  ;;  %v1618_v30 = vmul.f32 %v5131_v59, %v1348_v26  ;;  %v1095_v38 = vpop.f32.mrf.mxu0  ;;  %3774 = vadd.xlane.f32.xlu0 %v3539_v24 }
 0x215   :  { %v4286_v4 = vpop.eup %4285  ;;  %v1352_v6 = vpop.f32.mrf.mxu1  ;;  %v2516_v23 = vmul.f32 1.442695, %v2128_v3  ;;  %1872 = vst [vmem:[#allocation5 + $0x428] sm:$0xff] %v1616_v63  ;;  %v1623_v33 = vmul.f32 %v5093_v7, %v1095_v38 }
 0x216   :  { %1874 = vst [vmem:[#allocation5 + $0x438] sm:$0xff] %v1618_v30  ;;  %v1625_v11 = vmul.f32 %v5096_v9, %v1352_v6  ;;  %v3244_v27 = vsel %vm3140_vm1, %v4286_v4, 0.0  ;;  %v1097_v48 = vpop.f32.mrf.mxu0 }
 0x217   :  { %v1354_v58 = vpop.f32.mrf.mxu1  ;;  %v3540_v40 = vadd.f32 %v5815_v34, %v3244_v27  ;;  %4293 = vpow2.f32 %v2516_v23  ;;  %1879 = vst [vmem:[#allocation5 + $0x460] sm:$0xff] %v1623_v33  ;;  %v2136_v17 = vmul.f32 %v5071_v41, %v1623_v33  ;;  %v1624_v20 = vmul.f32 %v5105_v25, %v1097_v48 }
 0x218   :  { %1881 = vst [vmem:[#allocation5 + $0x470] sm:$0xff] %v1625_v11  ;;  %v1626_v15 = vmul.f32 %v5131_v59, %v1354_v58  ;;  %v1101_v37 = vpop.f32.mrf.mxu0 }
 0x219   :  { %v1358_v18 = vpop.f32.mrf.mxu1  ;;  %3776 = vadd.xlane.f32.xlu1 %v3540_v40  ;;  %v2532_v19 = vmul.f32 1.442695, %v2136_v17  ;;  %1880 = vst [vmem:[#allocation5 + $0x468] sm:$0xff] %v1624_v20  ;;  %v1631_v50 = vmul.f32 %v5093_v7, %v1101_v37 }
 0x21a   :  { %v4288_v29 = vpop.eup %4287  ;;  %1882 = vst [vmem:[#allocation5 + $0x478] sm:$0xff] %v1626_v15  ;;  %v1633_v34 = vmul.f32 %v5096_v9, %v1358_v18  ;;  %v1103_v47 = vpop.f32.mrf.mxu0 }
 0x21b   :  { %v3252_v51 = vsel %vm3140_vm1, %v4288_v29, 0.0  ;;  %v1360_v44 = vpop.f32.mrf.mxu1  ;;  %4295 = vpow2.f32 %v2532_v19  ;;  %1887 = vst [vmem:[#allocation5 + $0x4a0] sm:$0xff] %v1631_v50  ;;  %v2144_v16 = vmul.f32 %v5071_v41, %v1631_v50  ;;  %v1632_v60 = vmul.f32 %v5105_v25, %v1103_v47 }
 0x21c   :  { %v3541_v1 = vadd.f32 %v5822_v21, %v3252_v51  ;;  %1889 = vst [vmem:[#allocation5 + $0x4b0] sm:$0xff] %v1633_v34  ;;  %v1634_v5 = vmul.f32 %v5131_v59, %v1360_v44  ;;  %v1107_v54 = vpop.f32.mrf.mxu0 }
 0x21d   :  { %v4290_v45 = vpop.eup %4289  ;;  %v1364_v56 = vpop.f32.mrf.mxu1  ;;  %v2548_v53 = vmul.f32 1.442695, %v2144_v16  ;;  %1888 = vst [vmem:[#allocation5 + $0x4a8] sm:$0xff] %v1632_v60  ;;  %v1639_v10 = vmul.f32 %v5093_v7, %v1107_v54 }
 0x21e   :  { %3778 = vadd.xlane.f32.xlu0 %v3541_v1  ;;  %1890 = vst [vmem:[#allocation5 + $0x4b8] sm:$0xff] %v1634_v5  ;;  %v1641_v21 = vmul.f32 %v5096_v9, %v1364_v56  ;;  %v3260_v0 = vsel %vm3140_vm1, %v4290_v45, 0.0  ;;  %v1109_v46 = vpop.f32.mrf.mxu0 }
 0x21f   :  { %v1366_v57 = vpop.f32.mrf.mxu1  ;;  %v3542_v13 = vadd.f32 %v5842_v43, %v3260_v0  ;;  %4297 = vpow2.f32 %v2548_v53  ;;  %1895 = vst [vmem:[#allocation5 + $0x4e0] sm:$0xff] %v1639_v10  ;;  %v2152_v14 = vmul.f32 %v5071_v41, %v1639_v10  ;;  %v1640_v26 = vmul.f32 %v5105_v25, %v1109_v46 }
 0x220   :  { %1897 = vst [vmem:[#allocation5 + $0x4f0] sm:$0xff] %v1641_v21  ;;  %v1642_v24 = vmul.f32 %v5131_v59, %v1366_v57  ;;  %v4292_v3 = vpop.eup %4291  ;;  %v1113_v63 = vpop.f32.mrf.mxu0 }
 0x221   :  { %v1370_v30 = vpop.f32.mrf.mxu1  ;;  %3780 = vadd.xlane.f32.xlu1 %v3542_v13  ;;  %v2564_v4 = vmul.f32 1.442695, %v2152_v14  ;;  %1896 = vst [vmem:[#allocation5 + $0x4e8] sm:$0xff] %v1640_v26  ;;  %v1647_v38 = vmul.f32 %v5093_v7, %v1113_v63  ;;  %v3268_v6 = vsel %vm3140_vm1, %v4292_v3, 0.0 }
 0x222   :  { %1898 = vst [vmem:[#allocation5 + $0x4f8] sm:$0xff] %v1642_v24  ;;  %v1649_v43 = vmul.f32 %v5096_v9, %v1370_v30  ;;  %v1115_v23 = vpop.f32.mrf.mxu0  ;;  %v3543_v11 = vadd.f32 %v5845_v22, %v3268_v6 }
 0x223   :  { %v1372_v33 = vpop.f32.mrf.mxu1  ;;  %4299 = vpow2.f32 %v2564_v4  ;;  %1903 = vst [vmem:[#allocation5 + $0x520] sm:$0xff] %v1647_v38  ;;  %v2160_v27 = vmul.f32 %v5071_v41, %v1647_v38  ;;  %v1648_v48 = vmul.f32 %v5105_v25, %v1115_v23 }
 0x224   :  { %1905 = vst [vmem:[#allocation5 + $0x530] sm:$0xff] %v1649_v43  ;;  %v1650_v58 = vmul.f32 %v5131_v59, %v1372_v33  ;;  %v4294_v40 = vpop.eup %4293  ;;  %v1119_v17 = vpop.f32.mrf.mxu0  ;;  %3782 = vadd.xlane.f32.xlu0 %v3543_v11 }
 0x225   :  { %v1376_v20 = vpop.f32.mrf.mxu1  ;;  %v2580_v15 = vmul.f32 1.442695, %v2160_v27  ;;  %1904 = vst [vmem:[#allocation5 + $0x528] sm:$0xff] %v1648_v48  ;;  %v1655_v29 = vmul.f32 %v5093_v7, %v1119_v17  ;;  %v3276_v37 = vsel %vm3140_vm1, %v4294_v40, 0.0  ;;  %v6436_v17 = vld [vmem:[#allocation10_spill] sm:$0xff] }
 0x226   :  { %1906 = vst [vmem:[#allocation5 + $0x538] sm:$0xff] %v1650_v58  ;;  %v1657_v22 = vmul.f32 %v5096_v9, %v1376_v20  ;;  %v1121_v18 = vpop.f32.mrf.mxu0  ;;  %v3544_v50 = vadd.f32 %v5848_v2, %v3276_v37 }
 0x227   :  { %v1378_v19 = vpop.f32.mrf.mxu1  ;;  %4301 = vpow2.f32 %v2580_v15  ;;  %1911 = vst [vmem:[#allocation5 + $0x560] sm:$0xff] %v1655_v29  ;;  %v2168_v34 = vmul.f32 %v5071_v41, %v1655_v29  ;;  %v1656_v51 = vmul.f32 %v5105_v25, %v1121_v18 }
 0x228   :  { %1913 = vst [vmem:[#allocation5 + $0x570] sm:$0xff] %v1657_v22  ;;  %v1658_v47 = vmul.f32 %v5131_v59, %v1378_v19  ;;  %v4296_v44 = vpop.eup %4295  ;;  %v1125_v1 = vpop.f32.mrf.mxu0  ;;  %3784 = vadd.xlane.f32.xlu1 %v3544_v50 }
 0x229   :  { %v1382_v16 = vpop.f32.mrf.mxu1  ;;  %v2596_v60 = vmul.f32 1.442695, %v2168_v34  ;;  %1912 = vst [vmem:[#allocation5 + $0x568] sm:$0xff] %v1656_v51  ;;  %v1663_v5 = vmul.f32 %v5093_v7, %v1125_v1  ;;  %v3284_v45 = vsel %vm3140_vm1, %v4296_v44, 0.0 }
 0x22a   :  { %1914 = vst [vmem:[#allocation5 + $0x578] sm:$0xff] %v1658_v47  ;;  %v1665_v2 = vmul.f32 %v5096_v9, %v1382_v16  ;;  %v1127_v54 = vpop.f32.mrf.mxu0  ;;  %v3545_v53 = vadd.f32 %v5866_v36, %v3284_v45  ;;  %v6437_v16 = vld [vmem:[#allocation14_spill] sm:$0xff] }
 0x22b   :  { %v1384_v56 = vpop.f32.mrf.mxu1  ;;  %4303 = vpow2.f32 %v2596_v60  ;;  %1919 = vst [vmem:[#allocation5 + $0x5a0] sm:$0xff] %v1663_v5  ;;  %v2176_v10 = vmul.f32 %v5071_v41, %v1663_v5  ;;  %v1664_v21 = vmul.f32 %v5105_v25, %v1127_v54 }
 0x22c   :  { %1921 = vst [vmem:[#allocation5 + $0x5b0] sm:$0xff] %v1665_v2  ;;  %v1666_v0 = vmul.f32 %v5131_v59, %v1384_v56  ;;  %v4298_v46 = vpop.eup %4297  ;;  %v1131_v57 = vpop.f32.mrf.mxu0  ;;  %3786 = vadd.xlane.f32.xlu0 %v3545_v53 }
 0x22d   :  { %v1388_v13 = vpop.f32.mrf.mxu1  ;;  %v2612_v14 = vmul.f32 1.442695, %v2176_v10  ;;  %1920 = vst [vmem:[#allocation5 + $0x5a8] sm:$0xff] %v1664_v21  ;;  %v1671_v26 = vmul.f32 %v5093_v7, %v1131_v57  ;;  %v3292_v24 = vsel %vm3140_vm1, %v4298_v46, 0.0 }
 0x22e   :  { %1922 = vst [vmem:[#allocation5 + $0x5b8] sm:$0xff] %v1666_v0  ;;  %v1673_v36 = vmul.f32 %v5096_v9, %v1388_v13  ;;  %v1133_v3 = vpop.f32.mrf.mxu0  ;;  %v3546_v30 = vadd.f32 %v5878_v39, %v3292_v24 }
 0x22f   :  { %v1390_v63 = vpop.f32.mrf.mxu1  ;;  %4305 = vpow2.f32 %v2612_v14  ;;  %1927 = vst [vmem:[#allocation5 + $0x5e0] sm:$0xff] %v1671_v26  ;;  %v2184_v4 = vmul.f32 %v5071_v41, %v1671_v26  ;;  %v1672_v38 = vmul.f32 %v5105_v25, %v1133_v3 }
 0x230   :  { %1929 = vst [vmem:[#allocation5 + $0x5f0] sm:$0xff] %v1673_v36  ;;  %v1674_v43 = vmul.f32 %v5131_v59, %v1390_v63  ;;  %v4300_v6 = vpop.eup %4299  ;;  %v1137_v23 = vpop.f32.mrf.mxu0  ;;  %3788 = vadd.xlane.f32.xlu1 %v3546_v30 }
 0x231   :  { %v1394_v33 = vpop.f32.mrf.mxu1  ;;  %v2628_v11 = vmul.f32 1.442695, %v2184_v4  ;;  %1928 = vst [vmem:[#allocation5 + $0x5e8] sm:$0xff] %v1672_v38  ;;  %v1679_v27 = vmul.f32 %v5093_v7, %v1137_v23  ;;  %v3300_v48 = vsel %vm3140_vm1, %v4300_v6, 0.0 }
 0x232   :  { %1930 = vst [vmem:[#allocation5 + $0x5f8] sm:$0xff] %v1674_v43  ;;  %v1681_v39 = vmul.f32 %v5096_v9, %v1394_v33  ;;  %v1139_v58 = vpop.f32.mrf.mxu0  ;;  %v3547_v20 = vadd.f32 %v6436_v17, %v3300_v48 }
 0x233   :  { %v1396_v40 = vpop.f32.mrf.mxu1  ;;  %4307 = vpow2.f32 %v2628_v11  ;;  %1935 = vst [vmem:[#allocation5 + $0x620] sm:$0xff] %v1679_v27  ;;  %v2192_v15 = vmul.f32 %v5071_v41, %v1679_v27  ;;  %v1680_v29 = vmul.f32 %v5105_v25, %v1139_v58 }
 0x234   :  { %1937 = vst [vmem:[#allocation5 + $0x630] sm:$0xff] %v1681_v39  ;;  %v1682_v22 = vmul.f32 %v5131_v59, %v1396_v40  ;;  %v4302_v37 = vpop.eup %4301  ;;  %v1143_v18 = vpop.f32.mrf.mxu0  ;;  %3790 = vadd.xlane.f32.xlu0 %v3547_v20 }
 0x235   :  { %v1400_v19 = vpop.f32.mrf.mxu1  ;;  %v2644_v50 = vmul.f32 1.442695, %v2192_v15  ;;  %1936 = vst [vmem:[#allocation5 + $0x628] sm:$0xff] %v1680_v29  ;;  %v1687_v34 = vmul.f32 %v5093_v7, %v1143_v18  ;;  %v3308_v47 = vsel %vm3140_vm1, %v4302_v37, 0.0 }
 0x236   :  { %1938 = vst [vmem:[#allocation5 + $0x638] sm:$0xff] %v1682_v22  ;;  %v1689_v51 = vmul.f32 %v5096_v9, %v1400_v19  ;;  %v1145_v44 = vpop.f32.mrf.mxu0  ;;  %v3548_v60 = vadd.f32 %v6437_v16, %v3308_v47 }
 0x237   :  { %v1402_v1 = vpop.f32.mrf.mxu1  ;;  %4309 = vpow2.f32 %v2644_v50  ;;  %1943 = vst [vmem:[#allocation5 + $0x660] sm:$0xff] %v1687_v34  ;;  %v2200_v5 = vmul.f32 %v5071_v41, %v1687_v34  ;;  %v1688_v2 = vmul.f32 %v5105_v25, %v1145_v44 }
 0x238   :  { %1945 = vst [vmem:[#allocation5 + $0x670] sm:$0xff] %v1689_v51  ;;  %v1690_v45 = vmul.f32 %v5131_v59, %v1402_v1  ;;  %v4304_v54 = vpop.eup %4303  ;;  %v1149_v56 = vpop.f32.mrf.mxu0  ;;  %3792 = vadd.xlane.f32.xlu1 %v3548_v60 }
 0x239   :  { %v1406_v53 = vpop.f32.mrf.mxu1  ;;  %v2660_v10 = vmul.f32 1.442695, %v2200_v5  ;;  %1944 = vst [vmem:[#allocation5 + $0x668] sm:$0xff] %v1688_v2  ;;  %v1695_v21 = vmul.f32 %v5093_v7, %v1149_v56  ;;  %v3316_v46 = vsel %vm3140_vm1, %v4304_v54, 0.0 }
 0x23a   :  { %1946 = vst [vmem:[#allocation5 + $0x678] sm:$0xff] %v1690_v45  ;;  %v1697_v0 = vmul.f32 %v5096_v9, %v1406_v53  ;;  %v1151_v57 = vpop.f32.mrf.mxu0  ;;  %v3549_v14 = vadd.f32 %v5908_v8, %v3316_v46 }
 0x23b   :  { %v1408_v13 = vpop.f32.mrf.mxu1  ;;  %4311 = vpow2.f32 %v2660_v10  ;;  %1951 = vst [vmem:[#allocation5 + $0x6a0] sm:$0xff] %v1695_v21  ;;  %v2208_v26 = vmul.f32 %v5071_v41, %v1695_v21  ;;  %v1696_v36 = vmul.f32 %v5105_v25, %v1151_v57 }
 0x23c   :  { %1953 = vst [vmem:[#allocation5 + $0x6b0] sm:$0xff] %v1697_v0  ;;  %v1698_v24 = vmul.f32 %v5131_v59, %v1408_v13  ;;  %v4306_v3 = vpop.eup %4305  ;;  %v1155_v63 = vpop.f32.mrf.mxu0  ;;  %3794 = vadd.xlane.f32.xlu0 %v3549_v14 }
 0x23d   :  { %v1412_v30 = vpop.f32.mrf.mxu1  ;;  %v2676_v4 = vmul.f32 1.442695, %v2208_v26  ;;  %1952 = vst [vmem:[#allocation5 + $0x6a8] sm:$0xff] %v1696_v36  ;;  %v1703_v38 = vmul.f32 %v5093_v7, %v1155_v63  ;;  %v3324_v43 = vsel %vm3140_vm1, %v4306_v3, 0.0 }
 0x23e   :  { %1954 = vst [vmem:[#allocation5 + $0x6b8] sm:$0xff] %v1698_v24  ;;  %v1705_v8 = vmul.f32 %v5096_v9, %v1412_v30  ;;  %v1157_v6 = vpop.f32.mrf.mxu0  ;;  %v3550_v33 = vadd.f32 %v5911_v52, %v3324_v43 }
 0x23f   :  { %v1414_v23 = vpop.f32.mrf.mxu1  ;;  %4313 = vpow2.f32 %v2676_v4  ;;  %1959 = vst [vmem:[#allocation5 + $0x6e0] sm:$0xff] %v1703_v38  ;;  %v2216_v11 = vmul.f32 %v5071_v41, %v1703_v38  ;;  %v1704_v27 = vmul.f32 %v5105_v25, %v1157_v6 }
 0x240   :  { %1961 = vst [vmem:[#allocation5 + $0x6f0] sm:$0xff] %v1705_v8  ;;  %v1706_v39 = vmul.f32 %v5131_v59, %v1414_v23  ;;  %v4308_v48 = vpop.eup %4307  ;;  %v1161_v58 = vpop.f32.mrf.mxu0  ;;  %3796 = vadd.xlane.f32.xlu1 %v3550_v33 }
 0x241   :  { %v1418_v40 = vpop.f32.mrf.mxu1  ;;  %v2692_v17 = vmul.f32 1.442695, %v2216_v11  ;;  %1960 = vst [vmem:[#allocation5 + $0x6e8] sm:$0xff] %v1704_v27  ;;  %v1711_v20 = vmul.f32 %v5093_v7, %v1161_v58  ;;  %v3332_v15 = vsel %vm3140_vm1, %v4308_v48, 0.0 }
 0x242   :  { %1962 = vst [vmem:[#allocation5 + $0x6f8] sm:$0xff] %v1706_v39  ;;  %v1713_v52 = vmul.f32 %v5096_v9, %v1418_v40  ;;  %v1163_v29 = vpop.f32.mrf.mxu0  ;;  %v3551_v37 = vadd.f32 %v5914_v62, %v3332_v15 }
 0x243   :  { %v1420_v22 = vpop.f32.mrf.mxu1  ;;  %4315 = vpow2.f32 %v2692_v17  ;;  %1967 = vst [vmem:[#allocation5 + $0x720] sm:$0xff] %v1711_v20  ;;  %v2224_v18 = vmul.f32 %v5071_v41, %v1711_v20  ;;  %v1712_v19 = vmul.f32 %v5105_v25, %v1163_v29 }
 0x244   :  { %1969 = vst [vmem:[#allocation5 + $0x730] sm:$0xff] %v1713_v52  ;;  %v1714_v50 = vmul.f32 %v5131_v59, %v1420_v22  ;;  %v4310_v34 = vpop.eup %4309  ;;  %v1167_v51 = vpop.f32.mrf.mxu0  ;;  %3798 = vadd.xlane.f32.xlu0 %v3551_v37 }
 0x245   :  { %v1424_v47 = vpop.f32.mrf.mxu1  ;;  %v2708_v44 = vmul.f32 1.442695, %v2224_v18  ;;  %1968 = vst [vmem:[#allocation5 + $0x728] sm:$0xff] %v1712_v19  ;;  %v1719_v1 = vmul.f32 %v5093_v7, %v1167_v51  ;;  %v3340_v16 = vsel %vm3140_vm1, %v4310_v34, 0.0 }
 0x246   :  { %1970 = vst [vmem:[#allocation5 + $0x738] sm:$0xff] %v1714_v50  ;;  %v1721_v62 = vmul.f32 %v5096_v9, %v1424_v47  ;;  %v1169_v60 = vpop.f32.mrf.mxu0  ;;  %v3552_v2 = vadd.f32 %v5932_v42, %v3340_v16 }
 0x247   :  { %v1426_v5 = vpop.f32.mrf.mxu1  ;;  %4317 = vpow2.f32 %v2708_v44  ;;  %1975 = vst [vmem:[#allocation5 + $0x760] sm:$0xff] %v1719_v1  ;;  %v2232_v45 = vmul.f32 %v5071_v41, %v1719_v1  ;;  %v1720_v54 = vmul.f32 %v5105_v25, %v1169_v60 }
 0x248   :  { %1977 = vst [vmem:[#allocation5 + $0x770] sm:$0xff] %v1721_v62  ;;  %v1722_v56 = vmul.f32 %v5131_v59, %v1426_v5  ;;  %v4312_v53 = vpop.eup %4311  ;;  %v1173_v10 = vpop.f32.mrf.mxu0  ;;  %3800 = vadd.xlane.f32.xlu1 %v3552_v2 }
 0x249   :  { %v1430_v21 = vpop.f32.mrf.mxu1  ;;  %v2724_v0 = vmul.f32 1.442695, %v2232_v45  ;;  %1976 = vst [vmem:[#allocation5 + $0x768] sm:$0xff] %v1720_v54  ;;  %v1727_v46 = vmul.f32 %v5093_v7, %v1173_v10  ;;  %v3348_v57 = vsel %vm3140_vm1, %v4312_v53, 0.0 }
 0x24a   :  { %1978 = vst [vmem:[#allocation5 + $0x778] sm:$0xff] %v1722_v56  ;;  %v1729_v42 = vmul.f32 %v5096_v9, %v1430_v21  ;;  %v1175_v13 = vpop.f32.mrf.mxu0  ;;  %v3553_v26 = vadd.f32 %v5944_v61, %v3348_v57 }
 0x24b   :  { %v1432_v14 = vpop.f32.mrf.mxu1  ;;  %4319 = vpow2.f32 %v2724_v0  ;;  %1983 = vst [vmem:[#allocation5 + $0x7a0] sm:$0xff] %v1727_v46  ;;  %v2240_v36 = vmul.f32 %v5071_v41, %v1727_v46  ;;  %v1728_v24 = vmul.f32 %v5105_v25, %v1175_v13 }
 0x24c   :  { %1985 = vst [vmem:[#allocation5 + $0x7b0] sm:$0xff] %v1729_v42  ;;  %v1730_v3 = vmul.f32 %v5131_v59, %v1432_v14  ;;  %v4314_v63 = vpop.eup %4313  ;;  %v1179_v30 = vpop.f32.mrf.mxu0  ;;  %3802 = vadd.xlane.f32.xlu0 %v3553_v26 }
 0x24d   :  { %v1436_v4 = vpop.f32.mrf.mxu1  ;;  %v2740_v38 = vmul.f32 1.442695, %v2240_v36  ;;  %1984 = vst [vmem:[#allocation5 + $0x7a8] sm:$0xff] %v1728_v24  ;;  %v1735_v8 = vmul.f32 %v5093_v7, %v1179_v30  ;;  %v3356_v43 = vsel %vm3140_vm1, %v4314_v63, 0.0 }
 0x24e   :  { %1986 = vst [vmem:[#allocation5 + $0x7b8] sm:$0xff] %v1730_v3  ;;  %v1737_v61 = vmul.f32 %v5096_v9, %v1436_v4  ;;  %v1181_v6 = vpop.f32.mrf.mxu0  ;;  %v3554_v33 = vadd.f32 %v5947_v55, %v3356_v43 }
 0x24f   :  { %v1438_v23 = vpop.f32.mrf.mxu1  ;;  %4321 = vpow2.f32 %v2740_v38  ;;  %1991 = vst [vmem:[#allocation5 + $0x7e0] sm:$0xff] %v1735_v8  ;;  %v2248_v11 = vmul.f32 %v5071_v41, %v1735_v8  ;;  %v1736_v27 = vmul.f32 %v5105_v25, %v1181_v6 }
 0x250   :  { %1993 = vst [vmem:[#allocation5 + $0x7f0] sm:$0xff] %v1737_v61  ;;  %v1738_v39 = vmul.f32 %v5131_v59, %v1438_v23  ;;  %v4316_v48 = vpop.eup %4315  ;;  %3804 = vadd.xlane.f32.xlu1 %v3554_v33 }
 0x251   :  { %v2756_v7 = vmul.f32 1.442695, %v2248_v11  ;;  %1992 = vst [vmem:[#allocation5 + $0x7e8] sm:$0xff] %v1736_v27  ;;  %v3364_v9 = vsel %vm3140_vm1, %v4316_v48, 0.0 }
 0x252   :  { %1994 = vst [vmem:[#allocation5 + $0x7f8] sm:$0xff] %v1738_v39  ;;  %v3555_v58 = vadd.f32 %v5954_v12, %v3364_v9 }
 0x253   :  { %4323 = vpow2.f32 %v2756_v7 }
 0x254   :  { %v4318_v55 = vpop.eup %4317  ;;  %3806 = vadd.xlane.f32.xlu0 %v3555_v58 }
 0x255   :  { %v3372_v41 = vsel %vm3140_vm1, %v4318_v55, 0.0 }
 0x256   :  { %v3556_v25 = vadd.f32 %v5974_v31, %v3372_v41 }
 0x258   :  { %v4320_v40 = vpop.eup %4319  ;;  %3808 = vadd.xlane.f32.xlu1 %v3556_v25 }
 0x259   :  { %v3380_v59 = vsel %vm3140_vm1, %v4320_v40, 0.0 }
 0x25a   :  { %v3557_v17 = vadd.f32 %v5977_v35, %v3380_v59 }
 0x25c   :  { %v4322_v20 = vpop.eup %4321  ;;  %3810 = vadd.xlane.f32.xlu0 %v3557_v17 }
 0x25d   :  { %v3388_v12 = vsel %vm3140_vm1, %v4322_v20, 0.0 }
 0x25e   :  { %v3558_v52 = vadd.f32 %v5980_v28, %v3388_v12 }
 0x260   :  { %v4324_v15 = vpop.eup %4323  ;;  %3812 = vadd.xlane.f32.xlu1 %v3558_v52 }
 0x261   :  { %v3396_v29 = vsel %vm3140_vm1, %v4324_v15, 0.0 }
 0x262   :  { %v3559_v31 = vadd.f32 %v5994_v49, %v3396_v29 }
 0x264   :  { %3814 = vadd.xlane.f32.xlu0 %v3559_v31 }
 0x265   :  { %4348 = shalt.err (!%p4345_p9)
}
 0x266   :  { %s4365_s15 = smov 1024   ;;  %s4366_s16 = smov 64  }
 0x267   :  { %3860 = dma.vmem_to_hbm [thread:$0]  %s3855_s3, 32768, %s6283_s5, [#allocation6], %s4365_s15, %s4365_s15, %s4366_s16  }
 0x273   :  { %v3753_v32 = vpop.xlane.xlu0 %3752 }
 0x274   :  { %3817 = vst.msk [vmem:[%s6284_s6] sm:$0xff] %vm3816_vm2, %v3753_v32 }
 0x275   :  { %v3755_v35 = vpop.xlane.xlu1 %3754 }
 0x276   :  { %3818 = vst.msk [vmem:[%s6284_s6 + $0x8] sm:$0xff] %vm3816_vm2, %v3755_v35 }
 0x27a   :  { %v3757_v28 = vpop.xlane.xlu0 %3756 }
 0x27b   :  { %3819 = vst.msk [vmem:[%s6284_s6 + $0x10] sm:$0xff] %vm3816_vm2, %v3757_v28 }
 0x27e   :  { %v3759_v49 = vpop.xlane.xlu0 %3758 }
 0x27f   :  { %3820 = vst.msk [vmem:[%s6284_s6 + $0x18] sm:$0xff] %vm3816_vm2, %v3759_v49 }
 0x282   :  { %v3761_v22 = vpop.xlane.xlu1 %3760 }
 0x283   :  { %3821 = vst.msk [vmem:[%s6284_s6 + $0x20] sm:$0xff] %vm3816_vm2, %v3761_v22 }
 0x287   :  { %v3763_v37 = vpop.xlane.xlu0 %3762 }
 0x288   :  { %3822 = vst.msk [vmem:[%s6284_s6 + $0x28] sm:$0xff] %vm3816_vm2, %v3763_v37 }
 0x28b   :  { %v3765_v18 = vpop.xlane.xlu1 %3764 }
 0x28c   :  { %3823 = vst.msk [vmem:[%s6284_s6 + $0x30] sm:$0xff] %vm3816_vm2, %v3765_v18 }
 0x28f   :  { %v3767_v19 = vpop.xlane.xlu0 %3766 }
 0x290   :  { %3824 = vst.msk [vmem:[%s6284_s6 + $0x38] sm:$0xff] %vm3816_vm2, %v3767_v19 }
 0x293   :  { %v3769_v50 = vpop.xlane.xlu1 %3768 }
 0x294   :  { %3825 = vst.msk [vmem:[%s6284_s6 + $0x40] sm:$0xff] %vm3816_vm2, %v3769_v50 }
 0x296   :  { %v3771_v34 = vpop.xlane.xlu0 %3770 }
 0x297   :  { %3826 = vst.msk [vmem:[%s6284_s6 + $0x48] sm:$0xff] %vm3816_vm2, %v3771_v34 }
 0x299   :  { %v3773_v51 = vpop.xlane.xlu1 %3772 }
 0x29a   :  { %3827 = vst.msk [vmem:[%s6284_s6 + $0x50] sm:$0xff] %vm3816_vm2, %v3773_v51 }
 0x29d   :  { %v3775_v47 = vpop.xlane.xlu0 %3774 }
 0x29e   :  { %3828 = vst.msk [vmem:[%s6284_s6 + $0x58] sm:$0xff] %vm3816_vm2, %v3775_v47 }
 0x2a2   :  { %v3777_v44 = vpop.xlane.xlu1 %3776 }
 0x2a3   :  { %3829 = vst.msk [vmem:[%s6284_s6 + $0x60] sm:$0xff] %vm3816_vm2, %v3777_v44 }
 0x2a7   :  { %v3779_v1 = vpop.xlane.xlu0 %3778 }
 0x2a8   :  { %3830 = vst.msk [vmem:[%s6284_s6 + $0x68] sm:$0xff] %vm3816_vm2, %v3779_v1 }
 0x2aa   :  { %v3781_v62 = vpop.xlane.xlu1 %3780 }
 0x2ab   :  { %3831 = vst.msk [vmem:[%s6284_s6 + $0x70] sm:$0xff] %vm3816_vm2, %v3781_v62 }
 0x2ad   :  { %v3783_v16 = vpop.xlane.xlu0 %3782 }
 0x2ae   :  { %3832 = vst.msk [vmem:[%s6284_s6 + $0x78] sm:$0xff] %vm3816_vm2, %v3783_v16 }
 0x2b1   :  { %v3785_v60 = vpop.xlane.xlu1 %3784 }
 0x2b2   :  { %3833 = vst.msk [vmem:[%s6284_s6 + $0x80] sm:$0xff] %vm3816_vm2, %v3785_v60 }
 0x2b5   :  { %v3787_v5 = vpop.xlane.xlu0 %3786 }
 0x2b6   :  { %3834 = vst.msk [vmem:[%s6284_s6 + $0x88] sm:$0xff] %vm3816_vm2, %v3787_v5 }
 0x2b9   :  { %v3789_v2 = vpop.xlane.xlu1 %3788 }
 0x2ba   :  { %3835 = vst.msk [vmem:[%s6284_s6 + $0x90] sm:$0xff] %vm3816_vm2, %v3789_v2 }
 0x2bd   :  { %v3791_v45 = vpop.xlane.xlu0 %3790 }
 0x2be   :  { %3836 = vst.msk [vmem:[%s6284_s6 + $0x98] sm:$0xff] %vm3816_vm2, %v3791_v45 }
 0x2c1   :  { %v3793_v54 = vpop.xlane.xlu1 %3792 }
 0x2c2   :  { %3837 = vst.msk [vmem:[%s6284_s6 + $0xa0] sm:$0xff] %vm3816_vm2, %v3793_v54 }
 0x2c5   :  { %v3795_v56 = vpop.xlane.xlu0 %3794 }
 0x2c6   :  { %3838 = vst.msk [vmem:[%s6284_s6 + $0xa8] sm:$0xff] %vm3816_vm2, %v3795_v56 }
 0x2c9   :  { %v3797_v53 = vpop.xlane.xlu1 %3796 }
 0x2ca   :  { %3839 = vst.msk [vmem:[%s6284_s6 + $0xb0] sm:$0xff] %vm3816_vm2, %v3797_v53 }
 0x2cd   :  { %v3799_v10 = vpop.xlane.xlu0 %3798 }
 0x2ce   :  { %3840 = vst.msk [vmem:[%s6284_s6 + $0xb8] sm:$0xff] %vm3816_vm2, %v3799_v10 }
 0x2d1   :  { %v3801_v21 = vpop.xlane.xlu1 %3800 }
 0x2d2   :  { %3841 = vst.msk [vmem:[%s6284_s6 + $0xc0] sm:$0xff] %vm3816_vm2, %v3801_v21 }
 0x2d5   :  { %v3803_v0 = vpop.xlane.xlu0 %3802 }
 0x2d6   :  { %3842 = vst.msk [vmem:[%s6284_s6 + $0xc8] sm:$0xff] %vm3816_vm2, %v3803_v0 }
 0x2d9   :  { %v3805_v46 = vpop.xlane.xlu1 %3804 }
 0x2da   :  { %3843 = vst.msk [vmem:[%s6284_s6 + $0xd0] sm:$0xff] %vm3816_vm2, %v3805_v46 }
 0x2dd   :  { %v3807_v42 = vpop.xlane.xlu0 %3806 }
 0x2de   :  { %3844 = vst.msk [vmem:[%s6284_s6 + $0xd8] sm:$0xff] %vm3816_vm2, %v3807_v42 }
 0x2e1   :  { %v3809_v57 = vpop.xlane.xlu1 %3808 }
 0x2e2   :  { %3845 = vst.msk [vmem:[%s6284_s6 + $0xe0] sm:$0xff] %vm3816_vm2, %v3809_v57 }
 0x2e5   :  { %v3811_v13 = vpop.xlane.xlu0 %3810 }
 0x2e6   :  { %3846 = vst.msk [vmem:[%s6284_s6 + $0xe8] sm:$0xff] %vm3816_vm2, %v3811_v13 }
 0x2e9   :  { %v3813_v14 = vpop.xlane.xlu1 %3812 }
 0x2ea   :  { %3847 = vst.msk [vmem:[%s6284_s6 + $0xf0] sm:$0xff] %vm3816_vm2, %v3813_v14 }
 0x2ed   :  { %v3815_v26 = vpop.xlane.xlu0 %3814 }
 0x2ee   :  { %3848 = vst.msk [vmem:[%s6284_s6 + $0xf8] sm:$0xff] %vm3816_vm2, %v3815_v26 }
 0x2ef   :  { %4359 = dma.done.wait [#allocation6], 32768  }
 0x2f0   :  { %4360 = vsyncadd [#allocation6], 4294934528 }
 0x2f1   :  { %3868 = vsyncpa [#allocation6], 1 }

</bundles_post_ra>
